<compile_context>
chip_gen: v6e
topology: v6e:2x2x1
jax: 0.10.0
libtpu: 0.0.40
codegen_flags: <defaults>
</compile_context>

<pallas_src>
import jax
import jax.numpy as jnp
from jax.experimental import pallas as pl
from jax.experimental.pallas import tpu as pltpu


def basemodel_kernel(
    # ------- batched (tiled over batch) -------
    wemb_ref,      # [S, tb, E]    bf16   word embeddings, sequence-major
    v_ref,         # [tb, N, Dv]   bf16
    vmask_ref,     # [tb, N]       f32
    # ------- GRU (q_emb), gates fused (r|z|n) -------
    w_ih_ref,      # [E,  3Hq]     bf16
    w_hh_ref,      # [Hq, 3Hq]     bf16
    b_ih_ref,      # [1,  3Hq]     f32
    b_hh_ref,      # [1,  3Hq]     f32
    # ------- v_att -------
    wv_att_ref,    # [Dv, H]       bf16
    bv_att_ref,    # [1, H]        f32
    wq_att_ref,    # [Hq, H]       bf16
    bq_att_ref,    # [1, H]        f32
    w_att_ref,     # [1, H]        f32   (Linear(H,1) weight, folded elementwise)
    b_att_ref,     # [1, 1]        f32   (SMEM scalar)
    # ------- v_net / classifier -------
    wv1_ref,       # [Dv, H]       bf16
    bv1_ref,       # [1, H]        f32
    wc_ref,        # [H, Ap]       bf16  (Ap = A padded to 128)
    bc_ref,        # [1, Ap]       f32
    # ------- output -------
    logits_ref,    # [tb, Ap]      f32
):
    f32, bf16 = jnp.float32, jnp.bfloat16
    S, tb, E = wemb_ref.shape
    _, N, Dv = v_ref.shape
    Hq = w_hh_ref.shape[0]
    H = wv_att_ref.shape[1]

    # ------------------------------------------------------------------
    # q_emb: single-layer GRU, return last hidden state.
    # Input projections hoisted out of the recurrence as one big matmul.
    # ------------------------------------------------------------------
    x = wemb_ref[...].reshape(S * tb, E)                        # bf16
    xp = (jnp.dot(x, w_ih_ref[...], preferred_element_type=f32)
          + b_ih_ref[...])                                      # [S*tb, 3Hq] f32
    xp = xp.reshape(S, tb, 3 * Hq)

    w_hh = w_hh_ref[...]                                        # hoisted loads
    b_hh = b_hh_ref[...]

    h = jnp.zeros((tb, Hq), dtype=f32)
    # Fully unrolled recurrence (S is static & small): only the unavoidable
    # h-dependent fused matmul remains inside each step.
    for t in range(S):
        xpt = xp[t]                                             # [tb, 3Hq] lane-dense
        hp = (jnp.dot(h.astype(bf16), w_hh, preferred_element_type=f32)
              + b_hh)                                           # [tb, 3Hq]
        r = jax.nn.sigmoid(xpt[:, :Hq] + hp[:, :Hq])
        z = jax.nn.sigmoid(xpt[:, Hq:2 * Hq] + hp[:, Hq:2 * Hq])
        n = jnp.tanh(xpt[:, 2 * Hq:] + r * hp[:, 2 * Hq:])
        h = (1.0 - z) * n + z * h
    q_emb = h                                                   # [tb, Hq] f32

    # ------------------------------------------------------------------
    # v_att: att[b, n] = Linear_1( ReLU(v Wv + bv) * ReLU(q Wq + bq) )
    # Linear_1's weight (w_att) is folded elementwise into the q projection.
    # ------------------------------------------------------------------
    v3 = v_ref[...]                                             # [tb, N, Dv] bf16
    vproj = jnp.maximum(
        jnp.dot(v3.reshape(tb * N, Dv), wv_att_ref[...],
                preferred_element_type=f32) + bv_att_ref[...], 0.0)   # [tb*N, H]
    qproj = jnp.maximum(
        jnp.dot(q_emb.astype(bf16), wq_att_ref[...],
                preferred_element_type=f32) + bq_att_ref[...], 0.0)   # [tb, H]
    qw = qproj * w_att_ref[...]                                 # [tb, H]

    # Per-tile temporary [tb, N, H] is bounded by the batch tile size.
    att = (jnp.sum(vproj.reshape(tb, N, H) * qw[:, None, :], axis=-1)
           + b_att_ref[0, 0])                                   # [tb, N]

    # ------------------------------------------------------------------
    # mask_softmax.  NOTE: per-row max (reference uses a GLOBAL tensor max);
    # with the +1e-5 denominator the results differ only at O(1e-5).
    # ------------------------------------------------------------------
    mask = vmask_ref[...]                                       # [tb, N] f32
    att = att - jnp.max(att, axis=1, keepdims=True)
    x3 = jnp.exp(att) * mask
    attw = x3 / (jnp.sum(x3, axis=1, keepdims=True) + 1e-5)     # [tb, N]

    # attention-weighted pooling: v_emb = (att * v).sum(1)
    v_emb = jnp.sum(attw[:, :, None] * v3, axis=1)              # [tb, Dv] f32

    # ------------------------------------------------------------------
    # v_net (Linear+ReLU) and classifier (Linear).
    # q_net / joint_repr are dead when labels is None (reference only feeds
    # v_repr into the classifier) and are intentionally not computed.
    # ------------------------------------------------------------------
    v_repr = jnp.maximum(
        jnp.dot(v_emb.astype(bf16), wv1_ref[...],
                preferred_element_type=f32) + bv1_ref[...], 0.0)      # [tb, H]
    logits_ref[...] = (jnp.dot(v_repr.astype(bf16), wc_ref[...],
                               preferred_element_type=f32) + bc_ref[...])


def base_model_forward(params, v, s, q, labels, bias, v_mask, *, block_b=16):
    """Mirrors BaseModel.forward(v, s, q, labels, bias, v_mask) -> (logits, loss, w_emb).

    block_b: rows of the batch per grid step (multiple of 16).  Use 128-512 on
    v5e/v6e; roughly half the working set on v7x (64 MiB VMEM).
    """
    del s, bias  # unused when labels is None (matches the reference path)
    assert labels is None, "TODO(synk): debias_loss_fn loss path not implemented"
    assert block_b % 16 == 0

    f32, bf16 = jnp.float32, jnp.bfloat16

    # w_emb: embedding lookup (glue — gather stays in plain JAX/XLA).
    w_emb = params["emb_table"][q].astype(f32)                  # [B, S, E] (returned)
    B, S, E = w_emb.shape
    _, N, Dv = v.shape
    A = params["wc"].shape[1]

    if v_mask is None:
        # reference softmax path; differs from F.softmax only by the +1e-5 eps
        v_mask = jnp.ones((B, N), f32)

    # ---- static padding: batch -> multiple of block_b, classifier lanes -> 128
    Bp = -(-B // block_b) * block_b
    Ap = -(-A // 128) * 128
    pb = Bp - B

    wemb_seq = jnp.transpose(w_emb, (1, 0, 2))                  # [S, B, E]
    v_in = v.astype(bf16)
    m_in = v_mask.astype(f32)
    if pb:
        wemb_seq = jnp.pad(wemb_seq, ((0, 0), (0, pb), (0, 0)))
        v_in = jnp.pad(v_in, ((0, pb), (0, 0), (0, 0)))
        m_in = jnp.pad(m_in, ((0, pb), (0, 0)))
    wemb_seq = wemb_seq.astype(bf16)

    # ---- fuse the GRU gate weights (r|z|n) into single wide matmuls
    w_ih = jnp.concatenate([params["gru_wih"][g] for g in range(3)], 1).astype(bf16)  # [E, 3Hq]
    w_hh = jnp.concatenate([params["gru_whh"][g] for g in range(3)], 1).astype(bf16)  # [Hq,3Hq]
    b_ih = jnp.concatenate([params["gru_bih"][g] for g in range(3)], 1).astype(f32)   # [1, 3Hq]
    b_hh = jnp.concatenate([params["gru_bhh"][g] for g in range(3)], 1).astype(f32)   # [1, 3Hq]

    # ---- lane-pad classifier to Ap
    wc_p = jnp.pad(params["wc"], ((0, 0), (0, Ap - A))).astype(bf16)
    bc_p = jnp.pad(params["bc"], ((0, 0), (0, Ap - A))).astype(f32)

    def full_vmem(x):
        nd = x.ndim
        return pl.BlockSpec(x.shape, lambda i, _n=nd: (0,) * _n)   # VMEM-resident

    operands_and_specs = [
        # batched operands (pipelined over the batch grid)
        (wemb_seq, pl.BlockSpec((S, block_b, E), lambda i: (0, i, 0))),
        (v_in,     pl.BlockSpec((block_b, N, Dv), lambda i: (i, 0, 0))),
        (m_in,     pl.BlockSpec((block_b, N),     lambda i: (i, 0))),
        # GRU weights
        (w_ih, None), (w_hh, None), (b_ih, None), (b_hh, None),
        # v_att weights
        (params["wv_att"].astype(bf16), None), (params["bv_att"].astype(f32), None),
        (params["wq_att"].astype(bf16), None), (params["bq_att"].astype(f32), None),
        (params["w_att"].astype(f32), None),
        (params["b_att"].astype(f32),
         pl.BlockSpec(memory_space=pltpu.MemorySpace.SMEM)),        # scalar bias
        # v_net / classifier weights
        (params["wv1"].astype(bf16), None), (params["bv1"].astype(f32), None),
        (wc_p, None), (bc_p, None),
    ]
    operands = [a for a, _ in operands_and_specs]
    in_specs = [sp if sp is not None else full_vmem(a) for a, sp in operands_and_specs]

    logits_pad = pl.pallas_call(
        basemodel_kernel,
        out_shape=jax.ShapeDtypeStruct((Bp, Ap), f32),
        grid=(Bp // block_b,),
        in_specs=in_specs,
        out_specs=pl.BlockSpec((block_b, Ap), lambda i: (i, 0)),
        compiler_params=pltpu.CompilerParams(
            dimension_semantics=("parallel",)),
    )(*operands)

    logits = logits_pad[:B, :A]
    loss = None
    return logits, loss, w_emb


def init_params(key, *, vocab, E, Hq, Dv, H, A):
    ks = jax.random.split(key, 16)

    def w(k, shape, scale=0.1):
        return (scale * jax.random.normal(k, shape)).astype(jnp.float32)

    return dict(
        emb_table=w(ks[0], (vocab, E)),
        gru_wih=w(ks[1], (3, E, Hq)),
        gru_whh=w(ks[2], (3, Hq, Hq)),
        gru_bih=w(ks[3], (3, 1, Hq)),
        gru_bhh=w(ks[4], (3, 1, Hq)),
        wv_att=w(ks[5], (Dv, H)),
        bv_att=w(ks[6], (1, H)),
        wq_att=w(ks[7], (Hq, H)),
        bq_att=w(ks[8], (1, H)),
        w_att=w(ks[9], (1, H)),
        b_att=w(ks[10], (1, 1)),
        wq1=w(ks[11], (Hq, H)),      # kept for parity with the module (q_net);
        bq1=w(ks[12], (1, H)),       # unused on the labels=None forward path
        wv1=w(ks[13], (Dv, H)),
        bv1=w(ks[14], (1, H)),
        wc=w(ks[15], (H, A)),
        bc=jnp.zeros((1, A), jnp.float32),
    )


if __name__ == "__main__":
    # Small shapes consistent with the module's forward:
    #   v: [batch, num_objs, obj_dim], q: [batch, seq_length]
    B, N, Dv = 32, 8, 128     # batch, num_objs, obj_dim
    S, E = 8, 32              # seq_length, word-embedding dim
    Hq, H, A = 128, 128, 16   # GRU hidden, joint hidden, num answers
    VOCAB = 64

    key = jax.random.PRNGKey(0)
    kp, kv, kq, km = jax.random.split(key, 4)

    params = init_params(kp, vocab=VOCAB, E=E, Hq=Hq, Dv=Dv, H=H, A=A)
    v = jax.random.normal(kv, (B, N, Dv), dtype=jnp.float32)
    q = jax.random.randint(kq, (B, S), 0, VOCAB)
    v_mask = (jax.random.uniform(km, (B, N)) > 0.25).astype(jnp.float32)

    logits, loss, w_emb = base_model_forward(
        params, v, s=None, q=q, labels=None, bias=None, v_mask=v_mask, block_b=16)

    jax.block_until_ready(logits)
    jax.block_until_ready(w_emb)
    assert logits.shape == (B, A) and w_emb.shape == (B, S, E) and loss is None
    assert bool(jnp.all(jnp.isfinite(logits)))
    print("KERNEL_OK")
</pallas_src>

<mosaic_0001>
module attributes {stable_mosaic.version = 11 : i64} {
  func.func @basemodel_kernel(%arg0: i32, %arg1: memref<8x16x32xbf16, #tpu.memory_space<vmem>>, %arg2: memref<16x8x128xbf16, #tpu.memory_space<vmem>>, %arg3: memref<16x8xf32, #tpu.memory_space<vmem>>, %arg4: memref<32x384xbf16, #tpu.memory_space<vmem>>, %arg5: memref<128x384xbf16, #tpu.memory_space<vmem>>, %arg6: memref<1x384xf32, #tpu.memory_space<vmem>>, %arg7: memref<1x384xf32, #tpu.memory_space<vmem>>, %arg8: memref<128x128xbf16, #tpu.memory_space<vmem>>, %arg9: memref<1x128xf32, #tpu.memory_space<vmem>>, %arg10: memref<128x128xbf16, #tpu.memory_space<vmem>>, %arg11: memref<1x128xf32, #tpu.memory_space<vmem>>, %arg12: memref<1x128xf32, #tpu.memory_space<vmem>>, %arg13: memref<1x1xf32, #tpu.memory_space<smem>>, %arg14: memref<128x128xbf16, #tpu.memory_space<vmem>>, %arg15: memref<1x128xf32, #tpu.memory_space<vmem>>, %arg16: memref<128x128xbf16, #tpu.memory_space<vmem>>, %arg17: memref<1x128xf32, #tpu.memory_space<vmem>>, %arg18: memref<16x128xf32, #tpu.memory_space<vmem>>) attributes {dimension_semantics = [#tpu.dimension_semantics<parallel>], iteration_bounds = array<i64: 2>, scalar_prefetch = 0 : i64, scratch_operands = 0 : i64, tpu.core_type = #tpu.core_type<tc>, window_params = [{transform_indices = @transform_0, window_bounds = array<i64: 8, 16, 32>}, {transform_indices = @transform_1, window_bounds = array<i64: 16, 8, 128>}, {transform_indices = @transform_2, window_bounds = array<i64: 16, 8>}, {pipeline_mode = #tpu.pipeline_mode<synchronous>, transform_indices = @transform_3, window_bounds = array<i64: 32, 384>}, {pipeline_mode = #tpu.pipeline_mode<synchronous>, transform_indices = @transform_4, window_bounds = array<i64: 128, 384>}, {pipeline_mode = #tpu.pipeline_mode<synchronous>, transform_indices = @transform_5, window_bounds = array<i64: 1, 384>}, {pipeline_mode = #tpu.pipeline_mode<synchronous>, transform_indices = @transform_6, window_bounds = array<i64: 1, 384>}, {pipeline_mode = #tpu.pipeline_mode<synchronous>, transform_indices = @transform_7, window_bounds = array<i64: 128, 128>}, {pipeline_mode = #tpu.pipeline_mode<synchronous>, transform_indices = @transform_8, window_bounds = array<i64: 1, 128>}, {pipeline_mode = #tpu.pipeline_mode<synchronous>, transform_indices = @transform_9, window_bounds = array<i64: 128, 128>}, {pipeline_mode = #tpu.pipeline_mode<synchronous>, transform_indices = @transform_10, window_bounds = array<i64: 1, 128>}, {pipeline_mode = #tpu.pipeline_mode<synchronous>, transform_indices = @transform_11, window_bounds = array<i64: 1, 128>}, {transform_indices = @transform_12, window_bounds = array<i64: 1, 1>}, {pipeline_mode = #tpu.pipeline_mode<synchronous>, transform_indices = @transform_13, window_bounds = array<i64: 128, 128>}, {pipeline_mode = #tpu.pipeline_mode<synchronous>, transform_indices = @transform_14, window_bounds = array<i64: 1, 128>}, {pipeline_mode = #tpu.pipeline_mode<synchronous>, transform_indices = @transform_15, window_bounds = array<i64: 128, 128>}, {pipeline_mode = #tpu.pipeline_mode<synchronous>, transform_indices = @transform_16, window_bounds = array<i64: 1, 128>}, {transform_indices = @transform_17, window_bounds = array<i64: 16, 128>}]} {
    %c0 = arith.constant 0 : index
    %c0_0 = arith.constant 0 : index
    %c0_1 = arith.constant 0 : index
    %0 = vector.load %arg1[%c0, %c0_0, %c0_1] : memref<8x16x32xbf16, #tpu.memory_space<vmem>>, vector<8x16x32xbf16>
    %1 = vector.shape_cast %0 : vector<8x16x32xbf16> to vector<128x32xbf16>
    %c0_2 = arith.constant 0 : index
    %c0_3 = arith.constant 0 : index
    %2 = vector.load %arg4[%c0_2, %c0_3] : memref<32x384xbf16, #tpu.memory_space<vmem>>, vector<32x384xbf16>
    %cst = arith.constant dense<0.000000e+00> : vector<128x384xf32>
    %3 = tpu.matmul %1, %2, %cst {dimension_numbers = #tpu.dot_dimension_numbers<[1], [0], [0], [1], [0, 0, 1, 1], [], []>} : vector<128x32xbf16>, vector<32x384xbf16>, vector<128x384xf32> -> vector<128x384xf32>
    %c0_4 = arith.constant 0 : index
    %c0_5 = arith.constant 0 : index
    %4 = vector.load %arg6[%c0_4, %c0_5] : memref<1x384xf32, #tpu.memory_space<vmem>>, vector<1x384xf32>
    %5 = vector.broadcast %4 : vector<1x384xf32> to vector<128x384xf32>
    %6 = arith.addf %3, %5 : vector<128x384xf32>
    %7 = vector.shape_cast %6 : vector<128x384xf32> to vector<8x16x384xf32>
    %c0_6 = arith.constant 0 : index
    %c0_7 = arith.constant 0 : index
    %8 = vector.load %arg5[%c0_6, %c0_7] : memref<128x384xbf16, #tpu.memory_space<vmem>>, vector<128x384xbf16>
    %c0_8 = arith.constant 0 : index
    %c0_9 = arith.constant 0 : index
    %9 = vector.load %arg7[%c0_8, %c0_9] : memref<1x384xf32, #tpu.memory_space<vmem>>, vector<1x384xf32>
    %cst_10 = arith.constant 0.000000e+00 : f32
    %10 = vector.broadcast %cst_10 : f32 to vector<16x128xf32>
    %11 = vector.extract_strided_slice %7 {offsets = [0, 0, 0], sizes = [1, 16, 384], strides = [1, 1, 1]} : vector<8x16x384xf32> to vector<1x16x384xf32>
    %12 = vector.shape_cast %11 : vector<1x16x384xf32> to vector<16x384xf32>
    %13 = arith.truncf %10 : vector<16x128xf32> to vector<16x128xbf16>
    %cst_11 = arith.constant dense<0.000000e+00> : vector<16x384xf32>
    %14 = tpu.matmul %13, %8, %cst_11 {dimension_numbers = #tpu.dot_dimension_numbers<[1], [0], [0], [1], [0, 0, 1, 1], [], []>} : vector<16x128xbf16>, vector<128x384xbf16>, vector<16x384xf32> -> vector<16x384xf32>
    %15 = vector.broadcast %9 : vector<1x384xf32> to vector<16x384xf32>
    %16 = arith.addf %14, %15 : vector<16x384xf32>
    %17 = vector.extract_strided_slice %12 {offsets = [0, 0], sizes = [16, 128], strides = [1, 1]} : vector<16x384xf32> to vector<16x128xf32>
    %18 = vector.extract_strided_slice %16 {offsets = [0, 0], sizes = [16, 128], strides = [1, 1]} : vector<16x384xf32> to vector<16x128xf32>
    %19 = arith.addf %17, %18 : vector<16x128xf32>
    %20 = arith.negf %19 : vector<16x128xf32>
    %21 = math.exp %20 : vector<16x128xf32>
    %cst_12 = arith.constant 1.000000e+00 : f32
    %22 = vector.broadcast %cst_12 : f32 to vector<16x128xf32>
    %23 = arith.addf %22, %21 : vector<16x128xf32>
    %24 = arith.divf %22, %23 : vector<16x128xf32>
    %25 = vector.extract_strided_slice %12 {offsets = [0, 128], sizes = [16, 128], strides = [1, 1]} : vector<16x384xf32> to vector<16x128xf32>
    %26 = vector.extract_strided_slice %16 {offsets = [0, 128], sizes = [16, 128], strides = [1, 1]} : vector<16x384xf32> to vector<16x128xf32>
    %27 = arith.addf %25, %26 : vector<16x128xf32>
    %28 = arith.negf %27 : vector<16x128xf32>
    %29 = math.exp %28 : vector<16x128xf32>
    %cst_13 = arith.constant 1.000000e+00 : f32
    %30 = vector.broadcast %cst_13 : f32 to vector<16x128xf32>
    %31 = arith.addf %30, %29 : vector<16x128xf32>
    %32 = arith.divf %30, %31 : vector<16x128xf32>
    %33 = vector.extract_strided_slice %12 {offsets = [0, 256], sizes = [16, 128], strides = [1, 1]} : vector<16x384xf32> to vector<16x128xf32>
    %34 = vector.extract_strided_slice %16 {offsets = [0, 256], sizes = [16, 128], strides = [1, 1]} : vector<16x384xf32> to vector<16x128xf32>
    %35 = arith.mulf %24, %34 : vector<16x128xf32>
    %36 = arith.addf %33, %35 : vector<16x128xf32>
    %37 = math.tanh %36 : vector<16x128xf32>
    %cst_14 = arith.constant 1.000000e+00 : f32
    %38 = vector.broadcast %cst_14 : f32 to vector<16x128xf32>
    %39 = arith.subf %38, %32 : vector<16x128xf32>
    %40 = arith.mulf %39, %37 : vector<16x128xf32>
    %41 = arith.mulf %32, %10 : vector<16x128xf32>
    %42 = arith.addf %40, %41 : vector<16x128xf32>
    %43 = vector.extract_strided_slice %7 {offsets = [1, 0, 0], sizes = [1, 16, 384], strides = [1, 1, 1]} : vector<8x16x384xf32> to vector<1x16x384xf32>
    %44 = vector.shape_cast %43 : vector<1x16x384xf32> to vector<16x384xf32>
    %45 = arith.truncf %42 : vector<16x128xf32> to vector<16x128xbf16>
    %cst_15 = arith.constant dense<0.000000e+00> : vector<16x384xf32>
    %46 = tpu.matmul %45, %8, %cst_15 {dimension_numbers = #tpu.dot_dimension_numbers<[1], [0], [0], [1], [0, 0, 1, 1], [], []>} : vector<16x128xbf16>, vector<128x384xbf16>, vector<16x384xf32> -> vector<16x384xf32>
    %47 = vector.broadcast %9 : vector<1x384xf32> to vector<16x384xf32>
    %48 = arith.addf %46, %47 : vector<16x384xf32>
    %49 = vector.extract_strided_slice %44 {offsets = [0, 0], sizes = [16, 128], strides = [1, 1]} : vector<16x384xf32> to vector<16x128xf32>
    %50 = vector.extract_strided_slice %48 {offsets = [0, 0], sizes = [16, 128], strides = [1, 1]} : vector<16x384xf32> to vector<16x128xf32>
    %51 = arith.addf %49, %50 : vector<16x128xf32>
    %52 = arith.negf %51 : vector<16x128xf32>
    %53 = math.exp %52 : vector<16x128xf32>
    %cst_16 = arith.constant 1.000000e+00 : f32
    %54 = vector.broadcast %cst_16 : f32 to vector<16x128xf32>
    %55 = arith.addf %54, %53 : vector<16x128xf32>
    %56 = arith.divf %54, %55 : vector<16x128xf32>
    %57 = vector.extract_strided_slice %44 {offsets = [0, 128], sizes = [16, 128], strides = [1, 1]} : vector<16x384xf32> to vector<16x128xf32>
    %58 = vector.extract_strided_slice %48 {offsets = [0, 128], sizes = [16, 128], strides = [1, 1]} : vector<16x384xf32> to vector<16x128xf32>
    %59 = arith.addf %57, %58 : vector<16x128xf32>
    %60 = arith.negf %59 : vector<16x128xf32>
    %61 = math.exp %60 : vector<16x128xf32>
    %cst_17 = arith.constant 1.000000e+00 : f32
    %62 = vector.broadcast %cst_17 : f32 to vector<16x128xf32>
    %63 = arith.addf %62, %61 : vector<16x128xf32>
    %64 = arith.divf %62, %63 : vector<16x128xf32>
    %65 = vector.extract_strided_slice %44 {offsets = [0, 256], sizes = [16, 128], strides = [1, 1]} : vector<16x384xf32> to vector<16x128xf32>
    %66 = vector.extract_strided_slice %48 {offsets = [0, 256], sizes = [16, 128], strides = [1, 1]} : vector<16x384xf32> to vector<16x128xf32>
    %67 = arith.mulf %56, %66 : vector<16x128xf32>
    %68 = arith.addf %65, %67 : vector<16x128xf32>
    %69 = math.tanh %68 : vector<16x128xf32>
    %cst_18 = arith.constant 1.000000e+00 : f32
    %70 = vector.broadcast %cst_18 : f32 to vector<16x128xf32>
    %71 = arith.subf %70, %64 : vector<16x128xf32>
    %72 = arith.mulf %71, %69 : vector<16x128xf32>
    %73 = arith.mulf %64, %42 : vector<16x128xf32>
    %74 = arith.addf %72, %73 : vector<16x128xf32>
    %75 = vector.extract_strided_slice %7 {offsets = [2, 0, 0], sizes = [1, 16, 384], strides = [1, 1, 1]} : vector<8x16x384xf32> to vector<1x16x384xf32>
    %76 = vector.shape_cast %75 : vector<1x16x384xf32> to vector<16x384xf32>
    %77 = arith.truncf %74 : vector<16x128xf32> to vector<16x128xbf16>
    %cst_19 = arith.constant dense<0.000000e+00> : vector<16x384xf32>
    %78 = tpu.matmul %77, %8, %cst_19 {dimension_numbers = #tpu.dot_dimension_numbers<[1], [0], [0], [1], [0, 0, 1, 1], [], []>} : vector<16x128xbf16>, vector<128x384xbf16>, vector<16x384xf32> -> vector<16x384xf32>
    %79 = vector.broadcast %9 : vector<1x384xf32> to vector<16x384xf32>
    %80 = arith.addf %78, %79 : vector<16x384xf32>
    %81 = vector.extract_strided_slice %76 {offsets = [0, 0], sizes = [16, 128], strides = [1, 1]} : vector<16x384xf32> to vector<16x128xf32>
    %82 = vector.extract_strided_slice %80 {offsets = [0, 0], sizes = [16, 128], strides = [1, 1]} : vector<16x384xf32> to vector<16x128xf32>
    %83 = arith.addf %81, %82 : vector<16x128xf32>
    %84 = arith.negf %83 : vector<16x128xf32>
    %85 = math.exp %84 : vector<16x128xf32>
    %cst_20 = arith.constant 1.000000e+00 : f32
    %86 = vector.broadcast %cst_20 : f32 to vector<16x128xf32>
    %87 = arith.addf %86, %85 : vector<16x128xf32>
    %88 = arith.divf %86, %87 : vector<16x128xf32>
    %89 = vector.extract_strided_slice %76 {offsets = [0, 128], sizes = [16, 128], strides = [1, 1]} : vector<16x384xf32> to vector<16x128xf32>
    %90 = vector.extract_strided_slice %80 {offsets = [0, 128], sizes = [16, 128], strides = [1, 1]} : vector<16x384xf32> to vector<16x128xf32>
    %91 = arith.addf %89, %90 : vector<16x128xf32>
    %92 = arith.negf %91 : vector<16x128xf32>
    %93 = math.exp %92 : vector<16x128xf32>
    %cst_21 = arith.constant 1.000000e+00 : f32
    %94 = vector.broadcast %cst_21 : f32 to vector<16x128xf32>
    %95 = arith.addf %94, %93 : vector<16x128xf32>
    %96 = arith.divf %94, %95 : vector<16x128xf32>
    %97 = vector.extract_strided_slice %76 {offsets = [0, 256], sizes = [16, 128], strides = [1, 1]} : vector<16x384xf32> to vector<16x128xf32>
    %98 = vector.extract_strided_slice %80 {offsets = [0, 256], sizes = [16, 128], strides = [1, 1]} : vector<16x384xf32> to vector<16x128xf32>
    %99 = arith.mulf %88, %98 : vector<16x128xf32>
    %100 = arith.addf %97, %99 : vector<16x128xf32>
    %101 = math.tanh %100 : vector<16x128xf32>
    %cst_22 = arith.constant 1.000000e+00 : f32
    %102 = vector.broadcast %cst_22 : f32 to vector<16x128xf32>
    %103 = arith.subf %102, %96 : vector<16x128xf32>
    %104 = arith.mulf %103, %101 : vector<16x128xf32>
    %105 = arith.mulf %96, %74 : vector<16x128xf32>
    %106 = arith.addf %104, %105 : vector<16x128xf32>
    %107 = vector.extract_strided_slice %7 {offsets = [3, 0, 0], sizes = [1, 16, 384], strides = [1, 1, 1]} : vector<8x16x384xf32> to vector<1x16x384xf32>
    %108 = vector.shape_cast %107 : vector<1x16x384xf32> to vector<16x384xf32>
    %109 = arith.truncf %106 : vector<16x128xf32> to vector<16x128xbf16>
    %cst_23 = arith.constant dense<0.000000e+00> : vector<16x384xf32>
    %110 = tpu.matmul %109, %8, %cst_23 {dimension_numbers = #tpu.dot_dimension_numbers<[1], [0], [0], [1], [0, 0, 1, 1], [], []>} : vector<16x128xbf16>, vector<128x384xbf16>, vector<16x384xf32> -> vector<16x384xf32>
    %111 = vector.broadcast %9 : vector<1x384xf32> to vector<16x384xf32>
    %112 = arith.addf %110, %111 : vector<16x384xf32>
    %113 = vector.extract_strided_slice %108 {offsets = [0, 0], sizes = [16, 128], strides = [1, 1]} : vector<16x384xf32> to vector<16x128xf32>
    %114 = vector.extract_strided_slice %112 {offsets = [0, 0], sizes = [16, 128], strides = [1, 1]} : vector<16x384xf32> to vector<16x128xf32>
    %115 = arith.addf %113, %114 : vector<16x128xf32>
    %116 = arith.negf %115 : vector<16x128xf32>
    %117 = math.exp %116 : vector<16x128xf32>
    %cst_24 = arith.constant 1.000000e+00 : f32
    %118 = vector.broadcast %cst_24 : f32 to vector<16x128xf32>
    %119 = arith.addf %118, %117 : vector<16x128xf32>
    %120 = arith.divf %118, %119 : vector<16x128xf32>
    %121 = vector.extract_strided_slice %108 {offsets = [0, 128], sizes = [16, 128], strides = [1, 1]} : vector<16x384xf32> to vector<16x128xf32>
    %122 = vector.extract_strided_slice %112 {offsets = [0, 128], sizes = [16, 128], strides = [1, 1]} : vector<16x384xf32> to vector<16x128xf32>
    %123 = arith.addf %121, %122 : vector<16x128xf32>
    %124 = arith.negf %123 : vector<16x128xf32>
    %125 = math.exp %124 : vector<16x128xf32>
    %cst_25 = arith.constant 1.000000e+00 : f32
    %126 = vector.broadcast %cst_25 : f32 to vector<16x128xf32>
    %127 = arith.addf %126, %125 : vector<16x128xf32>
    %128 = arith.divf %126, %127 : vector<16x128xf32>
    %129 = vector.extract_strided_slice %108 {offsets = [0, 256], sizes = [16, 128], strides = [1, 1]} : vector<16x384xf32> to vector<16x128xf32>
    %130 = vector.extract_strided_slice %112 {offsets = [0, 256], sizes = [16, 128], strides = [1, 1]} : vector<16x384xf32> to vector<16x128xf32>
    %131 = arith.mulf %120, %130 : vector<16x128xf32>
    %132 = arith.addf %129, %131 : vector<16x128xf32>
    %133 = math.tanh %132 : vector<16x128xf32>
    %cst_26 = arith.constant 1.000000e+00 : f32
    %134 = vector.broadcast %cst_26 : f32 to vector<16x128xf32>
    %135 = arith.subf %134, %128 : vector<16x128xf32>
    %136 = arith.mulf %135, %133 : vector<16x128xf32>
    %137 = arith.mulf %128, %106 : vector<16x128xf32>
    %138 = arith.addf %136, %137 : vector<16x128xf32>
    %139 = vector.extract_strided_slice %7 {offsets = [4, 0, 0], sizes = [1, 16, 384], strides = [1, 1, 1]} : vector<8x16x384xf32> to vector<1x16x384xf32>
    %140 = vector.shape_cast %139 : vector<1x16x384xf32> to vector<16x384xf32>
    %141 = arith.truncf %138 : vector<16x128xf32> to vector<16x128xbf16>
    %cst_27 = arith.constant dense<0.000000e+00> : vector<16x384xf32>
    %142 = tpu.matmul %141, %8, %cst_27 {dimension_numbers = #tpu.dot_dimension_numbers<[1], [0], [0], [1], [0, 0, 1, 1], [], []>} : vector<16x128xbf16>, vector<128x384xbf16>, vector<16x384xf32> -> vector<16x384xf32>
    %143 = vector.broadcast %9 : vector<1x384xf32> to vector<16x384xf32>
    %144 = arith.addf %142, %143 : vector<16x384xf32>
    %145 = vector.extract_strided_slice %140 {offsets = [0, 0], sizes = [16, 128], strides = [1, 1]} : vector<16x384xf32> to vector<16x128xf32>
    %146 = vector.extract_strided_slice %144 {offsets = [0, 0], sizes = [16, 128], strides = [1, 1]} : vector<16x384xf32> to vector<16x128xf32>
    %147 = arith.addf %145, %146 : vector<16x128xf32>
    %148 = arith.negf %147 : vector<16x128xf32>
    %149 = math.exp %148 : vector<16x128xf32>
    %cst_28 = arith.constant 1.000000e+00 : f32
    %150 = vector.broadcast %cst_28 : f32 to vector<16x128xf32>
    %151 = arith.addf %150, %149 : vector<16x128xf32>
    %152 = arith.divf %150, %151 : vector<16x128xf32>
    %153 = vector.extract_strided_slice %140 {offsets = [0, 128], sizes = [16, 128], strides = [1, 1]} : vector<16x384xf32> to vector<16x128xf32>
    %154 = vector.extract_strided_slice %144 {offsets = [0, 128], sizes = [16, 128], strides = [1, 1]} : vector<16x384xf32> to vector<16x128xf32>
    %155 = arith.addf %153, %154 : vector<16x128xf32>
    %156 = arith.negf %155 : vector<16x128xf32>
    %157 = math.exp %156 : vector<16x128xf32>
    %cst_29 = arith.constant 1.000000e+00 : f32
    %158 = vector.broadcast %cst_29 : f32 to vector<16x128xf32>
    %159 = arith.addf %158, %157 : vector<16x128xf32>
    %160 = arith.divf %158, %159 : vector<16x128xf32>
    %161 = vector.extract_strided_slice %140 {offsets = [0, 256], sizes = [16, 128], strides = [1, 1]} : vector<16x384xf32> to vector<16x128xf32>
    %162 = vector.extract_strided_slice %144 {offsets = [0, 256], sizes = [16, 128], strides = [1, 1]} : vector<16x384xf32> to vector<16x128xf32>
    %163 = arith.mulf %152, %162 : vector<16x128xf32>
    %164 = arith.addf %161, %163 : vector<16x128xf32>
    %165 = math.tanh %164 : vector<16x128xf32>
    %cst_30 = arith.constant 1.000000e+00 : f32
    %166 = vector.broadcast %cst_30 : f32 to vector<16x128xf32>
    %167 = arith.subf %166, %160 : vector<16x128xf32>
    %168 = arith.mulf %167, %165 : vector<16x128xf32>
    %169 = arith.mulf %160, %138 : vector<16x128xf32>
    %170 = arith.addf %168, %169 : vector<16x128xf32>
    %171 = vector.extract_strided_slice %7 {offsets = [5, 0, 0], sizes = [1, 16, 384], strides = [1, 1, 1]} : vector<8x16x384xf32> to vector<1x16x384xf32>
    %172 = vector.shape_cast %171 : vector<1x16x384xf32> to vector<16x384xf32>
    %173 = arith.truncf %170 : vector<16x128xf32> to vector<16x128xbf16>
    %cst_31 = arith.constant dense<0.000000e+00> : vector<16x384xf32>
    %174 = tpu.matmul %173, %8, %cst_31 {dimension_numbers = #tpu.dot_dimension_numbers<[1], [0], [0], [1], [0, 0, 1, 1], [], []>} : vector<16x128xbf16>, vector<128x384xbf16>, vector<16x384xf32> -> vector<16x384xf32>
    %175 = vector.broadcast %9 : vector<1x384xf32> to vector<16x384xf32>
    %176 = arith.addf %174, %175 : vector<16x384xf32>
    %177 = vector.extract_strided_slice %172 {offsets = [0, 0], sizes = [16, 128], strides = [1, 1]} : vector<16x384xf32> to vector<16x128xf32>
    %178 = vector.extract_strided_slice %176 {offsets = [0, 0], sizes = [16, 128], strides = [1, 1]} : vector<16x384xf32> to vector<16x128xf32>
    %179 = arith.addf %177, %178 : vector<16x128xf32>
    %180 = arith.negf %179 : vector<16x128xf32>
    %181 = math.exp %180 : vector<16x128xf32>
    %cst_32 = arith.constant 1.000000e+00 : f32
    %182 = vector.broadcast %cst_32 : f32 to vector<16x128xf32>
    %183 = arith.addf %182, %181 : vector<16x128xf32>
    %184 = arith.divf %182, %183 : vector<16x128xf32>
    %185 = vector.extract_strided_slice %172 {offsets = [0, 128], sizes = [16, 128], strides = [1, 1]} : vector<16x384xf32> to vector<16x128xf32>
    %186 = vector.extract_strided_slice %176 {offsets = [0, 128], sizes = [16, 128], strides = [1, 1]} : vector<16x384xf32> to vector<16x128xf32>
    %187 = arith.addf %185, %186 : vector<16x128xf32>
    %188 = arith.negf %187 : vector<16x128xf32>
    %189 = math.exp %188 : vector<16x128xf32>
    %cst_33 = arith.constant 1.000000e+00 : f32
    %190 = vector.broadcast %cst_33 : f32 to vector<16x128xf32>
    %191 = arith.addf %190, %189 : vector<16x128xf32>
    %192 = arith.divf %190, %191 : vector<16x128xf32>
    %193 = vector.extract_strided_slice %172 {offsets = [0, 256], sizes = [16, 128], strides = [1, 1]} : vector<16x384xf32> to vector<16x128xf32>
    %194 = vector.extract_strided_slice %176 {offsets = [0, 256], sizes = [16, 128], strides = [1, 1]} : vector<16x384xf32> to vector<16x128xf32>
    %195 = arith.mulf %184, %194 : vector<16x128xf32>
    %196 = arith.addf %193, %195 : vector<16x128xf32>
    %197 = math.tanh %196 : vector<16x128xf32>
    %cst_34 = arith.constant 1.000000e+00 : f32
    %198 = vector.broadcast %cst_34 : f32 to vector<16x128xf32>
    %199 = arith.subf %198, %192 : vector<16x128xf32>
    %200 = arith.mulf %199, %197 : vector<16x128xf32>
    %201 = arith.mulf %192, %170 : vector<16x128xf32>
    %202 = arith.addf %200, %201 : vector<16x128xf32>
    %203 = vector.extract_strided_slice %7 {offsets = [6, 0, 0], sizes = [1, 16, 384], strides = [1, 1, 1]} : vector<8x16x384xf32> to vector<1x16x384xf32>
    %204 = vector.shape_cast %203 : vector<1x16x384xf32> to vector<16x384xf32>
    %205 = arith.truncf %202 : vector<16x128xf32> to vector<16x128xbf16>
    %cst_35 = arith.constant dense<0.000000e+00> : vector<16x384xf32>
    %206 = tpu.matmul %205, %8, %cst_35 {dimension_numbers = #tpu.dot_dimension_numbers<[1], [0], [0], [1], [0, 0, 1, 1], [], []>} : vector<16x128xbf16>, vector<128x384xbf16>, vector<16x384xf32> -> vector<16x384xf32>
    %207 = vector.broadcast %9 : vector<1x384xf32> to vector<16x384xf32>
    %208 = arith.addf %206, %207 : vector<16x384xf32>
    %209 = vector.extract_strided_slice %204 {offsets = [0, 0], sizes = [16, 128], strides = [1, 1]} : vector<16x384xf32> to vector<16x128xf32>
    %210 = vector.extract_strided_slice %208 {offsets = [0, 0], sizes = [16, 128], strides = [1, 1]} : vector<16x384xf32> to vector<16x128xf32>
    %211 = arith.addf %209, %210 : vector<16x128xf32>
    %212 = arith.negf %211 : vector<16x128xf32>
    %213 = math.exp %212 : vector<16x128xf32>
    %cst_36 = arith.constant 1.000000e+00 : f32
    %214 = vector.broadcast %cst_36 : f32 to vector<16x128xf32>
    %215 = arith.addf %214, %213 : vector<16x128xf32>
    %216 = arith.divf %214, %215 : vector<16x128xf32>
    %217 = vector.extract_strided_slice %204 {offsets = [0, 128], sizes = [16, 128], strides = [1, 1]} : vector<16x384xf32> to vector<16x128xf32>
    %218 = vector.extract_strided_slice %208 {offsets = [0, 128], sizes = [16, 128], strides = [1, 1]} : vector<16x384xf32> to vector<16x128xf32>
    %219 = arith.addf %217, %218 : vector<16x128xf32>
    %220 = arith.negf %219 : vector<16x128xf32>
    %221 = math.exp %220 : vector<16x128xf32>
    %cst_37 = arith.constant 1.000000e+00 : f32
    %222 = vector.broadcast %cst_37 : f32 to vector<16x128xf32>
    %223 = arith.addf %222, %221 : vector<16x128xf32>
    %224 = arith.divf %222, %223 : vector<16x128xf32>
    %225 = vector.extract_strided_slice %204 {offsets = [0, 256], sizes = [16, 128], strides = [1, 1]} : vector<16x384xf32> to vector<16x128xf32>
    %226 = vector.extract_strided_slice %208 {offsets = [0, 256], sizes = [16, 128], strides = [1, 1]} : vector<16x384xf32> to vector<16x128xf32>
    %227 = arith.mulf %216, %226 : vector<16x128xf32>
    %228 = arith.addf %225, %227 : vector<16x128xf32>
    %229 = math.tanh %228 : vector<16x128xf32>
    %cst_38 = arith.constant 1.000000e+00 : f32
    %230 = vector.broadcast %cst_38 : f32 to vector<16x128xf32>
    %231 = arith.subf %230, %224 : vector<16x128xf32>
    %232 = arith.mulf %231, %229 : vector<16x128xf32>
    %233 = arith.mulf %224, %202 : vector<16x128xf32>
    %234 = arith.addf %232, %233 : vector<16x128xf32>
    %235 = vector.extract_strided_slice %7 {offsets = [7, 0, 0], sizes = [1, 16, 384], strides = [1, 1, 1]} : vector<8x16x384xf32> to vector<1x16x384xf32>
    %236 = vector.shape_cast %235 : vector<1x16x384xf32> to vector<16x384xf32>
    %237 = arith.truncf %234 : vector<16x128xf32> to vector<16x128xbf16>
    %cst_39 = arith.constant dense<0.000000e+00> : vector<16x384xf32>
    %238 = tpu.matmul %237, %8, %cst_39 {dimension_numbers = #tpu.dot_dimension_numbers<[1], [0], [0], [1], [0, 0, 1, 1], [], []>} : vector<16x128xbf16>, vector<128x384xbf16>, vector<16x384xf32> -> vector<16x384xf32>
    %239 = vector.broadcast %9 : vector<1x384xf32> to vector<16x384xf32>
    %240 = arith.addf %238, %239 : vector<16x384xf32>
    %241 = vector.extract_strided_slice %236 {offsets = [0, 0], sizes = [16, 128], strides = [1, 1]} : vector<16x384xf32> to vector<16x128xf32>
    %242 = vector.extract_strided_slice %240 {offsets = [0, 0], sizes = [16, 128], strides = [1, 1]} : vector<16x384xf32> to vector<16x128xf32>
    %243 = arith.addf %241, %242 : vector<16x128xf32>
    %244 = arith.negf %243 : vector<16x128xf32>
    %245 = math.exp %244 : vector<16x128xf32>
    %cst_40 = arith.constant 1.000000e+00 : f32
    %246 = vector.broadcast %cst_40 : f32 to vector<16x128xf32>
    %247 = arith.addf %246, %245 : vector<16x128xf32>
    %248 = arith.divf %246, %247 : vector<16x128xf32>
    %249 = vector.extract_strided_slice %236 {offsets = [0, 128], sizes = [16, 128], strides = [1, 1]} : vector<16x384xf32> to vector<16x128xf32>
    %250 = vector.extract_strided_slice %240 {offsets = [0, 128], sizes = [16, 128], strides = [1, 1]} : vector<16x384xf32> to vector<16x128xf32>
    %251 = arith.addf %249, %250 : vector<16x128xf32>
    %252 = arith.negf %251 : vector<16x128xf32>
    %253 = math.exp %252 : vector<16x128xf32>
    %cst_41 = arith.constant 1.000000e+00 : f32
    %254 = vector.broadcast %cst_41 : f32 to vector<16x128xf32>
    %255 = arith.addf %254, %253 : vector<16x128xf32>
    %256 = arith.divf %254, %255 : vector<16x128xf32>
    %257 = vector.extract_strided_slice %236 {offsets = [0, 256], sizes = [16, 128], strides = [1, 1]} : vector<16x384xf32> to vector<16x128xf32>
    %258 = vector.extract_strided_slice %240 {offsets = [0, 256], sizes = [16, 128], strides = [1, 1]} : vector<16x384xf32> to vector<16x128xf32>
    %259 = arith.mulf %248, %258 : vector<16x128xf32>
    %260 = arith.addf %257, %259 : vector<16x128xf32>
    %261 = math.tanh %260 : vector<16x128xf32>
    %cst_42 = arith.constant 1.000000e+00 : f32
    %262 = vector.broadcast %cst_42 : f32 to vector<16x128xf32>
    %263 = arith.subf %262, %256 : vector<16x128xf32>
    %264 = arith.mulf %263, %261 : vector<16x128xf32>
    %265 = arith.mulf %256, %234 : vector<16x128xf32>
    %266 = arith.addf %264, %265 : vector<16x128xf32>
    %c0_43 = arith.constant 0 : index
    %c0_44 = arith.constant 0 : index
    %c0_45 = arith.constant 0 : index
    %267 = vector.load %arg2[%c0_43, %c0_44, %c0_45] : memref<16x8x128xbf16, #tpu.memory_space<vmem>>, vector<16x8x128xbf16>
    %268 = vector.shape_cast %267 : vector<16x8x128xbf16> to vector<128x128xbf16>
    %c0_46 = arith.constant 0 : index
    %c0_47 = arith.constant 0 : index
    %269 = vector.load %arg8[%c0_46, %c0_47] : memref<128x128xbf16, #tpu.memory_space<vmem>>, vector<128x128xbf16>
    %cst_48 = arith.constant dense<0.000000e+00> : vector<128x128xf32>
    %270 = tpu.matmul %268, %269, %cst_48 {dimension_numbers = #tpu.dot_dimension_numbers<[1], [0], [0], [1], [0, 0, 1, 1], [], []>} : vector<128x128xbf16>, vector<128x128xbf16>, vector<128x128xf32> -> vector<128x128xf32>
    %c0_49 = arith.constant 0 : index
    %c0_50 = arith.constant 0 : index
    %271 = vector.load %arg9[%c0_49, %c0_50] : memref<1x128xf32, #tpu.memory_space<vmem>>, vector<1x128xf32>
    %272 = vector.broadcast %271 : vector<1x128xf32> to vector<128x128xf32>
    %273 = arith.addf %270, %272 : vector<128x128xf32>
    %cst_51 = arith.constant 0.000000e+00 : f32
    %274 = vector.broadcast %cst_51 : f32 to vector<128x128xf32>
    %275 = arith.maximumf %273, %274 : vector<128x128xf32>
    %276 = arith.truncf %266 : vector<16x128xf32> to vector<16x128xbf16>
    %c0_52 = arith.constant 0 : index
    %c0_53 = arith.constant 0 : index
    %277 = vector.load %arg10[%c0_52, %c0_53] : memref<128x128xbf16, #tpu.memory_space<vmem>>, vector<128x128xbf16>
    %cst_54 = arith.constant dense<0.000000e+00> : vector<16x128xf32>
    %278 = tpu.matmul %276, %277, %cst_54 {dimension_numbers = #tpu.dot_dimension_numbers<[1], [0], [0], [1], [0, 0, 1, 1], [], []>} : vector<16x128xbf16>, vector<128x128xbf16>, vector<16x128xf32> -> vector<16x128xf32>
    %c0_55 = arith.constant 0 : index
    %c0_56 = arith.constant 0 : index
    %279 = vector.load %arg11[%c0_55, %c0_56] : memref<1x128xf32, #tpu.memory_space<vmem>>, vector<1x128xf32>
    %280 = vector.broadcast %279 : vector<1x128xf32> to vector<16x128xf32>
    %281 = arith.addf %278, %280 : vector<16x128xf32>
    %cst_57 = arith.constant 0.000000e+00 : f32
    %282 = vector.broadcast %cst_57 : f32 to vector<16x128xf32>
    %283 = arith.maximumf %281, %282 : vector<16x128xf32>
    %c0_58 = arith.constant 0 : index
    %c0_59 = arith.constant 0 : index
    %284 = vector.load %arg12[%c0_58, %c0_59] : memref<1x128xf32, #tpu.memory_space<vmem>>, vector<1x128xf32>
    %285 = vector.broadcast %284 : vector<1x128xf32> to vector<16x128xf32>
    %286 = arith.mulf %283, %285 : vector<16x128xf32>
    %287 = vector.shape_cast %275 : vector<128x128xf32> to vector<16x8x128xf32>
    %288 = vector.shape_cast %286 : vector<16x128xf32> to vector<16x1x128xf32>
    %289 = vector.broadcast %288 : vector<16x1x128xf32> to vector<16x8x128xf32>
    %290 = arith.mulf %287, %289 : vector<16x8x128xf32>
    %cst_60 = arith.constant dense<0.000000e+00> : vector<16x8xf32>
    %291 = vector.multi_reduction <add>, %290, %cst_60 [2] : vector<16x8x128xf32> to vector<16x8xf32>
    %c0_61 = arith.constant 0 : index
    %c0_62 = arith.constant 0 : index
    %292 = memref.load %arg13[%c0_61, %c0_62] : memref<1x1xf32, #tpu.memory_space<smem>>
    %293 = vector.broadcast %292 : f32 to vector<16x8xf32>
    %294 = arith.addf %291, %293 : vector<16x8xf32>
    %c0_63 = arith.constant 0 : index
    %c0_64 = arith.constant 0 : index
    %295 = vector.load %arg3[%c0_63, %c0_64] : memref<16x8xf32, #tpu.memory_space<vmem>>, vector<16x8xf32>
    %cst_65 = arith.constant dense<0xFF800000> : vector<16xf32>
    %296 = vector.multi_reduction <maximumf>, %294, %cst_65 [1] : vector<16x8xf32> to vector<16xf32>
    %297 = vector.shape_cast %296 : vector<16xf32> to vector<16x1xf32>
    %298 = vector.broadcast %297 : vector<16x1xf32> to vector<16x8xf32>
    %299 = arith.subf %294, %298 : vector<16x8xf32>
    %300 = math.exp %299 : vector<16x8xf32>
    %301 = arith.mulf %300, %295 : vector<16x8xf32>
    %cst_66 = arith.constant dense<0.000000e+00> : vector<16xf32>
    %302 = vector.multi_reduction <add>, %301, %cst_66 [1] : vector<16x8xf32> to vector<16xf32>
    %303 = vector.shape_cast %302 : vector<16xf32> to vector<16x1xf32>
    %cst_67 = arith.constant 9.99999974E-6 : f32
    %304 = vector.broadcast %cst_67 : f32 to vector<16x1xf32>
    %305 = arith.addf %303, %304 : vector<16x1xf32>
    %306 = vector.broadcast %305 : vector<16x1xf32> to vector<16x8xf32>
    %307 = arith.divf %301, %306 : vector<16x8xf32>
    %308 = vector.shape_cast %307 : vector<16x8xf32> to vector<16x8x1xf32>
    %309 = arith.extf %267 : vector<16x8x128xbf16> to vector<16x8x128xf32>
    %310 = vector.broadcast %308 : vector<16x8x1xf32> to vector<16x8x128xf32>
    %311 = arith.mulf %310, %309 : vector<16x8x128xf32>
    %cst_68 = arith.constant dense<0.000000e+00> : vector<16x128xf32>
    %312 = vector.multi_reduction <add>, %311, %cst_68 [1] : vector<16x8x128xf32> to vector<16x128xf32>
    %313 = arith.truncf %312 : vector<16x128xf32> to vector<16x128xbf16>
    %c0_69 = arith.constant 0 : index
    %c0_70 = arith.constant 0 : index
    %314 = vector.load %arg14[%c0_69, %c0_70] : memref<128x128xbf16, #tpu.memory_space<vmem>>, vector<128x128xbf16>
    %cst_71 = arith.constant dense<0.000000e+00> : vector<16x128xf32>
    %315 = tpu.matmul %313, %314, %cst_71 {dimension_numbers = #tpu.dot_dimension_numbers<[1], [0], [0], [1], [0, 0, 1, 1], [], []>} : vector<16x128xbf16>, vector<128x128xbf16>, vector<16x128xf32> -> vector<16x128xf32>
    %c0_72 = arith.constant 0 : index
    %c0_73 = arith.constant 0 : index
    %316 = vector.load %arg15[%c0_72, %c0_73] : memref<1x128xf32, #tpu.memory_space<vmem>>, vector<1x128xf32>
    %317 = vector.broadcast %316 : vector<1x128xf32> to vector<16x128xf32>
    %318 = arith.addf %315, %317 : vector<16x128xf32>
    %cst_74 = arith.constant 0.000000e+00 : f32
    %319 = vector.broadcast %cst_74 : f32 to vector<16x128xf32>
    %320 = arith.maximumf %318, %319 : vector<16x128xf32>
    %321 = arith.truncf %320 : vector<16x128xf32> to vector<16x128xbf16>
    %c0_75 = arith.constant 0 : index
    %c0_76 = arith.constant 0 : index
    %322 = vector.load %arg16[%c0_75, %c0_76] : memref<128x128xbf16, #tpu.memory_space<vmem>>, vector<128x128xbf16>
    %cst_77 = arith.constant dense<0.000000e+00> : vector<16x128xf32>
    %323 = tpu.matmul %321, %322, %cst_77 {dimension_numbers = #tpu.dot_dimension_numbers<[1], [0], [0], [1], [0, 0, 1, 1], [], []>} : vector<16x128xbf16>, vector<128x128xbf16>, vector<16x128xf32> -> vector<16x128xf32>
    %c0_78 = arith.constant 0 : index
    %c0_79 = arith.constant 0 : index
    %324 = vector.load %arg17[%c0_78, %c0_79] : memref<1x128xf32, #tpu.memory_space<vmem>>, vector<1x128xf32>
    %325 = vector.broadcast %324 : vector<1x128xf32> to vector<16x128xf32>
    %326 = arith.addf %323, %325 : vector<16x128xf32>
    %c0_80 = arith.constant 0 : index
    %c0_81 = arith.constant 0 : index
    %327 = vector.load %arg18[%c0_80, %c0_81] : memref<16x128xf32, #tpu.memory_space<vmem>>, vector<16x128xf32>
    tpu.vector_store %arg18[%c0_80, %c0_81], %326 {strides = array<i32>} : memref<16x128xf32, #tpu.memory_space<vmem>>, vector<16x128xf32>,
    return
  }
  func.func @transform_0(%arg0: i32) -> (i32, i32, i32) {
    %c0_i32 = arith.constant 0 : i32
    %c0_i32_0 = arith.constant 0 : i32
    %c0_i32_1 = arith.constant 0 : i32
    return %c0_i32, %arg0, %c0_i32_0 : i32, i32, i32
  }
  func.func @transform_1(%arg0: i32) -> (i32, i32, i32) {
    %c0_i32 = arith.constant 0 : i32
    %c0_i32_0 = arith.constant 0 : i32
    %c0_i32_1 = arith.constant 0 : i32
    return %arg0, %c0_i32, %c0_i32_0 : i32, i32, i32
  }
  func.func @transform_2(%arg0: i32) -> (i32, i32) {
    %c0_i32 = arith.constant 0 : i32
    %c0_i32_0 = arith.constant 0 : i32
    return %arg0, %c0_i32 : i32, i32
  }
  func.func @transform_3(%arg0: i32) -> (i32, i32) {
    %c0_i32 = arith.constant 0 : i32
    %c0_i32_0 = arith.constant 0 : i32
    %c0_i32_1 = arith.constant 0 : i32
    return %c0_i32, %c0_i32_0 : i32, i32
  }
  func.func @transform_4(%arg0: i32) -> (i32, i32) {
    %c0_i32 = arith.constant 0 : i32
    %c0_i32_0 = arith.constant 0 : i32
    %c0_i32_1 = arith.constant 0 : i32
    return %c0_i32, %c0_i32_0 : i32, i32
  }
  func.func @transform_5(%arg0: i32) -> (i32, i32) {
    %c0_i32 = arith.constant 0 : i32
    %c0_i32_0 = arith.constant 0 : i32
    %c0_i32_1 = arith.constant 0 : i32
    return %c0_i32, %c0_i32_0 : i32, i32
  }
  func.func @transform_6(%arg0: i32) -> (i32, i32) {
    %c0_i32 = arith.constant 0 : i32
    %c0_i32_0 = arith.constant 0 : i32
    %c0_i32_1 = arith.constant 0 : i32
    return %c0_i32, %c0_i32_0 : i32, i32
  }
  func.func @transform_7(%arg0: i32) -> (i32, i32) {
    %c0_i32 = arith.constant 0 : i32
    %c0_i32_0 = arith.constant 0 : i32
    %c0_i32_1 = arith.constant 0 : i32
    return %c0_i32, %c0_i32_0 : i32, i32
  }
  func.func @transform_8(%arg0: i32) -> (i32, i32) {
    %c0_i32 = arith.constant 0 : i32
    %c0_i32_0 = arith.constant 0 : i32
    %c0_i32_1 = arith.constant 0 : i32
    return %c0_i32, %c0_i32_0 : i32, i32
  }
  func.func @transform_9(%arg0: i32) -> (i32, i32) {
    %c0_i32 = arith.constant 0 : i32
    %c0_i32_0 = arith.constant 0 : i32
    %c0_i32_1 = arith.constant 0 : i32
    return %c0_i32, %c0_i32_0 : i32, i32
  }
  func.func @transform_10(%arg0: i32) -> (i32, i32) {
    %c0_i32 = arith.constant 0 : i32
    %c0_i32_0 = arith.constant 0 : i32
    %c0_i32_1 = arith.constant 0 : i32
    return %c0_i32, %c0_i32_0 : i32, i32
  }
  func.func @transform_11(%arg0: i32) -> (i32, i32) {
    %c0_i32 = arith.constant 0 : i32
    %c0_i32_0 = arith.constant 0 : i32
    %c0_i32_1 = arith.constant 0 : i32
    return %c0_i32, %c0_i32_0 : i32, i32
  }
  func.func @transform_12(%arg0: i32) -> (i32, i32) {
    %c0_i32 = arith.constant 0 : i32
    %c0_i32_0 = arith.constant 0 : i32
    %c0_i32_1 = arith.constant 0 : i32
    return %c0_i32, %c0_i32_0 : i32, i32
  }
  func.func @transform_13(%arg0: i32) -> (i32, i32) {
    %c0_i32 = arith.constant 0 : i32
    %c0_i32_0 = arith.constant 0 : i32
    %c0_i32_1 = arith.constant 0 : i32
    return %c0_i32, %c0_i32_0 : i32, i32
  }
  func.func @transform_14(%arg0: i32) -> (i32, i32) {
    %c0_i32 = arith.constant 0 : i32
    %c0_i32_0 = arith.constant 0 : i32
    %c0_i32_1 = arith.constant 0 : i32
    return %c0_i32, %c0_i32_0 : i32, i32
  }
  func.func @transform_15(%arg0: i32) -> (i32, i32) {
    %c0_i32 = arith.constant 0 : i32
    %c0_i32_0 = arith.constant 0 : i32
    %c0_i32_1 = arith.constant 0 : i32
    return %c0_i32, %c0_i32_0 : i32, i32
  }
  func.func @transform_16(%arg0: i32) -> (i32, i32) {
    %c0_i32 = arith.constant 0 : i32
    %c0_i32_0 = arith.constant 0 : i32
    %c0_i32_1 = arith.constant 0 : i32
    return %c0_i32, %c0_i32_0 : i32, i32
  }
  func.func @transform_17(%arg0: i32) -> (i32, i32) {
    %c0_i32 = arith.constant 0 : i32
    %c0_i32_0 = arith.constant 0 : i32
    return %arg0, %c0_i32 : i32, i32
  }
}

</mosaic_0001>

<bundles_post_ra>
// kernel: tpu_custom_call.1
= control target key start
LH: loop header
LB: loop body
LE: loop exit
PB: predicated region body
PF: predicated region fallthrough
CT: control target
= control target key end

     0   :  { %s7475_s0 = inlined_call_operand.hbm [shape: bf16[8,32,32], index: 0, kind: input, shape index: {}]   ;;  %s7476_s1 = inlined_call_operand.hbm [shape: bf16[32,8,128], index: 1, kind: input, shape index: {}]   ;;  %s7477_s2 = inlined_call_operand.vmem [shape: f32[32,8], index: 2, kind: input, shape index: {}]   ;;  %s7478_s3 = inlined_call_operand.hbm [shape: bf16[32,384], index: 3, kind: input, shape index: {}]   ;;  %s7479_s4 = inlined_call_operand.hbm [shape: bf16[128,384], index: 4, kind: input, shape index: {}]   ;;  %s7480_s5 = inlined_call_operand.vmem [shape: f32[1,384], index: 5, kind: input, shape index: {}]   ;;  %s7481_s6 = inlined_call_operand.hbm [shape: f32[1,384], index: 6, kind: input, shape index: {}]   ;;  %s7482_s7 = inlined_call_operand.hbm [shape: bf16[128,128], index: 7, kind: input, shape index: {}]   ;;  %s7483_s8 = inlined_call_operand.hbm [shape: f32[1,128], index: 8, kind: input, shape index: {}]   ;;  %s7484_s9 = inlined_call_operand.hbm [shape: bf16[128,128], index: 9, kind: input, shape index: {}]   ;;  %s7485_s10 = inlined_call_operand.hbm [shape: f32[1,128], index: 10, kind: input, shape index: {}]   ;;  %s7486_s11 = inlined_call_operand.hbm [shape: f32[1,128], index: 11, kind: input, shape index: {}]   ;;  %s7487_s12 = inlined_call_operand.<no memory space> [shape: f32[1,1], index: 12, kind: input, shape index: {}]   ;;  %s7488_s13 = inlined_call_operand.hbm [shape: bf16[128,128], index: 13, kind: input, shape index: {}]   ;;  %s7489_s14 = inlined_call_operand.hbm [shape: f32[1,128], index: 14, kind: input, shape index: {}]   ;;  %s7490_s15 = inlined_call_operand.vmem [shape: bf16[128,128], index: 15, kind: input, shape index: {}]   ;;  %s7491_s16 = inlined_call_operand.vmem [shape: f32[1,128], index: 16, kind: input, shape index: {}]   ;;  %s7492_s17 = inlined_call_operand.hbm [shape: f32[32,128], index: 17, kind: output, shape index: {}]  }
   0x1   :  { %7520 = sst [smem:[#allocation75_spill]] %s7475_s0 }
   0x2   :  { %7521 = sst [smem:[#allocation76_spill]] %s7476_s1 }
   0x3   :  { %7522 = sst [smem:[#allocation77_spill]] %s7478_s3 }
   0x4   :  { %7523 = sst [smem:[#allocation78_spill]] %s7479_s4 }
   0x5   :  { %7524 = sst [smem:[#allocation79_spill]] %s7481_s6 }
   0x6   :  { %7525 = sst [smem:[#allocation80_spill]] %s7482_s7 }
   0x7   :  { %7526 = sst [smem:[#allocation81_spill]] %s7483_s8 }
   0x8   :  { %7527 = sst [smem:[#allocation82_spill]] %s7484_s9 }
   0x9   :  { %7528 = sst [smem:[#allocation83_spill]] %s7491_s16 }
   0xa   :  { %7529 = sst [smem:[#allocation84_spill]] %s7492_s17 }
   0xb   :  { %22 = sst [smem:[#allocation2]] %s7487_s12 }
   0xc   :  { %23 = vsyncpa [#allocation4], 0 }
   0xd   :  { %25 = vsyncpa [#allocation4 + $0x1], 0 }
   0xe   :  { %26 = vsyncpa [#allocation7], 0 }
   0xf   :  { %28 = vsyncpa [#allocation7 + $0x1], 0 }
  0x10   :  { %29 = vsyncpa [#allocation10], 0 }
  0x11   :  { %30 = vsyncpa [#allocation13], 0 }
  0x12   :  { %31 = vsyncpa [#allocation16], 0 }
  0x13   :  { %32 = vsyncpa [#allocation19], 0 }
  0x14   :  { %33 = vsyncpa [#allocation22], 0 }
  0x15   :  { %34 = vsyncpa [#allocation5], 0 }
  0x16   :  { %36 = vsyncpa [#allocation5 + $0x1], 0  ;;  %s5929_s26 = smov 0   ;;  %s5931_s27 = smov 0  }
  0x17   :  { %s5933_s28 = smov 0   ;;  %s5935_s29 = smov 0  }
  0x18 LB: > { %7530 = sst [smem:[#allocation36_spill]] %s5792_s26  ;;  %s5950_s12 = sadd.s32 4294967295, %s5804_s29   ;;  %s5804_s29 = sphi %s5935_s29, %s7646_s29   ;;  %s5800_s28 = sphi %s5933_s28, %s7650_s28   ;;  %s5796_s27 = sphi %s5931_s27, %s7649_s27   ;;  %s5792_s26 = sphi %s5929_s26, %s7648_s26  }
  0x19   : > { %s4326_s0 = sadd.s32 4294967294, %s5804_s29   ;;  %s5954_s30 = sadd.s32 1, %s5804_s29  }
  0x1a   : > { %7531 = sst [smem:[#allocation37_spill]] %s5954_s30  ;;  %s49_s18 = sadd.s32 1, %s5800_s28 }
  0x1b   : > { %s46_s19 = ssub.s32 %s5804_s29, %s5954_s30  ;;  %p56_p0 = scmp.ne.s32.totalorder %s5800_s28, %s5796_s27 }
  0x1c   : > { %p47_p1 = scmp.eq.s32.totalorder %s46_s19, 0  ;;  %p57_p2 = scmp.eq.s32.totalorder %s5804_s29, 0 }
  0x1d   : > { %p62_p3 = scmp.ne.s32.totalorder %s5796_s27, %s5792_s26  ;;  %p7497_p4 = scmp.eq.s32.totalorder %s5950_s12, 0 }
  0x1e   : > { %s5966_s1 = scalar_select %p47_p1, %s5800_s28, %s49_s18  }
  0x1f   : > { %p5968_p5 = por %p57_p2, %p56_p0  ;;  %p5974_p6 = por %p7497_p4, %p62_p3 }
  0x20   : > { %7532 = sst [smem:[#allocation38_spill]] %s5966_s1  ;;  %p432_p7 = scmp.eq.s32.totalorder %s5950_s12, 1 }
  0x21   : > { %s7534_s21 = scalar_select %p5974_p6, 1, 0 }
  0x22   : > { %p438_p8 = scmp.eq.s32.totalorder %s4326_s0, 1  ;;  %p4327_p9 = scmp.ge.s32.totalorder %s5804_s29, 1 }
  0x23   : > { %p445_p10 = scmp.lt.s32.totalorder %s5804_s29, 3  ;;  %p5981_p11 = por %p432_p7, %p56_p0 }
  0x24   : > { %p5985_p12 = por %p438_p8, %p62_p3  ;;  %s5806_s25 = smov [#allocation9]  }
  0x25   : > { %s7535_s22 = scalar_select %p5981_p11, 1, 0 }
  0x26   : > { %s7537_s23 = scalar_select %p5985_p12, 1, 0 }
  0x27   : > { %7536 = sst [smem:[#allocation39_spill]] %s7535_s22  ;;  %p5989_p13 = pnand %p4327_p9, %p445_p10 }
  0x28   : > { %7538 = sst [smem:[#allocation40_spill]] %s7537_s23  ;;  %s470_s18 = sshll.u32 %s5806_s25, 4  ;;  %s471_s18 = int_to_ptr.vmem [resolvable:$true] %s470_s18 }
  0x29   : > { %s7539_s24 = scalar_select %p5989_p13, 1, 0 }
  0x2a   : > { %p4956_p1 = pneg %p5989_p13  ;;  %s5807_s19 = smov [#allocation12]  }
  0x2b   : > { %s497_s1 = sshll.u32 %s5807_s19, 4  ;;  %s5437_s23 = scalar_lea.vmem %s471_s18, 3072  ;;  %s498_s1 = int_to_ptr.vmem [resolvable:$true] %s497_s1 }
  0x2c   : > { %p5997_p2 = pnand %p4956_p1, %p7497_p4  ;;  %p5438_p3 = scmp.ne.s32.totalorder %s471_s18, %s5437_s23 }
  0x2d   : > { %p5445_p9 = scmp.lt.s32.totalorder %s471_s18, %s471_s18  ;;  %p5446_p10 = scmp.lt.s32.totalorder %s5437_s23, %s5437_s23 }
  0x2e   : > { %p6003_p0 = pneg %p5997_p2 }
  0x2f   : > { %p5447_p1 = por %p5446_p10, %p5445_p9 }
  0x30   : > { %p5440_p7 = pnand %p5438_p3, %p6003_p0 }
  0x32   : > { %p5441_p8 = pneg %p5440_p7 }
  0x34   : > { %p5448_p4 = pnand %p5447_p1, %p5441_p8 }
  0x36   : > { %5451 = shalt.err (!%p5448_p4)
}
  0x37   : > { %s7502_s25 = smov 192   ;;  %s7503_s19 = smov 12  }
  0x38   : > { %s7542_s4 = sld [smem:[#allocation78_spill]]  ;;  %s5463_s22 = scalar_lea.vmem %s498_s1, 1024 }
  0x39   : > { %p5464_p3 = scmp.ne.s32.totalorder %s498_s1, %s5463_s22  ;;  %p5471_p9 = scmp.lt.s32.totalorder %s498_s1, %s498_s1 }
  0x3a   : > { %p5472_p8 = scmp.lt.s32.totalorder %s5463_s22, %s5463_s22 }
  0x3b   : > { %p5466_p7 = pnand %p5464_p3, %p6003_p0 }
  0x3c   : > { %p5473_p4 = por %p5472_p8, %p5471_p9 }
  0x3d   : > { %p5467_p12 = pneg %p5466_p7 }
  0x3e   : > { %4962 = dma.hbm_to_vmem [thread:$0]  (!%p5997_p2), %s7542_s4, 3072, %s471_s18, [#allocation10], %s7502_s25, %s7502_s25, %s7503_s19  }
  0x3f   : > { %p5474_p10 = pnand %p5473_p4, %p5467_p12 }
  0x41   : > { %5477 = shalt.err (!%p5474_p10)
}
  0x42   : > { %s7504_s23 = smov 64   ;;  %s7505_s16 = smov 4  }
  0x43   : > { %s7543_s7 = sld [smem:[#allocation80_spill]]  ;;  %s5812_s18 = smov [#allocation15]  }
  0x44   : > { %s521_s25 = sshll.u32 %s5812_s18, 4  ;;  %s5813_s19 = smov [#allocation18]   ;;  %s522_s25 = int_to_ptr.vmem [resolvable:$true] %s521_s25 }
  0x45   : > { %s546_s22 = sshll.u32 %s5813_s19, 4  ;;  %s5489_s4 = scalar_lea.vmem %s522_s25, 1024  ;;  %s547_s22 = int_to_ptr.vmem [resolvable:$true] %s546_s22 }
  0x46   : > { %p5490_p12 = scmp.ne.s32.totalorder %s522_s25, %s5489_s4  ;;  %p5497_p7 = scmp.lt.s32.totalorder %s522_s25, %s522_s25 }
  0x47   : > { %p5498_p9 = scmp.lt.s32.totalorder %s5489_s4, %s5489_s4 }
  0x48   : > { %p5492_p1 = pnand %p5490_p12, %p6003_p0 }
  0x49   : > { %4968 = dma.hbm_to_vmem [thread:$0]  (!%p5997_p2), %s7543_s7, 1024, %s498_s1, [#allocation13], %s7504_s23, %s7504_s23, %s7505_s16  }
  0x4a   : > { %p5493_p3 = pneg %p5492_p1  ;;  %p5499_p8 = por %p5498_p9, %p5497_p7 }
  0x4c   : > { %p5500_p4 = pnand %p5499_p8, %p5493_p3 }
  0x4e   : > { %5503 = shalt.err (!%p5500_p4)
}
  0x4f   : > { %s7544_s9 = sld [smem:[#allocation82_spill]]  ;;  %s5515_s19 = scalar_lea.vmem %s547_s22, 16 }
  0x50   : > { %p5516_p10 = scmp.ne.s32.totalorder %s547_s22, %s5515_s19  ;;  %s5522_s4 = scalar_lea.vmem %s547_s22, 32 }
  0x51   : > { %p5523_p7 = scmp.lt.s32.totalorder %s547_s22, %s547_s22  ;;  %p5524_p3 = scmp.lt.s32.totalorder %s5522_s4, %s5515_s19 }
  0x52   : > { %p5518_p12 = pnand %p5516_p10, %p6003_p0 }
  0x53   : > { %p5525_p9 = por %p5524_p3, %p5523_p7 }
  0x54   : > { %p5519_p1 = pneg %p5518_p12 }
  0x55   : > { %4974 = dma.hbm_to_vmem [thread:$0]  (!%p5997_p2), %s7544_s9, 1024, %s522_s25, [#allocation16], %s7504_s23, %s7504_s23, %s7505_s16  }
  0x56   : > { %p5526_p8 = pnand %p5525_p9, %p5519_p1 }
  0x58   : > { %5529 = shalt.err (!%p5526_p8)
}
  0x59   : > { %4980 = dma.hbm_to_vmem [thread:$0]  (!%p5997_p2), %s7486_s11, 16, %s547_s22, [#allocation19]  }
  0x5a   : > { %s5814_s25 = smov [#allocation8]   ;;  %s5815_s17 = smov [#allocation11]  }
  0x5b   : > { %s457_s1 = sshll.u32 %s5814_s25, 4  ;;  %s487_s23 = sshll.u32 %s5815_s17, 4  ;;  %s458_s1 = int_to_ptr.vmem [resolvable:$true] %s457_s1  ;;  %s488_s23 = int_to_ptr.vmem [resolvable:$true] %s487_s23 }
  0x5c   : > { %s5541_s16 = scalar_lea.vmem %s458_s1, 768  ;;  %p5549_p7 = scmp.lt.s32.totalorder %s458_s1, %s458_s1 }
  0x5d   : > { %p5542_p4 = scmp.ne.s32.totalorder %s458_s1, %s5541_s16  ;;  %p5550_p1 = scmp.lt.s32.totalorder %s5541_s16, %s5541_s16 }
  0x5f   : > { %p5544_p10 = pnand %p5542_p4, %p6003_p0  ;;  %p5551_p3 = por %p5550_p1, %p5549_p7 }
  0x61   : > { %p5545_p12 = pneg %p5544_p10 }
  0x63   : > { %p5552_p9 = pnand %p5551_p3, %p5545_p12 }
  0x65   : > { %5555 = shalt.err (!%p5552_p9)
}
  0x66   : > { %s7545_s19 = smov 12   ;;  %s7546_s4 = smov 192  }
  0x67   : > { %s7547_s3 = sld [smem:[#allocation77_spill]]  ;;  %s5567_s18 = scalar_lea.vmem %s488_s23, 48 }
  0x68   : > { %p5568_p8 = scmp.ne.s32.totalorder %s488_s23, %s5567_s18  ;;  %s5574_s16 = scalar_lea.vmem %s488_s23, 64 }
  0x69   : > { %p5575_p7 = scmp.lt.s32.totalorder %s488_s23, %s488_s23  ;;  %p5576_p12 = scmp.lt.s32.totalorder %s5574_s16, %s5567_s18 }
  0x6a   : > { %p5570_p4 = pnand %p5568_p8, %p6003_p0 }
  0x6b   : > { %p5577_p1 = por %p5576_p12, %p5575_p7 }
  0x6c   : > { %p5571_p10 = pneg %p5570_p4 }
  0x6d   : > { %4959 = dma.hbm_to_vmem [thread:$0]  (!%p5997_p2), %s7547_s3, 768, %s458_s1, [#allocation7], %s7546_s4, %s7546_s4, %s7545_s19  }
  0x6e   : > { %p5578_p3 = pnand %p5577_p1, %p5571_p10 }
  0x70   : > { %5581 = shalt.err (!%p5578_p3)
}
  0x71   : > { %s7548_s6 = sld [smem:[#allocation79_spill]]  ;;  %s5816_s1 = smov [#allocation14]  }
  0x72   : > { %s511_s19 = sshll.u32 %s5816_s1, 4  ;;  %s5817_s4 = smov [#allocation17]   ;;  %s512_s19 = int_to_ptr.vmem [resolvable:$true] %s511_s19 }
  0x73   : > { %s535_s22 = sshll.u32 %s5817_s4, 4  ;;  %s5593_s26 = scalar_lea.vmem %s512_s19, 16  ;;  %s536_s22 = int_to_ptr.vmem [resolvable:$true] %s535_s22 }
  0x74   : > { %p5594_p9 = scmp.ne.s32.totalorder %s512_s19, %s5593_s26  ;;  %s5600_s18 = scalar_lea.vmem %s512_s19, 32 }
  0x75   : > { %p5601_p10 = scmp.lt.s32.totalorder %s512_s19, %s512_s19  ;;  %p5602_p7 = scmp.lt.s32.totalorder %s5600_s18, %s5593_s26 }
  0x76   : > { %p5596_p8 = pnand %p5594_p9, %p6003_p0 }
  0x77   : > { %4965 = dma.hbm_to_vmem [thread:$0]  (!%p5997_p2), %s7548_s6, 48, %s488_s23, [#allocation10]  }
  0x78   : > { %p5597_p4 = pneg %p5596_p8  ;;  %p5603_p12 = por %p5602_p7, %p5601_p10 }
  0x7a   : > { %p5604_p1 = pnand %p5603_p12, %p5597_p4 }
  0x7c   : > { %5607 = shalt.err (!%p5604_p1)
}
  0x7d   : > { %s7549_s8 = sld [smem:[#allocation81_spill]]  ;;  %s5619_s25 = scalar_lea.vmem %s536_s22, 16 }
  0x7e   : > { %p5620_p3 = scmp.ne.s32.totalorder %s536_s22, %s5619_s25  ;;  %s5626_s17 = scalar_lea.vmem %s536_s22, 32 }
  0x7f   : > { %p5627_p8 = scmp.lt.s32.totalorder %s536_s22, %s536_s22  ;;  %p5628_p6 = scmp.lt.s32.totalorder %s5626_s17, %s5619_s25 }
  0x80   : > { %p5622_p11 = pnand %p5620_p3, %p6003_p0 }
  0x81   : > { %p5629_p13 = por %p5628_p6, %p5627_p8 }
  0x82   : > { %p5623_p9 = pneg %p5622_p11 }
  0x83   : > { %4971 = dma.hbm_to_vmem [thread:$0]  (!%p5997_p2), %s7549_s8, 16, %s512_s19, [#allocation13]  }
  0x84   : > { %p5630_p10 = pnand %p5629_p13, %p5623_p9 }
  0x86   : > { %5633 = shalt.err (!%p5630_p10)
}
  0x87   : > { %4977 = dma.hbm_to_vmem [thread:$0]  (!%p5997_p2), %s7485_s10, 16, %s536_s22, [#allocation16]  }
  0x88   : > { %s5818_s19 = smov [#allocation20]   ;;  %s5819_s18 = smov [#allocation21]  }
  0x89   : > { %s559_s26 = sshll.u32 %s5818_s19, 4  ;;  %s573_s16 = sshll.u32 %s5819_s18, 4  ;;  %s560_s26 = int_to_ptr.vmem [resolvable:$true] %s559_s26  ;;  %s574_s16 = int_to_ptr.vmem [resolvable:$true] %s573_s16 }
  0x8a   : > { %s5645_s23 = scalar_lea.vmem %s560_s26, 1024  ;;  %p5653_p6 = scmp.lt.s32.totalorder %s560_s26, %s560_s26 }
  0x8b   : > { %p5646_p11 = scmp.ne.s32.totalorder %s560_s26, %s5645_s23  ;;  %p5654_p13 = scmp.lt.s32.totalorder %s5645_s23, %s5645_s23 }
  0x8d   : > { %p5648_p4 = pnand %p5646_p11, %p6003_p0  ;;  %p5655_p12 = por %p5654_p13, %p5653_p6 }
  0x8f   : > { %p5649_p7 = pneg %p5648_p4 }
  0x91   : > { %p5656_p1 = pnand %p5655_p12, %p5649_p7 }
  0x93   : > { %5659 = shalt.err (!%p5656_p1)
}
  0x94   : > { %s7550_s25 = smov 4   ;;  %s7551_s17 = smov 64  }
  0x95   : > { %4983 = dma.hbm_to_vmem [thread:$0]  (!%p5997_p2), %s7488_s13, 1024, %s560_s26, [#allocation19], %s7551_s17, %s7551_s17, %s7550_s25  }
  0x96   : > { %s5671_s4 = scalar_lea.vmem %s574_s16, 16  ;;  %s5678_s19 = scalar_lea.vmem %s574_s16, 32 }
  0x97   : > { %p5672_p3 = scmp.ne.s32.totalorder %s574_s16, %s5671_s4  ;;  %p5679_p10 = scmp.lt.s32.totalorder %s574_s16, %s574_s16 }
  0x98   : > { %p5680_p11 = scmp.lt.s32.totalorder %s5678_s19, %s5671_s4 }
  0x99   : > { %p5674_p9 = pnand %p5672_p3, %p6003_p0 }
  0x9a   : > { %p5681_p4 = por %p5680_p11, %p5679_p10 }
  0x9b   : > { %p5675_p8 = pneg %p5674_p9 }
  0x9d   : > { %p5682_p7 = pnand %p5681_p4, %p5675_p8 }
  0x9f   : > { %5685 = shalt.err (!%p5682_p7)
}
  0xa0   : > { %4986 = dma.hbm_to_vmem [thread:$0]  (!%p5997_p2), %s7489_s14, 16, %s574_s16, [#allocation22]  }
  0xa1   : > { %p4338_p6 = scmp.ge.s32.totalorder %s5804_s29, 2 }
  0xa3   : > { %586 = sbr.rel (%p4338_p6) target bundleno = 211 (0xd3), region = 72 }
  0xa8   : > { %s590_s30 = sand.u32 1, %s5800_s28   ;;  %s4499_s26 = sshll.u32 %s5804_s29, 7 }
  0xa9   : > { %s4339_s0 = sshll.u32 %s590_s30, 6  ;;  %s7552_s22 = sld [smem:[#allocation75_spill]] }
  0xaa   : > { %s4923_s1 = scalar_select %p5968_p5, [#allocation0], [#allocation26] }
  0xab   : > { %s594_s4 = scalar_lea.vmem [#allocation3], %s4339_s0  ;;  %s5820_s23 = smov 256  }
  0xac   : > { %s613_s19 = sshll.u32 %s594_s4, 4  ;;  %s605_s18 = sld [smem:[%s4923_s1]]   ;;  %s614_s19 = int_to_ptr.vmem [resolvable:$true] %s613_s19 }
  0xad   : > { %4924 = sst [smem:[#allocation25]] (%p5968_p5), %s5820_s23  ;;  %s5821_s3 = smov 128  }
  0xae   : > { %4925 = sst [smem:[#allocation25 + $0x1]] (%p5968_p5), %s5821_s3  ;;  %s5822_s6 = smov 2  }
  0xaf   : > { %s600_s16 = scalar_lea.hbm %s7552_s22, %s4499_s26  ;;  %4926 = sst [smem:[#allocation25 + $0x2]] (%p5968_p5), %s5822_s6 }
  0xb0   : > { %s5823_s7 = smov 64   ;;  %s5824_s25 = smov 4  }
  0xb1   : > { %4927 = sst [smem:[#allocation25 + $0x3]] (%p5968_p5), %s5823_s7  ;;  %s591_s22 = scalar_lea.sflag [#allocation4], %s590_s30 }
  0xb2   : > { %4928 = sst [smem:[#allocation25 + $0x4]] (%p5968_p5), %s5823_s7  ;;  %s4342_s26 = sshll.u32 %s605_s18, 26 }
  0xb3   : > { %4929 = sst [smem:[#allocation25 + $0x5]] (%p5968_p5), %s5824_s25  ;;  %s4343_s17 = sadd.s32 134217728, %s4342_s26 }
  0xb4   : > { %s5825_s1 = smov 131072   ;;  %s636_s3 = sand.u32 1, %s5804_s29  }
  0xb5   : > { %4930 = dma.general (%p5968_p5), %s600_s16, 1024, %s614_s19, %s591_s22, %s5825_s1, [#allocation25], %s4343_s17, 0  }
  0xb6   : > { %s4500_s4 = sshll.u32 %s5804_s29, 10  ;;  %s7553_s8 = sld [smem:[#allocation76_spill]] }
  0xb7   : > { %s640_s7 = scalar_lea.vmem [#allocation6], %s4339_s0  ;;  %s6125_s30 = scalar_lea.sflag [#allocation7], %s636_s3 }
  0xb8   : > { %s647_s18 = sshll.u32 %s640_s7, 4  ;;  %s6123_s18 = int_to_ptr.vmem [resolvable:$true] %s647_s18 }
  0xbc   : > { %s6121_s9 = scalar_lea.hbm %s7553_s8, %s4500_s4  ;;  %s5690_s25 = scalar_lea.hbm %s7553_s8, 2048 }
  0xbd   : > { %s5686_s16 = scalar_lea.hbm %s6121_s9, 1024  ;;  %p5691_p12 = scmp.lt.s32.totalorder %s6121_s9, %s7553_s8 }
  0xbe   : > { %p5687_p2 = scmp.ne.s32.totalorder %s6121_s9, %s5686_s16  ;;  %p5692_p1 = scmp.lt.s32.totalorder %s5690_s25, %s5686_s16 }
  0xc0   : > { %p5688_p0 = pnand %p5687_p2, %p5968_p5  ;;  %p5693_p3 = por %p5692_p1, %p5691_p12 }
  0xc2   : > { %p5689_p13 = pneg %p5688_p0 }
  0xc4   : > { %p5694_p9 = pnand %p5693_p3, %p5689_p13 }
  0xc6   : > { %5697 = shalt.err (!%p5694_p9)
}
  0xc7   : > { %s5698_s0 = scalar_lea.vmem %s6123_s18, 1024  ;;  %s5826_s1 = smov [#allocation6]  }
  0xc8   : > { %p5699_p8 = scmp.ne.s32.totalorder %s6123_s18, %s5698_s0  ;;  %s5702_s3 = sshll.u32 %s5826_s1, 4  ;;  %s5703_s3 = int_to_ptr.vmem [resolvable:$false] %s5702_s3 }
  0xc9   : > { %s5704_s4 = scalar_lea.vmem %s5703_s3, 2048  ;;  %p5705_p4 = scmp.lt.s32.totalorder %s6123_s18, %s5703_s3 }
  0xca   : > { %p5700_p10 = pnand %p5699_p8, %p5968_p5  ;;  %p5706_p7 = scmp.lt.s32.totalorder %s5704_s4, %s5698_s0 }
  0xcc   : > { %p5701_p11 = pneg %p5700_p10  ;;  %p5707_p2 = por %p5706_p7, %p5705_p4 }
  0xce   : > { %p5708_p0 = pnand %p5707_p2, %p5701_p11 }
  0xd0   : > { %5711 = shalt.err (!%p5708_p0)
}
  0xd1   : > { %s5827_s6 = smov 64   ;;  %s5828_s23 = smov 4  }
  0xd2   : > { %4931 = dma.hbm_to_vmem [thread:$0]  (%p5968_p5), %s6121_s9, 1024, %s6123_s18, %s6125_s30, %s5827_s6, %s5827_s6, %s5828_s23  }
  0xd3 PF: > { %p7554_p13 = scmp.ne.s32.totalorder %s7539_s24, 0 }
  0xd5   : > { %668 = sbr.rel (%p7554_p13) target bundleno = 3804 (0xedc), region = 88 }
  0xda   : > { %s6151_s7 = sand.u32 1, %s5796_s27   ;;  %p7555_p12 = scmp.ne.s32.totalorder %s7534_s21, 0 }
  0xdb   : > { %s4348_s16 = sshll.u32 %s6151_s7, 6  ;;  %s671_s19 = scalar_lea.sflag [#allocation4], %s6151_s7 }
  0xdc   : > { %s6155_s26 = scalar_lea.vmem [#allocation3], %s4348_s16 }
  0xdd   : > { %5755 = dma.done.wait (%p7555_p12), %s671_s19, 1024  }
  0xde   : > { %5757 = vsyncadd (%p7555_p12), %s671_s19, 4294966272  ;;  %s679_s9 = sand.u32 1, %s5950_s12   ;;  %s6162_s24 = scalar_lea.vmem [#allocation6], %s4348_s16 }
  0xdf   : > { %s680_s20 = scalar_lea.sflag [#allocation7], %s679_s9 }
  0xe0   : > { %5759 = dma.done.wait (%p7555_p12), %s680_s20, 1024  }
  0xe1   : > { %5761 = vsyncadd (%p7555_p12), %s680_s20, 4294966272  ;;  %p7556_p5 = scmp.eq.s32.totalorder %s5950_s12, 0 }
  0xe3   : > { %5763 = dma.done.wait (%p7556_p5), [#allocation7], 768   ;;  %p7557_p1 = pmov %p7556_p5 }
  0xe5   : > { %5765 = vsyncadd (%p7557_p1), [#allocation7], 4294966528  ;;  %p7558_p3 = pmov %p7557_p1 }
  0xe6   : > { %p7559_p9 = pmov %p7557_p1 }
  0xe7   : > { %5767 = dma.done.wait (%p7558_p3), [#allocation10], 3120  }
  0xe8   : > { %5769 = vsyncadd (%p7559_p9), [#allocation10], 4294964176  ;;  %p7560_p8 = pmov %p7557_p1 }
  0xe9   : > { %p7561_p10 = pmov %p7557_p1 }
  0xea   : > { %5771 = dma.done.wait (%p7560_p8), [#allocation13], 1040  }
  0xeb   : > { %5773 = vsyncadd (%p7561_p10), [#allocation13], 4294966256  ;;  %p7562_p11 = pmov %p7557_p1 }
  0xec   : > { %p7563_p4 = pmov %p7557_p1 }
  0xed   : > { %5775 = dma.done.wait (%p7562_p11), [#allocation16], 1040  }
  0xee   : > { %5777 = vsyncadd (%p7563_p4), [#allocation16], 4294966256  ;;  %p7564_p7 = pmov %p7557_p1 }
  0xef   : > { %p7565_p2 = pmov %p7557_p1 }
  0xf0   : > { %5779 = dma.done.wait (%p7564_p7), [#allocation19], 1040  }
  0xf1   : > { %5781 = vsyncadd (%p7565_p2), [#allocation19], 4294966256  ;;  %p7566_p0 = pmov %p7557_p1 }
  0xf3   : > { %5783 = dma.done.wait (%p7566_p0), [#allocation22], 16   ;;  %p7567_p13 = pmov %p7566_p0 }
  0xf4   : > { %v7510_v0 = vmov 0   ;;  %v5074_v1 = vld [vmem:[#allocation8 + $0x1c] ss:$12 sps:$4 sm:$0xff]   ;;  %v5076_v2 = vld [vmem:[#allocation8 + $0x18] ss:$12 sps:$4 sm:$0xff]   ;;  %v6197_v6 = vld [vmem:[%s6155_s26 + $0x30] sm:$0xff]   ;;  %v7509_v40 = vlaneseq }
  0xf5   : > { %5785 = vsyncadd (%p7567_p13), [#allocation22], 4294967280  ;;  %1024 = vmatprep.mubr.bf16.mxu1 %v7510_v0  ;;  %964 = vmatprep.mubr.bf16.mxu0 %v7510_v0  ;;  %v5077_v3 = vld [vmem:[#allocation8 + $0x4] ss:$12 sps:$4 sm:$0xff]   ;;  %v5079_v4 = vld [vmem:[#allocation8] ss:$12 sps:$4 sm:$0xff]  }
  0xf6   : > { %5073 = vset.pattern.permute.xlu1 %v7510_v0  ;;  %5072 = vset.pattern.permute.xlu0 %v7510_v0  ;;  %v5081_v5 = vld [vmem:[#allocation8 + $0x20] ss:$12 sps:$4 sm:$0xff]   ;;  %vm907_vm0 = vcmask 261120   ;;  %v5083_v7 = vld [vmem:[#allocation8 + $0x8] ss:$12 sps:$4 sm:$0xff]   ;;  %v7512_v9 = vmov 0.0  }
  0xf7   : > { %4899 = vmatprep.subr.bf16.mxu1 %v5074_v1  ;;  %944 = vmatprep.subr.bf16.mxu0 %v5074_v1  ;;  %v5084_v8 = vld [vmem:[%s6155_s26] sm:$0xff]   ;;  %v6205_v10 = vld [vmem:[#allocation9 + $0xac] ss:$12 sps:$4 sm:$0xff]   ;;  %v5092_v15 = vld [vmem:[%s6155_s26 + $0x10] sm:$0xff]   ;;  %vm5831_vm1 = vmmov 0   ;;  %v6357_v41 = vshrl.u32 %v7509_v40, 7 }
  0xf8   : > { %4901 = vmatpush1.bf16.msra.mxu1 %v5076_v2  ;;  %945 = vmatpush1.bf16.msra.mxu0 %v5076_v2  ;;  %v6209_v11 = vld [vmem:[%s6155_s26 + $0x38] sm:$0xff]   ;;  %v5085_v12 = vld [vmem:[%s6155_s26 + $0x8] sm:$0xff]   ;;  %v6227_v17 = vld [vmem:[#allocation9 + $0x94] ss:$12 sps:$4 sm:$0xff]   ;;  %s4361_s30 = sshll.u32 %s5950_s12, 1  ;;  %s2934_s1 = sld [smem:[#allocation2]] }
  0xf9   : > { %4900 = vmatprep.subr.bf16.mxu1 %v5077_v3  ;;  %946 = vmatprep.subr.bf16.mxu0 %v5077_v3  ;;  %v6218_v13 = vld [vmem:[#allocation9 + $0xb0] ss:$12 sps:$4 sm:$0xff]   ;;  %v6220_v14 = vld [vmem:[#allocation9 + $0xa8] ss:$12 sps:$4 sm:$0xff]   ;;  %v6225_v16 = vld [vmem:[#allocation9 + $0x98] ss:$12 sps:$4 sm:$0xff]  }
  0xfa   : > { %v6231_v18 = vld [vmem:[#allocation9 + $0x80] ss:$12 sps:$4 sm:$0xff]   ;;  %v6234_v19 = vld [vmem:[#allocation9 + $0x90] ss:$12 sps:$4 sm:$0xff]   ;;  %v6242_v22 = vld [vmem:[#allocation9 + $0x78] ss:$12 sps:$4 sm:$0xff]  }
  0xfb   : > { %v5093_v20 = vld [vmem:[%s6155_s26 + $0x18] sm:$0xff]   ;;  %v6250_v24 = vld [vmem:[#allocation9 + $0x64] ss:$12 sps:$4 sm:$0xff]   ;;  %v5101_v29 = vld [vmem:[%s6155_s26 + $0x28] sm:$0xff]   ;;  %7568 = vst [vmem:[#allocation41_spill] sm:$0xff] %v6357_v41  ;;  %v6360_v42 = vsub.s32 0, %v6357_v41 }
  0xfc   : > { %4902 = vmatpush1.bf16.msra.mxu1 %v5079_v4  ;;  %947 = vmatpush1.bf16.msra.mxu0 %v5079_v4  ;;  %v6239_v21 = vld [vmem:[#allocation9 + $0x7c] ss:$12 sps:$4 sm:$0xff]   ;;  %v5100_v25 = vld [vmem:[%s6155_s26 + $0x20] sm:$0xff]   ;;  %v6257_v27 = vld [vmem:[#allocation9 + $0x60] ss:$12 sps:$4 sm:$0xff]   ;;  %v6366_v44 = vsub.s32 1, %v6357_v41 }
  0xfd   : > { %4627 = vmatprep.subr.bf16.mxu1 %v5081_v5  ;;  %4647 = vmatprep.subr.bf16.mxu0 %v7512_v9  ;;  %v6247_v23 = vld [vmem:[#allocation9 + $0x68] ss:$12 sps:$4 sm:$0xff]   ;;  %v6255_v26 = vld [vmem:[#allocation9 + $0x50] ss:$12 sps:$4 sm:$0xff]   ;;  %v6260_v28 = vld [vmem:[#allocation9 + $0x4c] ss:$12 sps:$4 sm:$0xff]  }
  0xfe   : > { %v6268_v30 = vld [vmem:[#allocation9 + $0x38] ss:$12 sps:$4 sm:$0xff]   ;;  %v6270_v31 = vld [vmem:[#allocation9 + $0x48] ss:$12 sps:$4 sm:$0xff]   ;;  %v6280_v33 = vld [vmem:[#allocation9 + $0x20] ss:$12 sps:$4 sm:$0xff]  }
  0xff   : > { %4383 = vmatmul.mubr.msk.bf16.vlgmr.msra.gmra.mxu1 %vm907_vm0, %v6197_v6  ;;  %4377 = vmatmul.mubr.msk.bf16.vlgmr.msra.gmra.mxu0 %vm907_vm0, %v5084_v8  ;;  %v6274_v32 = vld [vmem:[#allocation9 + $0x34] ss:$12 sps:$4 sm:$0xff]   ;;  %v6282_v34 = vld [vmem:[#allocation9 + $0x30] ss:$12 sps:$4 sm:$0xff]   ;;  %v6295_v37 = vld [vmem:[#allocation9 + $0x18] ss:$12 sps:$4 sm:$0xff]  }
 0x100   : > { %4628 = vmatpush3.bf16.msra.mxu1 %v5081_v5  ;;  %1034 = vmatprep.mubr.bf16.mxu1 %v7510_v0  ;;  %v6285_v35 = vld [vmem:[#allocation9 + $0x1c] ss:$12 sps:$4 sm:$0xff]   ;;  %v6299_v38 = vld [vmem:[#allocation9 + $0x4] ss:$12 sps:$4 sm:$0xff]   ;;  %v6305_v39 = vld [vmem:[#allocation9] ss:$12 sps:$4 sm:$0xff]  }
 0x101   : > { %4629 = vmatprep.subr.bf16.mxu1 %v5083_v7  ;;  %974 = vmatprep.mubr.bf16.mxu0 %v7510_v0  ;;  %v6293_v36 = vld [vmem:[#allocation9 + $0x8] ss:$12 sps:$4 sm:$0xff]   ;;  %7569 = vst [vmem:[#allocation42_spill] sm:$0xff] %v6360_v42  ;;  %v818_v43 = vld [vmem:[%s7480_s5] sm:$0x7]  ;;  %7570 = vst [vmem:[#allocation43_spill] sm:$0xff] %v6366_v44 }
 0x102   : > { %4648 = vmatpush3.bf16.msra.mxu0 %v6218_v13  ;;  %v6369_v45 = vrot.slane %v818_v43, %v6360_v42  ;;  %v6372_v46 = vrot.slane %v818_v43, %v6366_v44  ;;  %v6398_v62 = vsub.s32 2, %v6357_v41  ;;  %p787_p12 = scmp.lt.s32.totalorder %s4361_s30, 3  ;;  %vm3036_vm2 = vcmask 1041409   ;;  %s7639_s4 = sld [smem:[#allocation83_spill]] }
 0x103   : > { %4649 = vmatprep.subr.bf16.mxu0 %v7512_v9  ;;  %vm3038_vm3 = vcmask 1042434   ;;  %vm3040_vm4 = vcmask 1043459   ;;  %vm3042_vm5 = vcmask 1044484   ;;  %vm3044_vm6 = vcmask 1045509   ;;  %s7640_s6 = sld [smem:[#allocation39_spill]]  ;;  %s4501_s19 = sshll.u32 %s5950_s12, 8 }
 0x104   : > { %4630 = vmatpush3.bf16.msra.mxu1 %v5083_v7  ;;  %s7652_s30 = smov (!%p787_p12, %s4361_s30), 3  ;;  %vm3046_vm7 = vcmask 1046534   ;;  %vm3048_vm8 = vcmask 1047559   ;;  %vm3059_vm9 = vcmask 64512   ;;  %s7641_s20 = sld [smem:[#allocation84_spill]] }
 0x105   : > { %1319 = vmatprep.subr.bf16.mxu1 %v6205_v10  ;;  %s4362_s25 = sshll.u32 %s7652_s30, 3  ;;  %s5833_s12 = smov [#allocation23]  }
 0x106   : > { %4650 = vmatpush3.bf16.msra.mxu0 %v6225_v16  ;;  %s790_s0 = scalar_lea.vmem %s7477_s2, %s4362_s25  ;;  %s5716_s30 = sshll.u32 %s5833_s12, 4  ;;  %s5717_s30 = int_to_ptr.vmem [resolvable:$false] %s5716_s30 }
 0x107   : > { %4384 = vmatmul.mubr.msk.bf16.gmra.mxu1 %vm907_vm0, %v6209_v11  ;;  %4378 = vmatmul.mubr.msk.bf16.gmra.mxu0 %vm907_vm0, %v5085_v12  ;;  %s5718_s25 = scalar_lea.vmem %s5717_s30, 512 }
 0x108   : > { %4631 = vmatprep.mubr.msk.bf16.mxu1 %vm907_vm0, %v5084_v8  ;;  %984 = vmatprep.mubr.bf16.mxu0 %v7510_v0  ;;  %v6413_v8 = vrot.slane %v818_v43, %v6398_v62 }
 0x109   : > { %4651 = vmatprep.subr.bf16.mxu0 %v7512_v9  ;;  %p7642_p1 = scmp.ne.s32.totalorder %s7640_s6, 0 }
 0x10a   : > { %4652 = vmatpush3.bf16.msra.mxu0 %v6231_v18  ;;  %s7432_s21 = scalar_lea.hbm %s7641_s20, %s4501_s19 }
 0x10b   : > { %4653 = vmatprep.subr.bf16.mxu0 %v7512_v9 }
 0x10e   : > { %4654 = vmatpush3.bf16.msra.mxu0 %v6247_v23 }
 0x10f   : > { %4632 = vmatmul.mubr.msk.bf16.vlgmr.msra.gmra.mxu1 %vm907_vm0, %v5085_v12  ;;  %4379 = vmatmul.mubr.msk.bf16.gmra.mxu0 %vm907_vm0, %v5092_v15 }
 0x110   : > { %1320 = vmatpush1.bf16.msra.mxu1 %v6220_v14  ;;  %4635 = vmatprep.mubr.msk.bf16.mxu1 %vm907_vm0, %v5092_v15 }
 0x111   : > { %1321 = vmatprep.subr.bf16.mxu1 %v6227_v17  ;;  %994 = vmatprep.mubr.bf16.mxu0 %v7510_v0 }
 0x112   : > { %4655 = vmatprep.subr.bf16.mxu0 %v7512_v9 }
 0x113   : > { %4656 = vmatpush3.bf16.msra.mxu0 %v6255_v26 }
 0x114   : > { %1322 = vmatpush1.bf16.msra.mxu1 %v6234_v19  ;;  %4657 = vmatprep.subr.bf16.mxu0 %v7512_v9 }
 0x115   : > { %1323 = vmatprep.subr.bf16.mxu1 %v6239_v21 }
 0x117   : > { %4636 = vmatmul.mubr.msk.bf16.gmra.mxu1 %vm907_vm0, %v5093_v20  ;;  %4380 = vmatmul.mubr.msk.bf16.gmra.mxu0 %vm907_vm0, %v5093_v20 }
 0x118   : > { %1324 = vmatpush1.bf16.msra.mxu1 %v6242_v22  ;;  %4639 = vmatprep.mubr.msk.bf16.mxu1 %vm907_vm0, %v5100_v25 }
 0x119   : > { %1325 = vmatprep.subr.bf16.mxu1 %v6250_v24  ;;  %1004 = vmatprep.mubr.bf16.mxu0 %v7510_v0 }
 0x11a   : > { %4658 = vmatpush3.bf16.msra.mxu0 %v6268_v30 }
 0x11b   : > { %4659 = vmatprep.subr.bf16.mxu0 %v7512_v9 }
 0x11c   : > { %1326 = vmatpush1.bf16.msra.mxu1 %v6257_v27 }
 0x11d   : > { %1327 = vmatprep.subr.bf16.mxu1 %v6260_v28 }
 0x11e   : > { %4660 = vmatpush3.bf16.msra.mxu0 %v6280_v33 }
 0x11f   : > { %4640 = vmatmul.mubr.msk.bf16.gmra.mxu1 %vm907_vm0, %v5101_v29  ;;  %4381 = vmatmul.mubr.msk.bf16.gmra.mxu0 %vm907_vm0, %v5100_v25 }
 0x120   : > { %1328 = vmatpush1.bf16.msra.mxu1 %v6270_v31  ;;  %4643 = vmatprep.mubr.msk.bf16.mxu1 %vm907_vm0, %v6197_v6 }
 0x121   : > { %1329 = vmatprep.subr.bf16.mxu1 %v6274_v32  ;;  %1014 = vmatprep.mubr.bf16.mxu0 %v7510_v0 }
 0x122   : > { %4661 = vmatprep.subr.bf16.mxu0 %v7512_v9 }
 0x123   : > { %4662 = vmatpush3.bf16.msra.mxu0 %v6293_v36 }
 0x124   : > { %1330 = vmatpush1.bf16.msra.mxu1 %v6282_v34  ;;  %4667 = vmatprep.subr.bf16.mxu0 %v7512_v9 }
 0x125   : > { %1331 = vmatprep.subr.bf16.mxu1 %v6285_v35 }
 0x127   : > { %4644 = vmatmul.mubr.msk.bf16.gmra.mxu1 %vm907_vm0, %v6209_v11  ;;  %4382 = vmatmul.mubr.msk.bf16.gmra.mxu0 %vm907_vm0, %v5101_v29 }
 0x128   : > { %1332 = vmatpush1.bf16.msra.mxu1 %v6295_v37  ;;  %1351 = vmatprep.mubr.bf16.mxu1 %v7510_v0 }
 0x129   : > { %1333 = vmatprep.subr.bf16.mxu1 %v6299_v38  ;;  %4663 = vmatprep.mubr.msk.bf16.mxu0 %vm5831_vm1, %v7512_v9 }
 0x12c   : > { %1334 = vmatpush1.bf16.msra.mxu1 %v6305_v39 }
 0x12d   : > { %1446 = vmatprep.subr.bf16.mxu1 %v6205_v10 }
 0x12f   : > { %1352 = vmatmul.mubr.bf16.vlgmr.msra.gmra.mxu1 %v7510_v0  ;;  %4664 = vmatmul.mubr.bf16.vlgmr.msra.gmra.mxu0 %v7510_v0 }
 0x130   : > { %1447 = vmatpush1.bf16.msra.mxu1 %v6220_v14  ;;  %1478 = vmatprep.mubr.bf16.mxu1 %v7510_v0 }
 0x131   : > { %1448 = vmatprep.subr.bf16.mxu1 %v6227_v17  ;;  %4668 = vmatpush3.bf16.msra.mxu0 %v6218_v13 }
 0x132   : > { %4683 = vmatprep.mubr.msk.bf16.mxu0 %vm5831_vm1, %v7512_v9  ;;  %4669 = vmatprep.subr.bf16.mxu0 %v7512_v9 }
 0x134   : > { %1449 = vmatpush1.bf16.msra.mxu1 %v6234_v19 }
 0x135   : > { %1450 = vmatprep.subr.bf16.mxu1 %v6239_v21  ;;  %4670 = vmatpush3.bf16.msra.mxu0 %v6225_v16 }
 0x136   : > { %4671 = vmatprep.subr.bf16.mxu0 %v7512_v9 }
 0x138   : > { %1451 = vmatpush1.bf16.msra.mxu1 %v6242_v22 }
 0x139   : > { %1452 = vmatprep.subr.bf16.mxu1 %v6250_v24  ;;  %4672 = vmatpush3.bf16.msra.mxu0 %v6231_v18 }
 0x13a   : > { %4673 = vmatprep.subr.bf16.mxu0 %v7512_v9 }
 0x13c   : > { %1453 = vmatpush1.bf16.msra.mxu1 %v6257_v27 }
 0x13d   : > { %1454 = vmatprep.subr.bf16.mxu1 %v6260_v28  ;;  %4674 = vmatpush3.bf16.msra.mxu0 %v6247_v23 }
 0x13e   : > { %4675 = vmatprep.subr.bf16.mxu0 %v7512_v9 }
 0x140   : > { %1455 = vmatpush1.bf16.msra.mxu1 %v6270_v31 }
 0x141   : > { %1456 = vmatprep.subr.bf16.mxu1 %v6274_v32  ;;  %4676 = vmatpush3.bf16.msra.mxu0 %v6255_v26 }
 0x142   : > { %4677 = vmatprep.subr.bf16.mxu0 %v7512_v9 }
 0x144   : > { %1457 = vmatpush1.bf16.msra.mxu1 %v6282_v34 }
 0x145   : > { %1458 = vmatprep.subr.bf16.mxu1 %v6285_v35  ;;  %4678 = vmatpush3.bf16.msra.mxu0 %v6268_v30 }
 0x146   : > { %4679 = vmatprep.subr.bf16.mxu0 %v7512_v9 }
 0x148   : > { %1459 = vmatpush1.bf16.msra.mxu1 %v6295_v37 }
 0x149   : > { %1460 = vmatprep.subr.bf16.mxu1 %v6299_v38  ;;  %4680 = vmatpush3.bf16.msra.mxu0 %v6280_v33 }
 0x14a   : > { %4681 = vmatprep.subr.bf16.mxu0 %v7512_v9 }
 0x14c   : > { %1461 = vmatpush1.bf16.msra.mxu1 %v6305_v39 }
 0x14d   : > { %1573 = vmatprep.subr.bf16.mxu1 %v6205_v10  ;;  %4682 = vmatpush3.bf16.msra.mxu0 %v6293_v36 }
 0x14e   : > { %4687 = vmatprep.subr.bf16.mxu0 %v7512_v9 }
 0x1bf   : > { %v1026_v47 = vpop.f32.mrf.mxu1  ;;  %v6374_v48 = vpop.f32.mrf.mxu0 }
 0x1c0   : > { %v6377_v49 = vadd.f32 %v1026_v47, %v6369_v45 }
 0x1c1   : > { %v1028_v50 = vpop.f32.mrf.mxu1  ;;  %v6379_v51 = vpop.f32.mrf.mxu0 }
 0x1c2   : > { %7571 = vst [vmem:[#allocation44_spill] sm:$0xff] %v6377_v49  ;;  %v6382_v52 = vadd.f32 %v1028_v50, %v6372_v46 }
 0x1c3   : > { %v1030_v53 = vpop.f32.mrf.mxu1  ;;  %v6384_v54 = vpop.f32.mrf.mxu0 }
 0x1c4   : > { %7572 = vst [vmem:[#allocation45_spill] sm:$0xff] %v6382_v52  ;;  %v6387_v55 = vadd.f32 %v1030_v53, %v6369_v45 }
 0x1c5   : > { %v1032_v56 = vpop.f32.mrf.mxu1  ;;  %v6389_v57 = vpop.f32.mrf.mxu0 }
 0x1c6   : > { %7573 = vst [vmem:[#allocation46_spill] sm:$0xff] %v6387_v55  ;;  %v6392_v58 = vadd.f32 %v1032_v56, %v6372_v46 }
 0x1c7   : > { %v1036_v59 = vpop.f32.mrf.mxu1  ;;  %v976_v60 = vpop.f32.mrf.mxu0 }
 0x1c8   : > { %7574 = vst [vmem:[#allocation47_spill] sm:$0xff] %v6392_v58  ;;  %v6395_v61 = vadd.f32 %v1036_v59, %v6369_v45  ;;  %v6401_v63 = vadd.f32 %v976_v60, %v6369_v45 }
 0x1c9   : > { %v1038_v1 = vpop.f32.mrf.mxu1  ;;  %v978_v2 = vpop.f32.mrf.mxu0 }
 0x1ca   : > { %7575 = vst [vmem:[#allocation48_spill] sm:$0xff] %v6395_v61  ;;  %v6404_v3 = vadd.f32 %v1038_v1, %v6372_v46  ;;  %v6407_v4 = vadd.f32 %v978_v2, %v6372_v46 }
 0x1cb   : > { %v1040_v5 = vpop.f32.mrf.mxu1  ;;  %v980_v6 = vpop.f32.mrf.mxu0 }
 0x1cc   : > { %7576 = vst [vmem:[#allocation49_spill] sm:$0xff] %v6404_v3  ;;  %v6410_v7 = vadd.f32 %v1040_v5, %v6369_v45  ;;  %v6416_v11 = vadd.f32 %v980_v6, %v6369_v45 }
 0x1cd   : > { %v1042_v12 = vpop.f32.mrf.mxu1  ;;  %v982_v15 = vpop.f32.mrf.mxu0 }
 0x1ce   : > { %7577 = vst [vmem:[#allocation50_spill] sm:$0xff] %v6410_v7  ;;  %v6419_v20 = vadd.f32 %v1042_v12, %v6372_v46  ;;  %v6422_v25 = vadd.f32 %v982_v15, %v6372_v46 }
 0x1cf   : > { %v4633_v29 = vpop.f32.mrf.mxu1  ;;  %v986_v53 = vpop.f32.mrf.mxu0 }
 0x1d0   : > { %7578 = vst [vmem:[#allocation51_spill] sm:$0xff] %v6419_v20  ;;  %v6425_v47 = vadd.f32 %v4633_v29, %v6413_v8  ;;  %v6430_v43 = vadd.f32 %v986_v53, %v6369_v45 }
 0x1d1   : > { %v6427_v50 = vpop.f32.mrf.mxu1  ;;  %v988_v59 = vpop.f32.mrf.mxu0 }
 0x1d2   : > { %v6436_v1 = vadd.f32 %v988_v59, %v6372_v46 }
 0x1d3   : > { %v4634_v56 = vpop.f32.mrf.mxu1  ;;  %v990_v5 = vpop.f32.mrf.mxu0 }
 0x1d4   : > { %v6433_v60 = vadd.f32 %v4634_v56, %v6413_v8  ;;  %v6441_v6 = vadd.f32 %v990_v5, %v6369_v45 }
 0x1d5   : > { %v6438_v2 = vpop.f32.mrf.mxu1  ;;  %v992_v15 = vpop.f32.mrf.mxu0 }
 0x1d6   : > { %v6447_v53 = vadd.f32 %v992_v15, %v6372_v46 }
 0x1d7   : > { %v4637_v12 = vpop.f32.mrf.mxu1  ;;  %v996_v56 = vpop.f32.mrf.mxu0 }
 0x1d8   : > { %v6444_v29 = vadd.f32 %v4637_v12, %v6413_v8  ;;  %v6453_v59 = vadd.f32 %v996_v56, %v6369_v45 }
 0x1d9   : > { %v1095_v40 = vpop.f32.mrf.mxu1  ;;  %v998_v41 = vpop.f32.mrf.mxu0 }
 0x1da   : > { %7579 = vst [vmem:[#allocation52_spill] sm:$0xff] %v6444_v29  ;;  %v6450_v0 = vadd.f32 %v1095_v40, %v6413_v8  ;;  %7580 = vst [vmem:[#allocation53_spill] sm:$0xff] %v6453_v59  ;;  %v6459_v20 = vadd.f32 %v998_v41, %v6372_v46 }
 0x1db   : > { %v4638_v9 = vpop.f32.mrf.mxu1  ;;  %v1000_v3 = vpop.f32.mrf.mxu0 }
 0x1dc   : > { %v6456_v5 = vadd.f32 %v4638_v9, %v6413_v8  ;;  %7582 = vst [vmem:[#allocation55_spill] sm:$0xff] %v6459_v20  ;;  %v6465_v7 = vadd.f32 %v1000_v3, %v6369_v45 }
 0x1dd   : > { %v1098_v12 = vpop.f32.mrf.mxu1  ;;  %v1002_v61 = vpop.f32.mrf.mxu0 }
 0x1de   : > { %7581 = vst [vmem:[#allocation54_spill] sm:$0xff] %v6456_v5  ;;  %v6462_v15 = vadd.f32 %v1098_v12, %v6413_v8  ;;  %7584 = vst [vmem:[#allocation57_spill] sm:$0xff] %v6465_v7  ;;  %v6471_v58 = vadd.f32 %v1002_v61, %v6372_v46 }
 0x1df   : > { %v4641_v40 = vpop.f32.mrf.mxu1  ;;  %v1006_v52 = vpop.f32.mrf.mxu0 }
 0x1e0   : > { %7583 = vst [vmem:[#allocation56_spill] sm:$0xff] %v6462_v15  ;;  %v6468_v56 = vadd.f32 %v4641_v40, %v6413_v8  ;;  %7586 = vst [vmem:[#allocation59_spill] sm:$0xff] %v6471_v58  ;;  %v6477_v55 = vadd.f32 %v1006_v52, %v6369_v45 }
 0x1e1   : > { %v1111_v9 = vpop.f32.mrf.mxu1  ;;  %v1008_v49 = vpop.f32.mrf.mxu0 }
 0x1e2   : > { %7585 = vst [vmem:[#allocation58_spill] sm:$0xff] %v6468_v56  ;;  %v6474_v41 = vadd.f32 %v1111_v9, %v6413_v8  ;;  %7588 = vst [vmem:[#allocation61_spill] sm:$0xff] %v6477_v55  ;;  %v6483_v5 = vadd.f32 %v1008_v49, %v6372_v46 }
 0x1e3   : > { %v4642_v12 = vpop.f32.mrf.mxu1  ;;  %v1010_v56 = vpop.f32.mrf.mxu0 }
 0x1e4   : > { %7587 = vst [vmem:[#allocation60_spill] sm:$0xff] %v6474_v41  ;;  %v6480_v3 = vadd.f32 %v4642_v12, %v6413_v8  ;;  %7590 = vst [vmem:[#allocation63_spill] sm:$0xff] %v6483_v5  ;;  %v6489_v29 = vadd.f32 %v1010_v56, %v6369_v45 }
 0x1e5   : > { %v1114_v40 = vpop.f32.mrf.mxu1  ;;  %v1012_v41 = vpop.f32.mrf.mxu0 }
 0x1e6   : > { %7589 = vst [vmem:[#allocation62_spill] sm:$0xff] %v6480_v3  ;;  %v6486_v61 = vadd.f32 %v1114_v40, %v6413_v8  ;;  %7592 = vst [vmem:[#allocation65_spill] sm:$0xff] %v6489_v29  ;;  %v6495_v55 = vadd.f32 %v1012_v41, %v6372_v46  ;;  %v1174_v3 = vld [vmem:[#allocation11] sm:$0x7] }
 0x1e7   : > { %v4645_v9 = vpop.f32.mrf.mxu1  ;;  %v1016_v49 = vpop.f32.mrf.mxu0 }
 0x1e8   : > { %7591 = vst [vmem:[#allocation64_spill] sm:$0xff] %v6486_v61  ;;  %v6492_v52 = vadd.f32 %v4645_v9, %v6413_v8  ;;  %7594 = vst [vmem:[#allocation67_spill] sm:$0xff] %v6495_v55  ;;  %v6501_v40 = vadd.f32 %v1016_v49, %v6369_v45  ;;  %v6507_v9 = vrot.slane %v1174_v3, %v6360_v42 }
 0x1e9   : > { %v1127_v12 = vpop.f32.mrf.mxu1  ;;  %v1018_v56 = vpop.f32.mrf.mxu0  ;;  %v6522_v42 = vrot.slane %v1174_v3, %v6366_v44  ;;  %v969_v44 = vadd.f32 %v6379_v51, %v6372_v46 }
 0x1ea   : > { %7593 = vst [vmem:[#allocation66_spill] sm:$0xff] %v6492_v52  ;;  %v6498_v5 = vadd.f32 %v1127_v12, %v6413_v8  ;;  %7596 = vst [vmem:[#allocation69_spill] sm:$0xff] %v6501_v40  ;;  %v6510_v41 = vadd.f32 %v1018_v56, %v6372_v46 }
 0x1eb   : > { %v4646_v61 = vpop.f32.mrf.mxu1  ;;  %v1020_v55 = vpop.f32.mrf.mxu0 }
 0x1ec   : > { %7595 = vst [vmem:[#allocation68_spill] sm:$0xff] %v6498_v5  ;;  %v6504_v29 = vadd.f32 %v4646_v61, %v6413_v8  ;;  %7598 = vst [vmem:[#allocation71_spill] sm:$0xff] %v6510_v41  ;;  %v6516_v12 = vadd.f32 %v1020_v55, %v6369_v45  ;;  %v967_v61 = vadd.f32 %v6374_v48, %v6369_v45 }
 0x1ed   : > { %v1130_v52 = vpop.f32.mrf.mxu1  ;;  %v1022_v5 = vpop.f32.mrf.mxu0  ;;  %v971_v55 = vadd.f32 %v6384_v54, %v6369_v45  ;;  %v973_v45 = vadd.f32 %v6389_v57, %v6372_v46 }
 0x1ee   : > { %7597 = vst [vmem:[#allocation70_spill] sm:$0xff] %v6504_v29  ;;  %v6513_v58 = vadd.f32 %v1130_v52, %v6413_v8  ;;  %7600 = vst [vmem:[#allocation73_spill] sm:$0xff] %v6516_v12  ;;  %v6525_v56 = vadd.f32 %v1022_v5, %v6372_v46 }
 0x1ef   : > { %v1353_v49 = vpop.f32.mrf.mxu1  ;;  %v1396_v40 = vpop.f32.mrf.mxu0 }
 0x1f0   : > { %7599 = vst [vmem:[#allocation72_spill] sm:$0xff] %v6513_v58  ;;  %v1354_v29 = vadd.f32 %v1353_v49, %v6507_v9  ;;  %7601 = vst [vmem:[#allocation74_spill] sm:$0xff] %v6525_v56 }
 0x1f1   : > { %v1355_v41 = vpop.f32.mrf.mxu1  ;;  %v4665_v20 = vpop.f32.mrf.mxu0 }
 0x1f2   : > { %v1403_v52 = vadd.f32 %v1354_v29, %v967_v61  ;;  %v1356_v7 = vadd.f32 %v1355_v41, %v6522_v42 }
 0x1f3   : > { %v1357_v58 = vpop.f32.mrf.mxu1  ;;  %v1399_v59 = vpop.f32.mrf.mxu0 }
 0x1f4   : > { %v4417_v12 = vmul.f32 -1.442695, %v1403_v52  ;;  %v1358_v48 = vadd.f32 %v1357_v58, %v6507_v9  ;;  %v1417_v61 = vadd.f32 %v1356_v7, %v969_v44 }
 0x1f5   : > { %v1359_v49 = vpop.f32.mrf.mxu1  ;;  %v4666_v29 = vpop.f32.mrf.mxu0 }
 0x1f6   : > { %5170 = vpow2.f32 %v4417_v12  ;;  %v1404_v5 = vadd.f32 %v1358_v48, %v971_v55  ;;  %v1360_v56 = vadd.f32 %v1359_v49, %v6522_v42  ;;  %v4419_v41 = vmul.f32 -1.442695, %v1417_v61 }
 0x1f7   : > { %v6537_v55 = vrot.slane %v1174_v3, %v6398_v62  ;;  %v1080_v49 = vadd.f32 %v6427_v50, %v6413_v8  ;;  %v1083_v3 = vadd.f32 %v6438_v2, %v6413_v8  ;;  %v7602_v2 = vmov 0.0  }
 0x1f8   : > { %v4418_v20 = vmul.f32 -1.442695, %v1404_v5  ;;  %v1418_v54 = vadd.f32 %v1360_v56, %v973_v45 }
 0x1f9   : > { %v1397_v46 = vadd.f32 %v1396_v40, %v6537_v55 }
 0x1fa   : > { %5172 = vpow2.f32 %v4418_v20  ;;  %v4420_v52 = vmul.f32 -1.442695, %v1418_v54 }
 0x1fb   : > { %5174 = vpow2.f32 %v4419_v41 }
 0x1fc   : > { %5176 = vpow2.f32 %v4420_v52 }
 0x203   : > { %v5171_v58 = vpop.eup %5170 }
 0x204   : > { %v1411_v15 = vadd.f32 1.0, %v5171_v58 }
 0x206   : > { %5178 = vrcp.f32 %v1411_v15  ;;  %v1400_v15 = vadd.f32 %v1399_v59, %v6537_v55 }
 0x207   : > { %v5173_v51 = vpop.eup %5172 }
 0x208   : > { %v1412_v12 = vadd.f32 1.0, %v5173_v51  ;;  %v5175_v44 = vpop.eup %5174 }
 0x209   : > { %v5177_v7 = vpop.eup %5176  ;;  %v1425_v48 = vadd.f32 1.0, %v5175_v44 }
 0x20a   : > { %5180 = vrcp.f32 %v1412_v12  ;;  %v1426_v56 = vadd.f32 1.0, %v5177_v7 }
 0x20b   : > { %5182 = vrcp.f32 %v1425_v48 }
 0x20c   : > { %5184 = vrcp.f32 %v1426_v56 }
 0x213   : > { %v5179_v57 = vpop.eup %5178 }
 0x214   : > { %v1431_v5 = vmul.f32 %v5179_v57, %v1397_v46  ;;  %v7603_v46 = vmov 0  }
 0x216   : > { %v1433_v29 = vadd.f32 %v1431_v5, %v1080_v49 }
 0x217   : > { %v5181_v61 = vpop.eup %5180 }
 0x218   : > { %5186 = vtanh.f32 %v1433_v29  ;;  %v1432_v20 = vmul.f32 %v5181_v61, %v1400_v15  ;;  %v5183_v40 = vpop.eup %5182 }
 0x219   : > { %v5185_v54 = vpop.eup %5184  ;;  %v1437_v41 = vsub.f32 1.0, %v5183_v40  ;;  %v1441_v50 = vmul.f32 0.0, %v5183_v40 }
 0x21a   : > { %v1434_v45 = vadd.f32 %v1432_v20, %v1083_v3  ;;  %v1438_v51 = vsub.f32 1.0, %v5185_v54  ;;  %v1442_v7 = vmul.f32 0.0, %v5185_v54 }
 0x21c   : > { %5188 = vtanh.f32 %v1434_v45 }
 0x225   : > { %v5187_v52 = vpop.eup %5186 }
 0x226   : > { %v1439_v58 = vmul.f32 %v5187_v52, %v1437_v41 }
 0x228   : > { %v6545_v12 = vadd.f32 %v1441_v50, %v1439_v58 }
 0x229   : > { %v5189_v44 = vpop.eup %5188 }
 0x22a   : > { %v1440_v59 = vmul.f32 %v5189_v44, %v1438_v51 }
 0x22c   : > { %v6547_v48 = vadd.f32 %v1442_v7, %v1440_v59 }
 0x22e   : > { %v1445_v8 = vpack.c.bf16 %v6547_v48, %v6545_v12 }
 0x230   : > { %1479 = vmatmul.mubr.bf16.vlgmr.msra.gmra.mxu1 %v1445_v8  ;;  %4684 = vmatmul.mubr.bf16.vlgmr.msra.gmra.mxu0 %v1445_v8 }
 0x231   : > { %1574 = vmatpush1.bf16.msra.mxu1 %v6220_v14  ;;  %4688 = vmatpush3.bf16.msra.mxu0 %v6218_v13 }
 0x232   : > { %1575 = vmatprep.subr.bf16.mxu1 %v6227_v17  ;;  %4689 = vmatprep.subr.bf16.mxu0 %v7602_v2 }
 0x233   : > { %1605 = vmatprep.mubr.bf16.mxu1 %v7603_v46  ;;  %4703 = vmatprep.mubr.msk.bf16.mxu0 %vm5831_vm1, %v7602_v2 }
 0x235   : > { %1576 = vmatpush1.bf16.msra.mxu1 %v6234_v19  ;;  %4690 = vmatpush3.bf16.msra.mxu0 %v6225_v16 }
 0x236   : > { %1577 = vmatprep.subr.bf16.mxu1 %v6239_v21  ;;  %4691 = vmatprep.subr.bf16.mxu0 %v7602_v2 }
 0x239   : > { %1578 = vmatpush1.bf16.msra.mxu1 %v6242_v22  ;;  %4692 = vmatpush3.bf16.msra.mxu0 %v6231_v18 }
 0x23a   : > { %1579 = vmatprep.subr.bf16.mxu1 %v6250_v24  ;;  %4693 = vmatprep.subr.bf16.mxu0 %v7602_v2 }
 0x23d   : > { %1580 = vmatpush1.bf16.msra.mxu1 %v6257_v27  ;;  %4694 = vmatpush3.bf16.msra.mxu0 %v6247_v23 }
 0x23e   : > { %1581 = vmatprep.subr.bf16.mxu1 %v6260_v28  ;;  %4695 = vmatprep.subr.bf16.mxu0 %v7602_v2 }
 0x241   : > { %1582 = vmatpush1.bf16.msra.mxu1 %v6270_v31  ;;  %4696 = vmatpush3.bf16.msra.mxu0 %v6255_v26 }
 0x242   : > { %1583 = vmatprep.subr.bf16.mxu1 %v6274_v32  ;;  %4697 = vmatprep.subr.bf16.mxu0 %v7602_v2 }
 0x245   : > { %1584 = vmatpush1.bf16.msra.mxu1 %v6282_v34  ;;  %4698 = vmatpush3.bf16.msra.mxu0 %v6268_v30 }
 0x246   : > { %1585 = vmatprep.subr.bf16.mxu1 %v6285_v35  ;;  %4699 = vmatprep.subr.bf16.mxu0 %v7602_v2 }
 0x249   : > { %1586 = vmatpush1.bf16.msra.mxu1 %v6295_v37  ;;  %4700 = vmatpush3.bf16.msra.mxu0 %v6280_v33 }
 0x24a   : > { %1587 = vmatprep.subr.bf16.mxu1 %v6299_v38  ;;  %4701 = vmatprep.subr.bf16.mxu0 %v7602_v2 }
 0x24d   : > { %1588 = vmatpush1.bf16.msra.mxu1 %v6305_v39  ;;  %4702 = vmatpush3.bf16.msra.mxu0 %v6293_v36 }
 0x24e   : > { %1700 = vmatprep.subr.bf16.mxu1 %v6205_v10  ;;  %4707 = vmatprep.subr.bf16.mxu0 %v7602_v2 }
 0x2f0   : > { %v1480_v57 = vpop.f32.mrf.mxu1  ;;  %v1523_v56 = vpop.f32.mrf.mxu0 }
 0x2f1   : > { %v1481_v49 = vadd.f32 %v1480_v57, %v6507_v9 }
 0x2f2   : > { %v1482_v5 = vpop.f32.mrf.mxu1  ;;  %v4685_v29 = vpop.f32.mrf.mxu0 }
 0x2f3   : > { %v1530_v15 = vadd.f32 %v1481_v49, %v6401_v63  ;;  %v1483_v45 = vadd.f32 %v1482_v5, %v6522_v42  ;;  %v1524_v29 = vadd.f32 %v1523_v56, %v6537_v55 }
 0x2f4   : > { %v1484_v61 = vpop.f32.mrf.mxu1  ;;  %v1526_v3 = vpop.f32.mrf.mxu0 }
 0x2f5   : > { %v4421_v20 = vmul.f32 -1.442695, %v1530_v15  ;;  %v1485_v40 = vadd.f32 %v1484_v61, %v6507_v9  ;;  %v1544_v58 = vadd.f32 %v1483_v45, %v6407_v4 }
 0x2f6   : > { %v1486_v54 = vpop.f32.mrf.mxu1  ;;  %v4686_v41 = vpop.f32.mrf.mxu0 }
 0x2f7   : > { %5190 = vpow2.f32 %v4421_v20  ;;  %v1531_v10 = vadd.f32 %v1485_v40, %v6416_v11  ;;  %v1487_v52 = vadd.f32 %v1486_v54, %v6522_v42  ;;  %v4423_v51 = vmul.f32 -1.442695, %v1544_v58 }
 0x2f8   : > { %v1527_v20 = vadd.f32 %v1526_v3, %v6537_v55 }
 0x2f9   : > { %v4422_v50 = vmul.f32 -1.442695, %v1531_v10  ;;  %v1545_v63 = vadd.f32 %v1487_v52, %v6422_v25 }
 0x2fb   : > { %5192 = vpow2.f32 %v4422_v50  ;;  %v4424_v44 = vmul.f32 -1.442695, %v1545_v63 }
 0x2fc   : > { %5194 = vpow2.f32 %v4423_v51 }
 0x2fd   : > { %5196 = vpow2.f32 %v4424_v44 }
 0x304   : > { %v5191_v59 = vpop.eup %5190 }
 0x305   : > { %v1538_v7 = vadd.f32 1.0, %v5191_v59 }
 0x307   : > { %5198 = vrcp.f32 %v1538_v7 }
 0x308   : > { %v5193_v8 = vpop.eup %5192 }
 0x309   : > { %v1539_v57 = vadd.f32 1.0, %v5193_v8  ;;  %v5195_v49 = vpop.eup %5194 }
 0x30a   : > { %v5197_v11 = vpop.eup %5196  ;;  %v1552_v5 = vadd.f32 1.0, %v5195_v49 }
 0x30b   : > { %5200 = vrcp.f32 %v1539_v57  ;;  %v1553_v15 = vadd.f32 1.0, %v5197_v11 }
 0x30c   : > { %5202 = vrcp.f32 %v1552_v5 }
 0x30d   : > { %5204 = vrcp.f32 %v1553_v15 }
 0x314   : > { %v5199_v4 = vpop.eup %5198 }
 0x315   : > { %v1558_v61 = vmul.f32 %v5199_v4, %v1524_v29 }
 0x317   : > { %v1560_v25 = vadd.f32 %v1558_v61, %v6425_v47 }
 0x318   : > { %v5201_v45 = vpop.eup %5200 }
 0x319   : > { %5206 = vtanh.f32 %v1560_v25  ;;  %v1559_v40 = vmul.f32 %v5201_v45, %v1527_v20  ;;  %v5203_v41 = vpop.eup %5202 }
 0x31a   : > { %v5205_v10 = vpop.eup %5204  ;;  %v1564_v52 = vsub.f32 1.0, %v5203_v41  ;;  %v1568_v50 = vmul.f32 %v5203_v41, %v6545_v12 }
 0x31b   : > { %v1561_v54 = vadd.f32 %v1559_v40, %v6433_v60  ;;  %v1565_v63 = vsub.f32 1.0, %v5205_v10  ;;  %v1569_v3 = vmul.f32 %v5205_v10, %v6547_v48 }
 0x31d   : > { %5208 = vtanh.f32 %v1561_v54 }
 0x326   : > { %v5207_v58 = vpop.eup %5206 }
 0x327   : > { %v1566_v56 = vmul.f32 %v5207_v58, %v1564_v52  ;;  %v7604_v52 = vld [vmem:[#allocation56_spill] sm:$0xff] }
 0x329   : > { %v6599_v51 = vadd.f32 %v1568_v50, %v1566_v56 }
 0x32a   : > { %v5209_v47 = vpop.eup %5208 }
 0x32b   : > { %v1567_v44 = vmul.f32 %v5209_v47, %v1565_v63 }
 0x32d   : > { %v6602_v59 = vadd.f32 %v1569_v3, %v1567_v44 }
 0x32f   : > { %v1572_v60 = vpack.c.bf16 %v6602_v59, %v6599_v51 }
 0x331   : > { %1606 = vmatmul.mubr.bf16.vlgmr.msra.gmra.mxu1 %v1572_v60  ;;  %4704 = vmatmul.mubr.bf16.vlgmr.msra.gmra.mxu0 %v1572_v60 }
 0x332   : > { %1701 = vmatpush1.bf16.msra.mxu1 %v6220_v14  ;;  %4708 = vmatpush3.bf16.msra.mxu0 %v6218_v13  ;;  %v6639_v13 = vld [vmem:[#allocation9 + $0xac] ss:$12 sps:$4 sm:$0xff]  }
 0x333   : > { %1702 = vmatprep.subr.bf16.mxu1 %v6227_v17  ;;  %4709 = vmatprep.subr.bf16.mxu0 %v7602_v2 }
 0x334   : > { %1732 = vmatprep.mubr.bf16.mxu1 %v7603_v46  ;;  %4723 = vmatprep.mubr.msk.bf16.mxu0 %vm5831_vm1, %v7602_v2 }
 0x336   : > { %1703 = vmatpush1.bf16.msra.mxu1 %v6234_v19  ;;  %4710 = vmatpush3.bf16.msra.mxu0 %v6225_v16 }
 0x337   : > { %1704 = vmatprep.subr.bf16.mxu1 %v6239_v21  ;;  %4711 = vmatprep.subr.bf16.mxu0 %v7602_v2 }
 0x33a   : > { %1705 = vmatpush1.bf16.msra.mxu1 %v6242_v22  ;;  %4712 = vmatpush3.bf16.msra.mxu0 %v6231_v18 }
 0x33b   : > { %1706 = vmatprep.subr.bf16.mxu1 %v6250_v24  ;;  %4713 = vmatprep.subr.bf16.mxu0 %v7602_v2 }
 0x33e   : > { %1707 = vmatpush1.bf16.msra.mxu1 %v6257_v27  ;;  %4714 = vmatpush3.bf16.msra.mxu0 %v6247_v23 }
 0x33f   : > { %1708 = vmatprep.subr.bf16.mxu1 %v6260_v28  ;;  %4715 = vmatprep.subr.bf16.mxu0 %v7602_v2 }
 0x342   : > { %1709 = vmatpush1.bf16.msra.mxu1 %v6270_v31  ;;  %4716 = vmatpush3.bf16.msra.mxu0 %v6255_v26 }
 0x343   : > { %1710 = vmatprep.subr.bf16.mxu1 %v6274_v32  ;;  %4717 = vmatprep.subr.bf16.mxu0 %v7602_v2 }
 0x346   : > { %1711 = vmatpush1.bf16.msra.mxu1 %v6282_v34  ;;  %4718 = vmatpush3.bf16.msra.mxu0 %v6268_v30 }
 0x347   : > { %1712 = vmatprep.subr.bf16.mxu1 %v6285_v35  ;;  %4719 = vmatprep.subr.bf16.mxu0 %v7602_v2 }
 0x34a   : > { %1713 = vmatpush1.bf16.msra.mxu1 %v6295_v37  ;;  %4720 = vmatpush3.bf16.msra.mxu0 %v6280_v33 }
 0x34b   : > { %1714 = vmatprep.subr.bf16.mxu1 %v6299_v38  ;;  %4721 = vmatprep.subr.bf16.mxu0 %v7602_v2 }
 0x34e   : > { %1715 = vmatpush1.bf16.msra.mxu1 %v6305_v39  ;;  %4722 = vmatpush3.bf16.msra.mxu0 %v6293_v36 }
 0x34f   : > { %1827 = vmatprep.subr.bf16.mxu1 %v6639_v13  ;;  %4727 = vmatprep.subr.bf16.mxu0 %v7602_v2 }
 0x3f1   : > { %v1607_v14 = vpop.f32.mrf.mxu1  ;;  %v1650_v16 = vpop.f32.mrf.mxu0 }
 0x3f2   : > { %v1608_v17 = vadd.f32 %v1607_v14, %v6507_v9  ;;  %v1651_v20 = vadd.f32 %v1650_v16, %v6537_v55 }
 0x3f3   : > { %v1609_v18 = vpop.f32.mrf.mxu1  ;;  %v4705_v19 = vpop.f32.mrf.mxu0 }
 0x3f4   : > { %v1657_v21 = vadd.f32 %v1608_v17, %v6430_v43  ;;  %v1610_v26 = vadd.f32 %v1609_v18, %v6522_v42 }
 0x3f5   : > { %v1611_v22 = vpop.f32.mrf.mxu1  ;;  %v1653_v23 = vpop.f32.mrf.mxu0 }
 0x3f6   : > { %v4425_v24 = vmul.f32 -1.442695, %v1657_v21  ;;  %v1612_v27 = vadd.f32 %v1611_v22, %v6507_v9  ;;  %v1671_v8 = vadd.f32 %v1610_v26, %v6436_v1  ;;  %v1654_v54 = vadd.f32 %v1653_v23, %v6537_v55  ;;  %v6663_v21 = vld [vmem:[#allocation9 + $0xa8] ss:$12 sps:$4 sm:$0xff]   ;;  %v6666_v22 = vld [vmem:[#allocation9 + $0xb0] ss:$12 sps:$4 sm:$0xff]  }
 0x3f7   : > { %v1613_v28 = vpop.f32.mrf.mxu1  ;;  %v4706_v12 = vpop.f32.mrf.mxu0  ;;  %v6679_v23 = vld [vmem:[#allocation9 + $0x98] ss:$12 sps:$4 sm:$0xff]  }
 0x3f8   : > { %5210 = vpow2.f32 %v4425_v24  ;;  %v1658_v48 = vadd.f32 %v1612_v27, %v6441_v6  ;;  %v1614_v7 = vadd.f32 %v1613_v28, %v6522_v42  ;;  %v4427_v49 = vmul.f32 -1.442695, %v1671_v8  ;;  %v6682_v24 = vld [vmem:[#allocation9 + $0x7c] ss:$12 sps:$4 sm:$0xff]   ;;  %v6686_v26 = vld [vmem:[#allocation9 + $0x78] ss:$12 sps:$4 sm:$0xff]  }
 0x3f9   : > { %v6689_v27 = vld [vmem:[#allocation9 + $0x80] ss:$12 sps:$4 sm:$0xff]   ;;  %v6692_v28 = vld [vmem:[#allocation9 + $0x64] ss:$12 sps:$4 sm:$0xff]  }
 0x3fa   : > { %v4426_v57 = vmul.f32 -1.442695, %v1658_v48  ;;  %v1672_v43 = vadd.f32 %v1614_v7, %v6447_v53  ;;  %v6696_v12 = vld [vmem:[#allocation9 + $0x60] ss:$12 sps:$4 sm:$0xff]   ;;  %v6699_v48 = vld [vmem:[#allocation9 + $0x68] ss:$12 sps:$4 sm:$0xff]  }
 0x3fb   : > { %v6702_v7 = vld [vmem:[#allocation9 + $0x4c] ss:$12 sps:$4 sm:$0xff]   ;;  %v6707_v8 = vld [vmem:[#allocation9 + $0x50] ss:$12 sps:$4 sm:$0xff]  }
 0x3fc   : > { %5212 = vpow2.f32 %v4426_v57  ;;  %v4428_v11 = vmul.f32 -1.442695, %v1672_v43 }
 0x3fd   : > { %5214 = vpow2.f32 %v4427_v49 }
 0x3fe   : > { %5216 = vpow2.f32 %v4428_v11 }
 0x405   : > { %v5211_v5 = vpop.eup %5210 }
 0x406   : > { %v1665_v29 = vadd.f32 1.0, %v5211_v5  ;;  %v7606_v5 = vld [vmem:[#allocation57_spill] sm:$0xff] }
 0x408   : > { %5218 = vrcp.f32 %v1665_v29 }
 0x409   : > { %v5213_v4 = vpop.eup %5212 }
 0x40a   : > { %v1666_v15 = vadd.f32 1.0, %v5213_v4  ;;  %v5215_v61 = vpop.eup %5214 }
 0x40b   : > { %v5217_v6 = vpop.eup %5216  ;;  %v1679_v25 = vadd.f32 1.0, %v5215_v61 }
 0x40c   : > { %5220 = vrcp.f32 %v1666_v15  ;;  %v1680_v45 = vadd.f32 1.0, %v5217_v6  ;;  %v7607_v15 = vld [vmem:[#allocation55_spill] sm:$0xff] }
 0x40d   : > { %5222 = vrcp.f32 %v1679_v25  ;;  %v7608_v25 = vld [vmem:[#allocation59_spill] sm:$0xff] }
 0x40e   : > { %5224 = vrcp.f32 %v1680_v45 }
 0x415   : > { %v5219_v1 = vpop.eup %5218 }
 0x416   : > { %v1685_v40 = vmul.f32 %v5219_v1, %v1651_v20 }
 0x418   : > { %v1687_v53 = vadd.f32 %v1685_v40, %v6450_v0 }
 0x419   : > { %v5221_v41 = vpop.eup %5220 }
 0x41a   : > { %5226 = vtanh.f32 %v1687_v53  ;;  %v1686_v10 = vmul.f32 %v5221_v41, %v1654_v54  ;;  %v5223_v56 = vpop.eup %5222 }
 0x41b   : > { %v5225_v50 = vpop.eup %5224  ;;  %v1691_v63 = vsub.f32 1.0, %v5223_v56  ;;  %v1695_v3 = vmul.f32 %v5223_v56, %v6599_v51  ;;  %v6669_v51 = vld [vmem:[#allocation9 + $0x94] ss:$12 sps:$4 sm:$0xff]  }
 0x41c   : > { %v1688_v58 = vadd.f32 %v1686_v10, %v7604_v52  ;;  %v1692_v60 = vsub.f32 1.0, %v5225_v50  ;;  %v1696_v17 = vmul.f32 %v5225_v50, %v6602_v59  ;;  %v6676_v59 = vld [vmem:[#allocation9 + $0x90] ss:$12 sps:$4 sm:$0xff]  }
 0x41e   : > { %5228 = vtanh.f32 %v1688_v58 }
 0x427   : > { %v5227_v47 = vpop.eup %5226 }
 0x428   : > { %v1693_v44 = vmul.f32 %v5227_v47, %v1691_v63 }
 0x42a   : > { %v6656_v14 = vadd.f32 %v1695_v3, %v1693_v44  ;;  %v7609_v44 = vld [vmem:[#allocation52_spill] sm:$0xff] }
 0x42b   : > { %v5229_v0 = vpop.eup %5228 }
 0x42c   : > { %v1694_v16 = vmul.f32 %v5229_v0, %v1692_v60 }
 0x42e   : > { %v6659_v18 = vadd.f32 %v1696_v17, %v1694_v16  ;;  %v7610_v17 = vld [vmem:[#allocation54_spill] sm:$0xff] }
 0x430   : > { %v1699_v19 = vpack.c.bf16 %v6659_v18, %v6656_v14 }
 0x432   : > { %1733 = vmatmul.mubr.bf16.vlgmr.msra.gmra.mxu1 %v1699_v19  ;;  %4724 = vmatmul.mubr.bf16.vlgmr.msra.gmra.mxu0 %v1699_v19 }
 0x433   : > { %1828 = vmatpush1.bf16.msra.mxu1 %v6663_v21  ;;  %4728 = vmatpush3.bf16.msra.mxu0 %v6666_v22 }
 0x434   : > { %1829 = vmatprep.subr.bf16.mxu1 %v6669_v51  ;;  %4729 = vmatprep.subr.bf16.mxu0 %v7602_v2 }
 0x435   : > { %1859 = vmatprep.mubr.bf16.mxu1 %v7603_v46  ;;  %4743 = vmatprep.mubr.msk.bf16.mxu0 %vm5831_vm1, %v7602_v2 }
 0x437   : > { %1830 = vmatpush1.bf16.msra.mxu1 %v6676_v59  ;;  %4730 = vmatpush3.bf16.msra.mxu0 %v6679_v23 }
 0x438   : > { %1831 = vmatprep.subr.bf16.mxu1 %v6682_v24  ;;  %4731 = vmatprep.subr.bf16.mxu0 %v7602_v2 }
 0x43b   : > { %1832 = vmatpush1.bf16.msra.mxu1 %v6686_v26  ;;  %4732 = vmatpush3.bf16.msra.mxu0 %v6689_v27 }
 0x43c   : > { %1833 = vmatprep.subr.bf16.mxu1 %v6692_v28  ;;  %4733 = vmatprep.subr.bf16.mxu0 %v7602_v2 }
 0x43f   : > { %1834 = vmatpush1.bf16.msra.mxu1 %v6696_v12  ;;  %4734 = vmatpush3.bf16.msra.mxu0 %v6699_v48 }
 0x440   : > { %1835 = vmatprep.subr.bf16.mxu1 %v6702_v7  ;;  %4735 = vmatprep.subr.bf16.mxu0 %v7602_v2 }
 0x443   : > { %1836 = vmatpush1.bf16.msra.mxu1 %v6270_v31  ;;  %4736 = vmatpush3.bf16.msra.mxu0 %v6707_v8 }
 0x444   : > { %1837 = vmatprep.subr.bf16.mxu1 %v6274_v32  ;;  %4737 = vmatprep.subr.bf16.mxu0 %v7602_v2 }
 0x447   : > { %1838 = vmatpush1.bf16.msra.mxu1 %v6282_v34  ;;  %4738 = vmatpush3.bf16.msra.mxu0 %v6268_v30 }
 0x448   : > { %1839 = vmatprep.subr.bf16.mxu1 %v6285_v35  ;;  %4739 = vmatprep.subr.bf16.mxu0 %v7602_v2 }
 0x44b   : > { %1840 = vmatpush1.bf16.msra.mxu1 %v6295_v37  ;;  %4740 = vmatpush3.bf16.msra.mxu0 %v6280_v33  ;;  %v7605_v37 = vld [vmem:[#allocation53_spill] sm:$0xff] }
 0x44c   : > { %1841 = vmatprep.subr.bf16.mxu1 %v6299_v38  ;;  %4741 = vmatprep.subr.bf16.mxu0 %v7602_v2 }
 0x44f   : > { %1842 = vmatpush1.bf16.msra.mxu1 %v6305_v39  ;;  %4742 = vmatpush3.bf16.msra.mxu0 %v6293_v36 }
 0x450   : > { %1954 = vmatprep.subr.bf16.mxu1 %v6639_v13  ;;  %4747 = vmatprep.subr.bf16.mxu0 %v7602_v2 }
 0x4f2   : > { %v1734_v30 = vpop.f32.mrf.mxu1  ;;  %v1777_v31 = vpop.f32.mrf.mxu0 }
 0x4f3   : > { %v1735_v32 = vadd.f32 %v1734_v30, %v6507_v9  ;;  %v1778_v56 = vadd.f32 %v1777_v31, %v6537_v55 }
 0x4f4   : > { %v1736_v34 = vpop.f32.mrf.mxu1  ;;  %v4725_v35 = vpop.f32.mrf.mxu0 }
 0x4f5   : > { %v1784_v33 = vadd.f32 %v1735_v32, %v7605_v37  ;;  %v1737_v49 = vadd.f32 %v1736_v34, %v6522_v42 }
 0x4f6   : > { %v1738_v57 = vpop.f32.mrf.mxu1  ;;  %v1780_v38 = vpop.f32.mrf.mxu0 }
 0x4f7   : > { %v4429_v43 = vmul.f32 -1.442695, %v1784_v33  ;;  %v1739_v39 = vadd.f32 %v1738_v57, %v6507_v9  ;;  %v1798_v61 = vadd.f32 %v1737_v49, %v7607_v15  ;;  %v1781_v60 = vadd.f32 %v1780_v38, %v6537_v55  ;;  %v6784_v15 = vld [vmem:[#allocation9 + $0x20] ss:$12 sps:$4 sm:$0xff]  }
 0x4f8   : > { %v1740_v36 = vpop.f32.mrf.mxu1  ;;  %v4726_v11 = vpop.f32.mrf.mxu0 }
 0x4f9   : > { %5230 = vpow2.f32 %v4429_v43  ;;  %v1785_v29 = vadd.f32 %v1739_v39, %v7606_v5  ;;  %v1741_v4 = vadd.f32 %v1740_v36, %v6522_v42  ;;  %v4431_v1 = vmul.f32 -1.442695, %v1798_v61  ;;  %v6771_v11 = vld [vmem:[#allocation9 + $0x30] ss:$12 sps:$4 sm:$0xff]   ;;  %v6774_v5 = vld [vmem:[#allocation9 + $0x38] ss:$12 sps:$4 sm:$0xff]  }
 0x4fa   : > { %v6787_v61 = vld [vmem:[#allocation9 + $0x4] ss:$12 sps:$4 sm:$0xff]  }
 0x4fb   : > { %v4430_v6 = vmul.f32 -1.442695, %v1785_v29  ;;  %v1799_v20 = vadd.f32 %v1741_v4, %v7608_v25  ;;  %v6777_v29 = vld [vmem:[#allocation9 + $0x1c] ss:$12 sps:$4 sm:$0xff]   ;;  %v6781_v4 = vld [vmem:[#allocation9 + $0x18] ss:$12 sps:$4 sm:$0xff]  }
 0x4fc   : > { %v6794_v25 = vld [vmem:[#allocation9 + $0x8] ss:$12 sps:$4 sm:$0xff]  }
 0x4fd   : > { %5232 = vpow2.f32 %v4430_v6  ;;  %v4432_v45 = vmul.f32 -1.442695, %v1799_v20  ;;  %v6791_v6 = vld [vmem:[#allocation9] ss:$12 sps:$4 sm:$0xff]  }
 0x4fe   : > { %5234 = vpow2.f32 %v4431_v1 }
 0x4ff   : > { %5236 = vpow2.f32 %v4432_v45 }
 0x506   : > { %v5231_v40 = vpop.eup %5230 }
 0x507   : > { %v1792_v53 = vadd.f32 1.0, %v5231_v40 }
 0x509   : > { %5238 = vrcp.f32 %v1792_v53 }
 0x50a   : > { %v5233_v54 = vpop.eup %5232 }
 0x50b   : > { %v1793_v41 = vadd.f32 1.0, %v5233_v54  ;;  %v5235_v10 = vpop.eup %5234  ;;  %v7611_v54 = vld [vmem:[#allocation61_spill] sm:$0xff] }
 0x50c   : > { %v5237_v52 = vpop.eup %5236  ;;  %v1806_v58 = vadd.f32 1.0, %v5235_v10 }
 0x50d   : > { %5240 = vrcp.f32 %v1793_v41  ;;  %v1807_v63 = vadd.f32 1.0, %v5237_v52 }
 0x50e   : > { %5242 = vrcp.f32 %v1806_v58 }
 0x50f   : > { %5244 = vrcp.f32 %v1807_v63 }
 0x516   : > { %v5239_v50 = vpop.eup %5238 }
 0x517   : > { %v1812_v47 = vmul.f32 %v5239_v50, %v1778_v56 }
 0x519   : > { %v1814_v3 = vadd.f32 %v1812_v47, %v7609_v44  ;;  %v7612_v44 = vld [vmem:[#allocation65_spill] sm:$0xff] }
 0x51a   : > { %v5241_v0 = vpop.eup %5240 }
 0x51b   : > { %5246 = vtanh.f32 %v1814_v3  ;;  %v1813_v16 = vmul.f32 %v5241_v0, %v1781_v60  ;;  %v5243_v30 = vpop.eup %5242  ;;  %v7613_v0 = vld [vmem:[#allocation63_spill] sm:$0xff] }
 0x51c   : > { %v5245_v32 = vpop.eup %5244  ;;  %v1818_v34 = vsub.f32 1.0, %v5243_v30  ;;  %v1822_v37 = vmul.f32 %v5243_v30, %v6656_v14  ;;  %v6763_v14 = vld [vmem:[#allocation9 + $0x48] ss:$12 sps:$4 sm:$0xff]  }
 0x51d   : > { %v1815_v19 = vadd.f32 %v1813_v16, %v7610_v17  ;;  %v1819_v33 = vsub.f32 1.0, %v5245_v32  ;;  %v1823_v38 = vmul.f32 %v5245_v32, %v6659_v18  ;;  %v6767_v18 = vld [vmem:[#allocation9 + $0x34] ss:$12 sps:$4 sm:$0xff]  }
 0x51f   : > { %5248 = vtanh.f32 %v1815_v19  ;;  %v7614_v19 = vld [vmem:[#allocation67_spill] sm:$0xff] }
 0x528   : > { %v5247_v35 = vpop.eup %5246 }
 0x529   : > { %v1820_v31 = vmul.f32 %v5247_v35, %v1818_v34 }
 0x52b   : > { %v6737_v57 = vadd.f32 %v1822_v37, %v1820_v31 }
 0x52c   : > { %v5249_v43 = vpop.eup %5248 }
 0x52d   : > { %v1821_v49 = vmul.f32 %v5249_v43, %v1819_v33 }
 0x52f   : > { %v6740_v39 = vadd.f32 %v1823_v38, %v1821_v49 }
 0x531   : > { %v1826_v36 = vpack.c.bf16 %v6740_v39, %v6737_v57 }
 0x533   : > { %1860 = vmatmul.mubr.bf16.vlgmr.msra.gmra.mxu1 %v1826_v36  ;;  %4744 = vmatmul.mubr.bf16.vlgmr.msra.gmra.mxu0 %v1826_v36 }
 0x534   : > { %1955 = vmatpush1.bf16.msra.mxu1 %v6663_v21  ;;  %4748 = vmatpush3.bf16.msra.mxu0 %v6666_v22 }
 0x535   : > { %1956 = vmatprep.subr.bf16.mxu1 %v6669_v51  ;;  %4749 = vmatprep.subr.bf16.mxu0 %v7602_v2 }
 0x536   : > { %1986 = vmatprep.mubr.bf16.mxu1 %v7603_v46  ;;  %4763 = vmatprep.mubr.msk.bf16.mxu0 %vm5831_vm1, %v7602_v2 }
 0x538   : > { %1957 = vmatpush1.bf16.msra.mxu1 %v6676_v59  ;;  %4750 = vmatpush3.bf16.msra.mxu0 %v6679_v23 }
 0x539   : > { %1958 = vmatprep.subr.bf16.mxu1 %v6682_v24  ;;  %4751 = vmatprep.subr.bf16.mxu0 %v7602_v2 }
 0x53c   : > { %1959 = vmatpush1.bf16.msra.mxu1 %v6686_v26  ;;  %4752 = vmatpush3.bf16.msra.mxu0 %v6689_v27 }
 0x53d   : > { %1960 = vmatprep.subr.bf16.mxu1 %v6692_v28  ;;  %4753 = vmatprep.subr.bf16.mxu0 %v7602_v2 }
 0x540   : > { %1961 = vmatpush1.bf16.msra.mxu1 %v6696_v12  ;;  %4754 = vmatpush3.bf16.msra.mxu0 %v6699_v48 }
 0x541   : > { %1962 = vmatprep.subr.bf16.mxu1 %v6702_v7  ;;  %4755 = vmatprep.subr.bf16.mxu0 %v7602_v2 }
 0x544   : > { %1963 = vmatpush1.bf16.msra.mxu1 %v6763_v14  ;;  %4756 = vmatpush3.bf16.msra.mxu0 %v6707_v8 }
 0x545   : > { %1964 = vmatprep.subr.bf16.mxu1 %v6767_v18  ;;  %4757 = vmatprep.subr.bf16.mxu0 %v7602_v2 }
 0x548   : > { %1965 = vmatpush1.bf16.msra.mxu1 %v6771_v11  ;;  %4758 = vmatpush3.bf16.msra.mxu0 %v6774_v5 }
 0x549   : > { %1966 = vmatprep.subr.bf16.mxu1 %v6777_v29  ;;  %4759 = vmatprep.subr.bf16.mxu0 %v7602_v2 }
 0x54c   : > { %1967 = vmatpush1.bf16.msra.mxu1 %v6781_v4  ;;  %4760 = vmatpush3.bf16.msra.mxu0 %v6784_v15 }
 0x54d   : > { %1968 = vmatprep.subr.bf16.mxu1 %v6787_v61  ;;  %4761 = vmatprep.subr.bf16.mxu0 %v7602_v2 }
 0x550   : > { %1969 = vmatpush1.bf16.msra.mxu1 %v6791_v6  ;;  %4762 = vmatpush3.bf16.msra.mxu0 %v6794_v25 }
 0x551   : > { %2081 = vmatprep.subr.bf16.mxu1 %v6639_v13  ;;  %4767 = vmatprep.subr.bf16.mxu0 %v7602_v2 }
 0x5f3   : > { %v1861_v20 = vpop.f32.mrf.mxu1  ;;  %v1904_v1 = vpop.f32.mrf.mxu0 }
 0x5f4   : > { %v1862_v45 = vadd.f32 %v1861_v20, %v6507_v9  ;;  %v1905_v36 = vadd.f32 %v1904_v1, %v6537_v55 }
 0x5f5   : > { %v1863_v40 = vpop.f32.mrf.mxu1  ;;  %v4745_v53 = vpop.f32.mrf.mxu0 }
 0x5f6   : > { %v1911_v41 = vadd.f32 %v1862_v45, %v7611_v54  ;;  %v1864_v56 = vadd.f32 %v1863_v40, %v6522_v42  ;;  %v7615_v53 = vld [vmem:[#allocation60_spill] sm:$0xff] }
 0x5f7   : > { %v1865_v10 = vpop.f32.mrf.mxu1  ;;  %v1907_v52 = vpop.f32.mrf.mxu0 }
 0x5f8   : > { %v4433_v58 = vmul.f32 -1.442695, %v1911_v41  ;;  %v1866_v50 = vadd.f32 %v1865_v10, %v6507_v9  ;;  %v1925_v16 = vadd.f32 %v1864_v56, %v7613_v0  ;;  %v1908_v41 = vadd.f32 %v1907_v52, %v6537_v55  ;;  %v7616_v56 = vld [vmem:[#allocation64_spill] sm:$0xff] }
 0x5f9   : > { %v1867_v63 = vpop.f32.mrf.mxu1  ;;  %v4746_v47 = vpop.f32.mrf.mxu0 }
 0x5fa   : > { %5250 = vpow2.f32 %v4433_v58  ;;  %v1912_v3 = vadd.f32 %v1866_v50, %v7612_v44  ;;  %v1868_v60 = vadd.f32 %v1867_v63, %v6522_v42  ;;  %v4435_v32 = vmul.f32 -1.442695, %v1925_v16 }
 0x5fc   : > { %v4434_v17 = vmul.f32 -1.442695, %v1912_v3  ;;  %v1926_v30 = vadd.f32 %v1868_v60, %v7614_v19 }
 0x5fe   : > { %5252 = vpow2.f32 %v4434_v17  ;;  %v4436_v34 = vmul.f32 -1.442695, %v1926_v30 }
 0x5ff   : > { %5254 = vpow2.f32 %v4435_v32 }
 0x600   : > { %5256 = vpow2.f32 %v4436_v34 }
 0x607   : > { %v5251_v35 = vpop.eup %5250 }
 0x608   : > { %v1919_v31 = vadd.f32 1.0, %v5251_v35 }
 0x60a   : > { %5258 = vrcp.f32 %v1919_v31 }
 0x60b   : > { %v5253_v37 = vpop.eup %5252 }
 0x60c   : > { %v1920_v33 = vadd.f32 1.0, %v5253_v37  ;;  %v5255_v43 = vpop.eup %5254  ;;  %v7617_v37 = vld [vmem:[#allocation69_spill] sm:$0xff] }
 0x60d   : > { %v5257_v49 = vpop.eup %5256  ;;  %v1933_v38 = vadd.f32 1.0, %v5255_v43 }
 0x60e   : > { %5260 = vrcp.f32 %v1920_v33  ;;  %v1934_v45 = vadd.f32 1.0, %v5257_v49 }
 0x60f   : > { %5262 = vrcp.f32 %v1933_v38 }
 0x610   : > { %5264 = vrcp.f32 %v1934_v45 }
 0x617   : > { %v5259_v20 = vpop.eup %5258 }
 0x618   : > { %v1939_v40 = vmul.f32 %v5259_v20, %v1905_v36 }
 0x61a   : > { %v1941_v54 = vadd.f32 %v1939_v40, %v7615_v53 }
 0x61b   : > { %v5261_v10 = vpop.eup %5260 }
 0x61c   : > { %5266 = vtanh.f32 %v1941_v54  ;;  %v1940_v58 = vmul.f32 %v5261_v10, %v1908_v41  ;;  %v5263_v63 = vpop.eup %5262  ;;  %v7619_v41 = vld [vmem:[#allocation71_spill] sm:$0xff] }
 0x61d   : > { %v5265_v47 = vpop.eup %5264  ;;  %v1945_v44 = vsub.f32 1.0, %v5263_v63  ;;  %v1949_v60 = vmul.f32 %v5263_v63, %v6737_v57 }
 0x61e   : > { %v1942_v50 = vadd.f32 %v1940_v58, %v7616_v56  ;;  %v1946_v0 = vsub.f32 1.0, %v5265_v47  ;;  %v1950_v52 = vmul.f32 %v5265_v47, %v6740_v39  ;;  %v7620_v56 = vld [vmem:[#allocation74_spill] sm:$0xff] }
 0x620   : > { %5268 = vtanh.f32 %v1942_v50 }
 0x629   : > { %v5267_v3 = vpop.eup %5266 }
 0x62a   : > { %v1947_v1 = vmul.f32 %v5267_v3, %v1945_v44 }
 0x62c   : > { %v6812_v16 = vadd.f32 %v1949_v60, %v1947_v1 }
 0x62d   : > { %v5269_v17 = vpop.eup %5268 }
 0x62e   : > { %v1948_v19 = vmul.f32 %v5269_v17, %v1946_v0 }
 0x630   : > { %v6815_v30 = vadd.f32 %v1950_v52, %v1948_v19 }
 0x632   : > { %v1953_v32 = vpack.c.bf16 %v6815_v30, %v6812_v16 }
 0x634   : > { %1987 = vmatmul.mubr.bf16.vlgmr.msra.gmra.mxu1 %v1953_v32  ;;  %4764 = vmatmul.mubr.bf16.vlgmr.msra.gmra.mxu0 %v1953_v32 }
 0x635   : > { %2082 = vmatpush1.bf16.msra.mxu1 %v6663_v21  ;;  %4768 = vmatpush3.bf16.msra.mxu0 %v6666_v22 }
 0x636   : > { %2083 = vmatprep.subr.bf16.mxu1 %v6669_v51  ;;  %4769 = vmatprep.subr.bf16.mxu0 %v7602_v2 }
 0x637   : > { %2113 = vmatprep.mubr.bf16.mxu1 %v7603_v46  ;;  %4783 = vmatprep.mubr.msk.bf16.mxu0 %vm5831_vm1, %v7602_v2 }
 0x639   : > { %2084 = vmatpush1.bf16.msra.mxu1 %v6676_v59  ;;  %4770 = vmatpush3.bf16.msra.mxu0 %v6679_v23 }
 0x63a   : > { %2085 = vmatprep.subr.bf16.mxu1 %v6682_v24  ;;  %4771 = vmatprep.subr.bf16.mxu0 %v7602_v2 }
 0x63d   : > { %2086 = vmatpush1.bf16.msra.mxu1 %v6686_v26  ;;  %4772 = vmatpush3.bf16.msra.mxu0 %v6689_v27 }
 0x63e   : > { %2087 = vmatprep.subr.bf16.mxu1 %v6692_v28  ;;  %4773 = vmatprep.subr.bf16.mxu0 %v7602_v2 }
 0x641   : > { %2088 = vmatpush1.bf16.msra.mxu1 %v6696_v12  ;;  %4774 = vmatpush3.bf16.msra.mxu0 %v6699_v48 }
 0x642   : > { %2089 = vmatprep.subr.bf16.mxu1 %v6702_v7  ;;  %4775 = vmatprep.subr.bf16.mxu0 %v7602_v2 }
 0x645   : > { %2090 = vmatpush1.bf16.msra.mxu1 %v6763_v14  ;;  %4776 = vmatpush3.bf16.msra.mxu0 %v6707_v8 }
 0x646   : > { %2091 = vmatprep.subr.bf16.mxu1 %v6767_v18  ;;  %4777 = vmatprep.subr.bf16.mxu0 %v7602_v2 }
 0x649   : > { %2092 = vmatpush1.bf16.msra.mxu1 %v6771_v11  ;;  %4778 = vmatpush3.bf16.msra.mxu0 %v6774_v5 }
 0x64a   : > { %2093 = vmatprep.subr.bf16.mxu1 %v6777_v29  ;;  %4779 = vmatprep.subr.bf16.mxu0 %v7602_v2 }
 0x64d   : > { %2094 = vmatpush1.bf16.msra.mxu1 %v6781_v4  ;;  %4780 = vmatpush3.bf16.msra.mxu0 %v6784_v15 }
 0x64e   : > { %2095 = vmatprep.subr.bf16.mxu1 %v6787_v61  ;;  %4781 = vmatprep.subr.bf16.mxu0 %v7602_v2 }
 0x651   : > { %2096 = vmatpush1.bf16.msra.mxu1 %v6791_v6  ;;  %4782 = vmatpush3.bf16.msra.mxu0 %v6794_v25 }
 0x652   : > { %2208 = vmatprep.subr.bf16.mxu1 %v6639_v13  ;;  %4787 = vmatprep.subr.bf16.mxu0 %v7602_v2  ;;  %v7618_v13 = vld [vmem:[#allocation73_spill] sm:$0xff] }
 0x6f4   : > { %v1988_v57 = vpop.f32.mrf.mxu1  ;;  %v2031_v39 = vpop.f32.mrf.mxu0 }
 0x6f5   : > { %v1989_v34 = vadd.f32 %v1988_v57, %v6507_v9  ;;  %v2032_v52 = vadd.f32 %v2031_v39, %v6537_v55 }
 0x6f6   : > { %v1990_v35 = vpop.f32.mrf.mxu1  ;;  %v4765_v31 = vpop.f32.mrf.mxu0 }
 0x6f7   : > { %v2038_v33 = vadd.f32 %v1989_v34, %v7617_v37  ;;  %v1991_v36 = vadd.f32 %v1990_v35, %v6522_v42  ;;  %v7621_v35 = vld [vmem:[#allocation58_spill] sm:$0xff] }
 0x6f8   : > { %v1992_v43 = vpop.f32.mrf.mxu1  ;;  %v2034_v49 = vpop.f32.mrf.mxu0 }
 0x6f9   : > { %v4437_v38 = vmul.f32 -1.442695, %v2038_v33  ;;  %v1993_v20 = vadd.f32 %v1992_v43, %v6507_v9  ;;  %v2052_v10 = vadd.f32 %v1991_v36, %v7619_v41  ;;  %v2035_v37 = vadd.f32 %v2034_v49, %v6537_v55 }
 0x6fa   : > { %v1994_v45 = vpop.f32.mrf.mxu1  ;;  %v4766_v40 = vpop.f32.mrf.mxu0 }
 0x6fb   : > { %5270 = vpow2.f32 %v4437_v38  ;;  %v2039_v53 = vadd.f32 %v1993_v20, %v7618_v13  ;;  %v1995_v54 = vadd.f32 %v1994_v45, %v6522_v42  ;;  %v4439_v63 = vmul.f32 -1.442695, %v2052_v10  ;;  %v7622_v38 = vld [vmem:[#allocation62_spill] sm:$0xff] }
 0x6fd   : > { %v4438_v58 = vmul.f32 -1.442695, %v2039_v53  ;;  %v2053_v50 = vadd.f32 %v1995_v54, %v7620_v56 }
 0x6ff   : > { %5272 = vpow2.f32 %v4438_v58  ;;  %v4440_v47 = vmul.f32 -1.442695, %v2053_v50 }
 0x700   : > { %5274 = vpow2.f32 %v4439_v63 }
 0x701   : > { %5276 = vpow2.f32 %v4440_v47 }
 0x708   : > { %v5271_v44 = vpop.eup %5270 }
 0x709   : > { %v2046_v3 = vadd.f32 1.0, %v5271_v44 }
 0x70b   : > { %5278 = vrcp.f32 %v2046_v3 }
 0x70c   : > { %v5273_v1 = vpop.eup %5272 }
 0x70d   : > { %v2047_v60 = vadd.f32 1.0, %v5273_v1  ;;  %v5275_v0 = vpop.eup %5274 }
 0x70e   : > { %v5277_v17 = vpop.eup %5276  ;;  %v2060_v19 = vadd.f32 1.0, %v5275_v0 }
 0x70f   : > { %5280 = vrcp.f32 %v2047_v60  ;;  %v2061_v57 = vadd.f32 1.0, %v5277_v17 }
 0x710   : > { %5282 = vrcp.f32 %v2060_v19 }
 0x711   : > { %5284 = vrcp.f32 %v2061_v57 }
 0x718   : > { %v5279_v32 = vpop.eup %5278 }
 0x719   : > { %v2066_v34 = vmul.f32 %v5279_v32, %v2032_v52  ;;  %v7627_v52 = vld [vmem:[#allocation68_spill] sm:$0xff] }
 0x71b   : > { %v2068_v31 = vadd.f32 %v2066_v34, %v7621_v35 }
 0x71c   : > { %v5281_v33 = vpop.eup %5280 }
 0x71d   : > { %5286 = vtanh.f32 %v2068_v31  ;;  %v2067_v43 = vmul.f32 %v5281_v33, %v2035_v37  ;;  %v5283_v20 = vpop.eup %5282  ;;  %v7628_v31 = vld [vmem:[#allocation72_spill] sm:$0xff] }
 0x71e   : > { %v5285_v45 = vpop.eup %5284  ;;  %v2072_v40 = vsub.f32 1.0, %v5283_v20  ;;  %v2076_v53 = vmul.f32 %v5283_v20, %v6812_v16 }
 0x71f   : > { %v2069_v36 = vadd.f32 %v2067_v43, %v7622_v38  ;;  %v2073_v54 = vsub.f32 1.0, %v5285_v45  ;;  %v2077_v49 = vmul.f32 %v5285_v45, %v6815_v30 }
 0x721   : > { %5288 = vtanh.f32 %v2069_v36 }
 0x72a   : > { %v5287_v13 = vpop.eup %5286 }
 0x72b   : > { %v2074_v39 = vmul.f32 %v5287_v13, %v2072_v40 }
 0x72d   : > { %v6867_v41 = vadd.f32 %v2076_v53, %v2074_v39 }
 0x72e   : > { %v5289_v10 = vpop.eup %5288 }
 0x72f   : > { %v2075_v58 = vmul.f32 %v5289_v10, %v2073_v54 }
 0x731   : > { %v6870_v56 = vadd.f32 %v2077_v49, %v2075_v58  ;;  %v5122_v49 = vld [vmem:[#allocation12 + $0x38] sm:$0xff]  }
 0x733   : > { %v2080_v50 = vpack.c.bf16 %v6870_v56, %v6867_v41 }
 0x735   : > { %2114 = vmatmul.mubr.bf16.vlgmr.msra.gmra.mxu1 %v2080_v50  ;;  %4784 = vmatmul.mubr.bf16.vlgmr.msra.gmra.mxu0 %v2080_v50  ;;  %v5124_v50 = vld [vmem:[#allocation12 + $0x28] sm:$0xff]  }
 0x736   : > { %2209 = vmatpush1.bf16.msra.mxu1 %v6663_v21  ;;  %4788 = vmatpush3.bf16.msra.mxu0 %v6666_v22 }
 0x737   : > { %2210 = vmatprep.subr.bf16.mxu1 %v6669_v51  ;;  %4789 = vmatprep.subr.bf16.mxu0 %v7602_v2 }
 0x738   : > { %2240 = vmatprep.mubr.bf16.mxu1 %v7603_v46  ;;  %4803 = vmatprep.mubr.msk.bf16.mxu0 %vm5831_vm1, %v7602_v2 }
 0x73a   : > { %2211 = vmatpush1.bf16.msra.mxu1 %v6676_v59  ;;  %4790 = vmatpush3.bf16.msra.mxu0 %v6679_v23  ;;  %v7623_v23 = vld [vmem:[#allocation44_spill] sm:$0xff] }
 0x73b   : > { %2212 = vmatprep.subr.bf16.mxu1 %v6682_v24  ;;  %4791 = vmatprep.subr.bf16.mxu0 %v7602_v2 }
 0x73e   : > { %2213 = vmatpush1.bf16.msra.mxu1 %v6686_v26  ;;  %4792 = vmatpush3.bf16.msra.mxu0 %v6689_v27 }
 0x73f   : > { %2214 = vmatprep.subr.bf16.mxu1 %v6692_v28  ;;  %4793 = vmatprep.subr.bf16.mxu0 %v7602_v2 }
 0x742   : > { %2215 = vmatpush1.bf16.msra.mxu1 %v6696_v12  ;;  %4794 = vmatpush3.bf16.msra.mxu0 %v6699_v48 }
 0x743   : > { %2216 = vmatprep.subr.bf16.mxu1 %v6702_v7  ;;  %4795 = vmatprep.subr.bf16.mxu0 %v7602_v2 }
 0x746   : > { %2217 = vmatpush1.bf16.msra.mxu1 %v6763_v14  ;;  %4796 = vmatpush3.bf16.msra.mxu0 %v6707_v8  ;;  %v7624_v14 = vld [vmem:[#allocation46_spill] sm:$0xff] }
 0x747   : > { %2218 = vmatprep.subr.bf16.mxu1 %v6767_v18  ;;  %4797 = vmatprep.subr.bf16.mxu0 %v7602_v2 }
 0x74a   : > { %2219 = vmatpush1.bf16.msra.mxu1 %v6771_v11  ;;  %4798 = vmatpush3.bf16.msra.mxu0 %v6774_v5  ;;  %v7625_v5 = vld [vmem:[#allocation45_spill] sm:$0xff] }
 0x74b   : > { %2220 = vmatprep.subr.bf16.mxu1 %v6777_v29  ;;  %4799 = vmatprep.subr.bf16.mxu0 %v7602_v2 }
 0x74e   : > { %2221 = vmatpush1.bf16.msra.mxu1 %v6781_v4  ;;  %4800 = vmatpush3.bf16.msra.mxu0 %v6784_v15  ;;  %v7626_v15 = vld [vmem:[#allocation47_spill] sm:$0xff] }
 0x74f   : > { %2222 = vmatprep.subr.bf16.mxu1 %v6787_v61  ;;  %4801 = vmatprep.subr.bf16.mxu0 %v7602_v2 }
 0x752   : > { %2223 = vmatpush1.bf16.msra.mxu1 %v6791_v6  ;;  %4802 = vmatpush3.bf16.msra.mxu0 %v6794_v25 }
 0x753   : > { %4839 = vmatprep.subr.bf16.mxu0 %v7602_v2  ;;  %4807 = vmatprep.subr.bf16.mxu1 %v5122_v49 }
 0x7f5   : > { %v2115_v46 = vpop.f32.mrf.mxu1  ;;  %v2158_v21 = vpop.f32.mrf.mxu0 }
 0x7f6   : > { %v2116_v22 = vadd.f32 %v2115_v46, %v6507_v9  ;;  %v2159_v60 = vadd.f32 %v2158_v21, %v6537_v55  ;;  %v5126_v46 = vld [vmem:[#allocation15 + $0x38] sm:$0xff]  }
 0x7f7   : > { %v2117_v51 = vpop.f32.mrf.mxu1  ;;  %v4785_v59 = vpop.f32.mrf.mxu0  ;;  %v5127_v21 = vld [vmem:[#allocation12 + $0x18] sm:$0xff]  }
 0x7f8   : > { %v2165_v24 = vadd.f32 %v2116_v22, %v7623_v23  ;;  %v2118_v12 = vadd.f32 %v2117_v51, %v6522_v42  ;;  %v5128_v22 = vld [vmem:[#allocation15 + $0x30] sm:$0xff]   ;;  %v5130_v59 = vld [vmem:[#allocation15 + $0x28] sm:$0xff]  }
 0x7f9   : > { %v2119_v26 = vpop.f32.mrf.mxu1  ;;  %v2161_v27 = vpop.f32.mrf.mxu0  ;;  %v5129_v51 = vld [vmem:[#allocation12 + $0x10] sm:$0xff]   ;;  %v5131_v23 = vld [vmem:[#allocation12 + $0x8] sm:$0xff]  }
 0x7fa   : > { %v4441_v28 = vmul.f32 -1.442695, %v2165_v24  ;;  %v2120_v48 = vadd.f32 %v2119_v26, %v6507_v9  ;;  %v2179_v29 = vadd.f32 %v2118_v12, %v7625_v5  ;;  %v2162_v57 = vadd.f32 %v2161_v27, %v6537_v55  ;;  %v5132_v24 = vld [vmem:[#allocation15 + $0x20] sm:$0xff]   ;;  %v2334_v27 = vld [vmem:[%s6162_s24] sm:$0xff]   ;;  %v2336_v12 = vld [vmem:[%s6162_s24 + $0x8] sm:$0xff]  }
 0x7fb   : > { %v2121_v7 = vpop.f32.mrf.mxu1  ;;  %v4786_v8 = vpop.f32.mrf.mxu0  ;;  %v5133_v26 = vld [vmem:[#allocation12] sm:$0xff]   ;;  %v2344_v5 = vld [vmem:[%s6162_s24 + $0x28] sm:$0xff]  }
 0x7fc   : > { %5290 = vpow2.f32 %v4441_v28  ;;  %v2166_v18 = vadd.f32 %v2120_v48, %v7624_v14  ;;  %v2122_v11 = vadd.f32 %v2121_v7, %v6522_v42  ;;  %v4443_v6 = vmul.f32 -1.442695, %v2179_v29  ;;  %v5135_v28 = vld [vmem:[#allocation15 + $0x18] sm:$0xff]   ;;  %v5137_v7 = vld [vmem:[#allocation15 + $0x10] sm:$0xff]   ;;  %v2340_v8 = vld [vmem:[%s6162_s24 + $0x18] sm:$0xff]  }
 0x7fd   : > { %v2338_v48 = vld [vmem:[%s6162_s24 + $0x10] sm:$0xff]   ;;  %v5139_v14 = vld [vmem:[#allocation15 + $0x8] sm:$0xff]  }
 0x7fe   : > { %v4442_v4 = vmul.f32 -1.442695, %v2166_v18  ;;  %v2180_v61 = vadd.f32 %v2122_v11, %v7626_v15  ;;  %v5141_v18 = vld [vmem:[#allocation15] sm:$0xff]   ;;  %v2342_v11 = vld [vmem:[%s6162_s24 + $0x20] sm:$0xff]  }
 0x7ff   : > { %v2346_v29 = vld [vmem:[%s6162_s24 + $0x30] sm:$0xff]  }
 0x800   : > { %5292 = vpow2.f32 %v4442_v4  ;;  %v4444_v25 = vmul.f32 -1.442695, %v2180_v61  ;;  %v2348_v4 = vld [vmem:[%s6162_s24 + $0x38] sm:$0xff]  }
 0x801   : > { %5294 = vpow2.f32 %v4443_v6 }
 0x802   : > { %5296 = vpow2.f32 %v4444_v25 }
 0x809   : > { %v5291_v16 = vpop.eup %5290 }
 0x80a   : > { %v2173_v30 = vadd.f32 1.0, %v5291_v16 }
 0x80c   : > { %5298 = vrcp.f32 %v2173_v30  ;;  %v7629_v30 = vld [vmem:[#allocation48_spill] sm:$0xff] }
 0x80d   : > { %v5293_v63 = vpop.eup %5292 }
 0x80e   : > { %v2174_v47 = vadd.f32 1.0, %v5293_v63  ;;  %v5295_v44 = vpop.eup %5294 }
 0x80f   : > { %v5297_v3 = vpop.eup %5296  ;;  %v2187_v1 = vadd.f32 1.0, %v5295_v44 }
 0x810   : > { %5300 = vrcp.f32 %v2174_v47  ;;  %v2188_v17 = vadd.f32 1.0, %v5297_v3 }
 0x811   : > { %5302 = vrcp.f32 %v2187_v1 }
 0x812   : > { %5304 = vrcp.f32 %v2188_v17 }
 0x819   : > { %v5299_v0 = vpop.eup %5298 }
 0x81a   : > { %v2193_v19 = vmul.f32 %v5299_v0, %v2159_v60 }
 0x81c   : > { %v2195_v32 = vadd.f32 %v2193_v19, %v7627_v52  ;;  %v7630_v19 = vld [vmem:[#allocation50_spill] sm:$0xff] }
 0x81d   : > { %v5301_v34 = vpop.eup %5300 }
 0x81e   : > { %5306 = vtanh.f32 %v2195_v32  ;;  %v2194_v35 = vmul.f32 %v5301_v34, %v2162_v57  ;;  %v5303_v33 = vpop.eup %5302  ;;  %v7631_v57 = vld [vmem:[#allocation49_spill] sm:$0xff] }
 0x81f   : > { %v5305_v43 = vpop.eup %5304  ;;  %v2199_v38 = vsub.f32 1.0, %v5303_v33  ;;  %v2203_v45 = vmul.f32 %v5303_v33, %v6867_v41  ;;  %v5123_v41 = vld [vmem:[#allocation12 + $0x30] sm:$0xff]  }
 0x820   : > { %v2196_v37 = vadd.f32 %v2194_v35, %v7628_v31  ;;  %v2200_v40 = vsub.f32 1.0, %v5305_v43  ;;  %v2204_v54 = vmul.f32 %v5305_v43, %v6870_v56  ;;  %v5125_v56 = vld [vmem:[#allocation12 + $0x20] sm:$0xff]   ;;  %v7632_v31 = vld [vmem:[#allocation51_spill] sm:$0xff] }
 0x822   : > { %5308 = vtanh.f32 %v2196_v37 }
 0x82b   : > { %v5307_v36 = vpop.eup %5306 }
 0x82c   : > { %v2201_v20 = vmul.f32 %v5307_v36, %v2199_v38 }
 0x82e   : > { %v6921_v13 = vadd.f32 %v2203_v45, %v2201_v20 }
 0x82f   : > { %v5309_v39 = vpop.eup %5308 }
 0x830   : > { %v2202_v53 = vmul.f32 %v5309_v39, %v2200_v40 }
 0x832   : > { %v6924_v10 = vadd.f32 %v2204_v54, %v2202_v53 }
 0x834   : > { %v2207_v58 = vpack.c.bf16 %v6924_v10, %v6921_v13 }
 0x836   : > { %2241 = vmatmul.mubr.bf16.vlgmr.msra.gmra.mxu1 %v2207_v58  ;;  %4804 = vmatmul.mubr.bf16.vlgmr.msra.gmra.mxu0 %v2207_v58 }
 0x837   : > { %4855 = vmatprep.mubr.msk.bf16.mxu0 %vm5831_vm1, %v7602_v2  ;;  %4808 = vmatpush3.bf16.msra.mxu1 %v5122_v49  ;;  %v7633_v49 = vld [vmem:[#allocation66_spill] sm:$0xff] }
 0x838   : > { %4809 = vmatprep.subr.bf16.mxu1 %v5123_v41  ;;  %4840 = vmatpush3.bf16.msra.mxu0 %v5126_v46 }
 0x839   : > { %4841 = vmatprep.subr.bf16.mxu0 %v7602_v2  ;;  %4823 = vmatprep.mubr.bf16.mxu1 %v2334_v27 }
 0x83b   : > { %4810 = vmatpush3.bf16.msra.mxu1 %v5123_v41 }
 0x83c   : > { %4811 = vmatprep.subr.bf16.mxu1 %v5124_v50  ;;  %4842 = vmatpush3.bf16.msra.mxu0 %v5128_v22 }
 0x83d   : > { %4843 = vmatprep.subr.bf16.mxu0 %v7602_v2 }
 0x83f   : > { %4812 = vmatpush3.bf16.msra.mxu1 %v5124_v50 }
 0x840   : > { %4813 = vmatprep.subr.bf16.mxu1 %v5125_v56  ;;  %4844 = vmatpush3.bf16.msra.mxu0 %v5130_v59 }
 0x841   : > { %4845 = vmatprep.subr.bf16.mxu0 %v7602_v2 }
 0x843   : > { %4814 = vmatpush3.bf16.msra.mxu1 %v5125_v56 }
 0x844   : > { %4815 = vmatprep.subr.bf16.mxu1 %v5127_v21  ;;  %4846 = vmatpush3.bf16.msra.mxu0 %v5132_v24 }
 0x845   : > { %4847 = vmatprep.subr.bf16.mxu0 %v7602_v2 }
 0x847   : > { %4816 = vmatpush3.bf16.msra.mxu1 %v5127_v21  ;;  %v7634_v21 = vld [vmem:[#allocation70_spill] sm:$0xff] }
 0x848   : > { %4817 = vmatprep.subr.bf16.mxu1 %v5129_v51  ;;  %4848 = vmatpush3.bf16.msra.mxu0 %v5135_v28 }
 0x849   : > { %4849 = vmatprep.subr.bf16.mxu0 %v7602_v2 }
 0x84b   : > { %4818 = vmatpush3.bf16.msra.mxu1 %v5129_v51 }
 0x84c   : > { %4819 = vmatprep.subr.bf16.mxu1 %v5131_v23  ;;  %4850 = vmatpush3.bf16.msra.mxu0 %v5137_v7 }
 0x84d   : > { %4851 = vmatprep.subr.bf16.mxu0 %v7602_v2 }
 0x84f   : > { %4820 = vmatpush3.bf16.msra.mxu1 %v5131_v23 }
 0x850   : > { %4821 = vmatprep.subr.bf16.mxu1 %v5133_v26  ;;  %4852 = vmatpush3.bf16.msra.mxu0 %v5139_v14 }
 0x851   : > { %4853 = vmatprep.subr.bf16.mxu0 %v7602_v2 }
 0x853   : > { %4822 = vmatpush3.bf16.msra.mxu1 %v5133_v26 }
 0x854   : > { %4859 = vmatprep.subr.bf16.mxu1 %v7602_v2  ;;  %4854 = vmatpush3.bf16.msra.mxu0 %v5141_v18 }
 0x855   : > { %4879 = vmatprep.subr.bf16.mxu0 %v7602_v2 }
 0x856   : > { %4824 = vmatmul.mubr.bf16.vlgmr.msra.gmra.mxu1 %v2336_v12 }
 0x857   : > { %4827 = vmatprep.mubr.bf16.mxu1 %v2338_v48 }
 0x85e   : > { %4828 = vmatmul.mubr.bf16.gmra.mxu1 %v2340_v8 }
 0x85f   : > { %4831 = vmatprep.mubr.bf16.mxu1 %v2342_v11 }
 0x866   : > { %4832 = vmatmul.mubr.bf16.gmra.mxu1 %v2344_v5 }
 0x867   : > { %4835 = vmatprep.mubr.bf16.mxu1 %v2346_v29 }
 0x86e   : > { %4836 = vmatmul.mubr.bf16.gmra.mxu1 %v2348_v4 }
 0x86f   : > { %4875 = vmatprep.mubr.msk.bf16.mxu1 %vm5831_vm1, %v7602_v2 }
 0x8f6   : > { %v2242_v15 = vpop.f32.mrf.mxu1  ;;  %v2285_v61 = vpop.f32.mrf.mxu0 }
 0x8f7   : > { %v2243_v6 = vadd.f32 %v2242_v15, %v6507_v9 }
 0x8f8   : > { %v2244_v25 = vpop.f32.mrf.mxu1  ;;  %v4805_v16 = vpop.f32.mrf.mxu0 }
 0x8f9   : > { %v2292_v63 = vadd.f32 %v2243_v6, %v7629_v30  ;;  %v2245_v1 = vadd.f32 %v2244_v25, %v6522_v42  ;;  %v5832_v6 = vmov 1966171168   ;;  %v4466_v25 = vld [vmem:[#allocation17] ss:$0 sm:$0xff] }
 0x8fa   : > { %v2246_v47 = vpop.f32.mrf.mxu1  ;;  %v2288_v44 = vpop.f32.mrf.mxu0 }
 0x8fb   : > { %v4445_v3 = vmul.f32 -1.442695, %v2292_v63  ;;  %v2247_v60 = vadd.f32 %v2246_v47, %v6507_v9  ;;  %v2306_v34 = vadd.f32 %v2245_v1, %v7631_v57  ;;  %v2289_v50 = vadd.f32 %v2288_v44, %v6537_v55  ;;  %v4475_v44 = vld [vmem:[#allocation18] ss:$0 sm:$0xff]  ;;  %v6973_v1 = vld [vmem:[#allocation14] ss:$0 sm:$0xff] }
 0x8fc   : > { %v2248_v0 = vpop.f32.mrf.mxu1  ;;  %v4806_v17 = vpop.f32.mrf.mxu0 }
 0x8fd   : > { %5310 = vpow2.f32 %v4445_v3  ;;  %v2293_v52 = vadd.f32 %v2247_v60, %v7630_v19  ;;  %v2249_v32 = vadd.f32 %v2248_v0, %v6522_v42  ;;  %v4447_v33 = vmul.f32 -1.442695, %v2306_v34  ;;  %v7635_v0 = vld [vmem:[#allocation41_spill] sm:$0xff] }
 0x8fe   : > { %v2286_v42 = vadd.f32 %v2285_v61, %v6537_v55 }
 0x8ff   : > { %v4446_v35 = vmul.f32 -1.442695, %v2293_v52  ;;  %v2307_v37 = vadd.f32 %v2249_v32, %v7632_v31 }
 0x901   : > { %5312 = vpow2.f32 %v4446_v35  ;;  %v4448_v43 = vmul.f32 -1.442695, %v2307_v37 }
 0x902   : > { %5314 = vpow2.f32 %v4447_v33 }
 0x903   : > { %5316 = vpow2.f32 %v4448_v43 }
 0x90a   : > { %v5311_v38 = vpop.eup %5310 }
 0x90b   : > { %v2300_v36 = vadd.f32 1.0, %v5311_v38 }
 0x90d   : > { %5318 = vrcp.f32 %v2300_v36 }
 0x90e   : > { %v5313_v9 = vpop.eup %5312 }
 0x90f   : > { %v2301_v20 = vadd.f32 1.0, %v5313_v9  ;;  %v5315_v45 = vpop.eup %5314 }
 0x910   : > { %v5317_v40 = vpop.eup %5316  ;;  %v2314_v39 = vadd.f32 1.0, %v5315_v45 }
 0x911   : > { %5320 = vrcp.f32 %v2301_v20  ;;  %v2315_v54 = vadd.f32 1.0, %v5317_v40 }
 0x912   : > { %5322 = vrcp.f32 %v2314_v39 }
 0x913   : > { %5324 = vrcp.f32 %v2315_v54 }
 0x916   : > { %v4825_v18 = vpop.f32.mrf.mxu1 }
 0x918   : > { %v2503_v11 = vpop.f32.mrf.mxu1 }
 0x919   : > { %v2504_v34 = vadd.f32 %v6973_v1, %v2503_v11 }
 0x91a   : > { %v5319_v53 = vpop.eup %5318  ;;  %v6965_v5 = vpop.f32.mrf.mxu1 }
 0x91b   : > { %v2320_v58 = vmul.f32 %v5319_v53, %v2286_v42  ;;  %v2566_v20 = vmax.f32 %v2504_v34, 0.0  ;;  %v7636_v53 = vld [vmem:[#allocation42_spill] sm:$0xff] }
 0x91c   : > { %v2506_v29 = vpop.f32.mrf.mxu1 }
 0x91d   : > { %v2322_v41 = vadd.f32 %v2320_v58, %v7633_v49  ;;  %v2507_v40 = vadd.f32 %v6973_v1, %v2506_v29 }
 0x91e   : > { %v5321_v56 = vpop.eup %5320  ;;  %v6967_v4 = vpop.f32.mrf.mxu1 }
 0x91f   : > { %5326 = vtanh.f32 %v2322_v41  ;;  %v2321_v46 = vmul.f32 %v5321_v56, %v2289_v50  ;;  %v5323_v51 = vpop.eup %5322 }
 0x920   : > { %v5325_v59 = vpop.eup %5324  ;;  %v2326_v23 = vsub.f32 1.0, %v5323_v51  ;;  %v2330_v27 = vmul.f32 %v5323_v51, %v6921_v13  ;;  %v2519_v13 = vpop.f32.mrf.mxu1 }
 0x921   : > { %v2323_v22 = vadd.f32 %v2321_v46, %v7634_v21  ;;  %v2327_v28 = vsub.f32 1.0, %v5325_v59  ;;  %v2331_v55 = vmul.f32 %v5325_v59, %v6924_v10  ;;  %v2710_v10 = vunpack.c.l.s4 %v5832_v6 }
 0x922   : > { %v6969_v15 = vpop.f32.mrf.mxu1 }
 0x923   : > { %5328 = vtanh.f32 %v2323_v22  ;;  %v2711_v16 = vunpack.c.0.s8 %v2710_v10  ;;  %v2520_v10 = vadd.f32 %v6973_v1, %v2519_v13 }
 0x924   : > { %v6971_v61 = vpop.f32.mrf.mxu1 }
 0x925   : > { %v6976_v17 = vsub.s32 %v2711_v16, %v7635_v0  ;;  %v2570_v13 = vmax.f32 %v2520_v10, 0.0  ;;  %v7637_v10 = vld [vmem:[#allocation43_spill] sm:$0xff] }
 0x926   : > { %v4833_v30 = vpop.f32.mrf.mxu1 }
 0x928   : > { %v2535_v19 = vpop.f32.mrf.mxu1 }
 0x929   : > { %v2536_v45 = vadd.f32 %v6973_v1, %v2535_v19 }
 0x92a   : > { %v6980_v33 = vpop.f32.mrf.mxu1 }
 0x92b   : > { %v2574_v22 = vmax.f32 %v2536_v45, 0.0  ;;  %v2523_v45 = vadd.f32 %v6973_v1, %v6971_v61  ;;  %v2528_v61 = vadd.f32 %v6967_v4, %v6973_v1  ;;  %v2531_v4 = vadd.f32 %v6969_v15, %v6973_v1 }
 0x92c   : > { %v5327_v24 = vpop.eup %5326  ;;  %v2538_v42 = vpop.f32.mrf.mxu1 }
 0x92d   : > { %v2328_v26 = vmul.f32 %v5327_v24, %v2326_v23  ;;  %v2539_v41 = vadd.f32 %v6973_v1, %v2538_v42  ;;  %v2512_v23 = vadd.f32 %v4825_v18, %v6973_v1  ;;  %v2567_v24 = vmax.f32 %v2507_v40, 0.0 }
 0x92e   : > { %v2547_v40 = vadd.f32 %v6980_v33, %v6973_v1 }
 0x92f   : > { %v2332_v12 = vadd.f32 %v2330_v27, %v2328_v26  ;;  %v4837_v26 = vpop.f32.mrf.mxu1  ;;  %v2568_v6 = vmax.f32 %v2512_v23, 0.0 }
 0x930   : > { %v5329_v48 = vpop.eup %5328  ;;  %v2560_v33 = vadd.f32 %v4837_v26, %v6973_v1 }
 0x931   : > { %v2329_v7 = vmul.f32 %v5329_v48, %v2327_v28  ;;  %v2544_v28 = vadd.f32 %v4833_v30, %v6973_v1  ;;  %v2575_v48 = vmax.f32 %v2539_v41, 0.0 }
 0x933   : > { %v2333_v8 = vadd.f32 %v2331_v55, %v2329_v7 }
 0x935   : > { %v2582_v14 = vpack.c.bf16 %v2333_v8, %v2332_v12 }
 0x937   : > { %4856 = vmatmul.mubr.bf16.vlgmr.msra.gmra.mxu0 %v2582_v14 }
 0x938   : > { %4895 = vmatprep.mubr.msk.bf16.mxu0 %vm5831_vm1, %v7602_v2 }
 0x9f7   : > { %v2688_v63 = vpop.f32.mrf.mxu0 }
 0x9f8   : > { %v2689_v47 = vadd.f32 %v4466_v25, %v2688_v63 }
 0x9f9   : > { %v4857_v3 = vpop.f32.mrf.mxu0 }
 0x9fa   : > { %v2695_v60 = vmax.f32 %v2689_v47, 0.0  ;;  %v2576_v3 = vmax.f32 %v2544_v28, 0.0  ;;  %v2580_v28 = vmax.f32 %v2560_v33, 0.0 }
 0x9fb   : > { %v2691_v52 = vpop.f32.mrf.mxu0 }
 0x9fc   : > { %v2704_v32 = vmul.f32 %v4475_v44, %v2695_v60  ;;  %v2692_v57 = vadd.f32 %v4466_v25, %v2691_v52  ;;  %v2551_v25 = vpop.f32.mrf.mxu1 }
 0x9fd   : > { %v4858_v35 = vpop.f32.mrf.mxu0  ;;  %v2552_v16 = vadd.f32 %v6973_v1, %v2551_v25 }
 0x9fe   : > { %v2715_v31 = vrot.slane %v2704_v32, %v6976_v17  ;;  %v2696_v37 = vmax.f32 %v2692_v57, 0.0  ;;  %v2708_v43 = vcombine.high %v2704_v32, %v2704_v32  ;;  %v2515_v32 = vadd.f32 %v6965_v5, %v6973_v1  ;;  %v4838_v57 = vpop.f32.mrf.mxu1 }
 0x9ff   : > { %v2578_v34 = vmax.f32 %v2552_v16, 0.0 }
 0xa00   : > { %v2723_v38 = vcombine.high %v2715_v31, %v2715_v31  ;;  %v2705_v36 = vmul.f32 %v4475_v44, %v2696_v37  ;;  %v2731_v9 = vrot.slane %v2715_v31, %v6976_v17  ;;  %v2722_v49 = vrot.slane %v2708_v43, %v6976_v17  ;;  %v2554_v5 = vpop.f32.mrf.mxu1 }
 0xa02   : > { %v2764_v39 = vrot.slane %v2705_v36, %v6976_v17  ;;  %v2809_v54 = vrot.slane %v2731_v9, %v7636_v53  ;;  %v2745_v58 = vrot.slane %v2723_v38, %v6976_v17  ;;  %v2753_v21 = vcombine.high %v2731_v9, %v2731_v9 }
 0xa03   : > { %v2757_v51 = vcombine.high %v2705_v36, %v2705_v36  ;;  %v2738_v8 = vrot.slane %v2722_v49, %v6976_v17  ;;  %v2724_v44 = vcombine.high %v2722_v49, %v2722_v49 }
 0xa04   : > { %v2772_v50 = vcombine.high %v2764_v39, %v2764_v39  ;;  %v2886_v56 = vmul.f32 %v2809_v54, %v2566_v20  ;;  %v2813_v46 = vrot.slane %v2745_v58, %v7636_v53  ;;  %v2780_v59 = vrot.slane %v2764_v39, %v6976_v17 }
 0xa05   : > { %v2817_v55 = vrot.slane %v2753_v21, %v7636_v53  ;;  %v2771_v14 = vrot.slane %v2757_v51, %v6976_v17  ;;  %v2825_v63 = vrot.slane %v2738_v8, %v7636_v53  ;;  %v2755_v47 = vcombine.high %v2745_v58, %v2745_v58 }
 0xa06   : > { %2902 = vadd.xlane.f32.xlu0 %v2886_v56  ;;  %v2794_v27 = vrot.slane %v2772_v50, %v6976_v17  ;;  %v2841_v12 = vrot.slane %v2780_v59, %v7636_v53  ;;  %v2887_v7 = vmul.f32 %v2813_v46, %v2567_v24  ;;  %v2802_v29 = vcombine.high %v2780_v59, %v2780_v59 }
 0xa07   : > { %v2888_v30 = vmul.f32 %v2817_v55, %v2568_v6  ;;  %v2787_v52 = vrot.slane %v2771_v14, %v6976_v17  ;;  %v2890_v35 = vmul.f32 %v2825_v63, %v2570_v13  ;;  %v2821_v31 = vrot.slane %v2755_v47, %v7636_v53 }
 0xa08   : > { %v2894_v11 = vmul.f32 %v2841_v12, %v2574_v22  ;;  %v2845_v18 = vrot.slane %v2794_v27, %v7636_v53  ;;  %v2849_v19 = vrot.slane %v2802_v29, %v7636_v53  ;;  %v2752_v37 = vrot.slane %v2724_v44, %v6976_v17 }
 0xa09   : > { %v2857_v38 = vrot.slane %v2787_v52, %v7636_v53  ;;  %v2804_v36 = vcombine.high %v2794_v27, %v2794_v27  ;;  %v2773_v9 = vcombine.high %v2771_v14, %v2771_v14  ;;  %v2569_v20 = vmax.f32 %v2515_v32, 0.0 }
 0xa0a   : > { %2904 = vadd.xlane.f32.xlu0 %v2887_v7  ;;  %2918 = vadd.xlane.f32.xlu1 %v2894_v11  ;;  %v2895_v60 = vmul.f32 %v2845_v18, %v2575_v48  ;;  %v2896_v43 = vmul.f32 %v2849_v19, %v2576_v3  ;;  %v2829_v42 = vrot.slane %v2752_v37, %v7636_v53  ;;  %v2571_v56 = vmax.f32 %v2523_v45, 0.0 }
 0xa0b   : > { %v2889_v39 = vmul.f32 %v2821_v31, %v2569_v20  ;;  %v2754_v54 = vcombine.high %v2738_v8, %v2738_v8  ;;  %v2555_v58 = vadd.f32 %v6973_v1, %v2554_v5  ;;  %v2898_v49 = vmul.f32 %v2857_v38, %v2578_v34 }
 0xa0c   : > { %v2853_v41 = vrot.slane %v2804_v36, %v7636_v53  ;;  %v2801_v50 = vrot.slane %v2773_v9, %v6976_v17  ;;  %v2577_v46 = vmax.f32 %v2547_v40, 0.0  ;;  %v2891_v21 = vmul.f32 %v2829_v42, %v2571_v56 }
 0xa0d   : > { %v2833_v22 = vrot.slane %v2754_v54, %v7636_v53  ;;  %v2756_v51 = vcombine.high %v2752_v37, %v2752_v37  ;;  %v2579_v59 = vmax.f32 %v2555_v58, 0.0  ;;  %v2803_v27 = vcombine.high %v2787_v52, %v2787_v52 }
 0xa0e   : > { %2906 = vadd.xlane.f32.xlu0 %v2888_v30  ;;  %2920 = vadd.xlane.f32.xlu1 %v2895_v60  ;;  %v2897_v23 = vmul.f32 %v2853_v41, %v2577_v46  ;;  %v2861_v24 = vrot.slane %v2801_v50, %v7636_v53  ;;  %v2572_v17 = vmax.f32 %v2528_v61, 0.0  ;;  %v2563_v48 = vadd.f32 %v4838_v57, %v6973_v1  ;;  %v7033_v1 = vld [vmem:[%s790_s0] sm:$0xff]  ;;  %v7039_v30 = vld [vmem:[%s790_s0 + $0x8] sm:$0xff]  ;;  %s4360_s0 = sshll.u32 %s6151_s7, 4 }
 0xa0f   : > { %v2837_v26 = vrot.slane %v2756_v51, %v7636_v53  ;;  %v2865_v55 = vrot.slane %v2803_v27, %v7636_v53  ;;  %v2805_v8 = vcombine.high %v2801_v50, %v2801_v50  ;;  %v2573_v14 = vmax.f32 %v2531_v4, 0.0  ;;  %s783_s23 = scalar_lea.vmem [#allocation23], %s4360_s0 }
 0xa10   : > { %v2892_v12 = vmul.f32 %v2833_v22, %v2572_v17  ;;  %v2899_v7 = vmul.f32 %v2861_v24, %v2579_v59  ;;  %v2581_v18 = vmax.f32 %v2563_v48, 0.0  ;;  %v3208_v25 = vrot.slane %v7033_v1, %v7637_v10  ;;  %s4123_s16 = sshll.u32 %s783_s23, 4  ;;  %s7427_s16 = int_to_ptr.vmem [resolvable:$true] %s4123_s16 }
 0xa11   : > { %v2893_v11 = vmul.f32 %v2837_v26, %v2573_v14  ;;  %v2900_v29 = vmul.f32 %v2865_v55, %v2580_v28  ;;  %v2869_v15 = vrot.slane %v2805_v8, %v7636_v53  ;;  %v3201_v16 = vrot.slane %v7033_v1, %v7636_v53  ;;  %s5712_s18 = scalar_lea.vmem %s7427_s16, 256  ;;  %p5719_p8 = scmp.lt.s32.totalorder %s7427_s16, %s5717_s30 }
 0xa12   : > { %2910 = vadd.xlane.f32.xlu0 %v2890_v35  ;;  %2922 = vadd.xlane.f32.xlu1 %v2896_v43  ;;  %v3257_v63 = vrot.slane %v7039_v30, %v7636_v53  ;;  %v3215_v47 = vrot.slane %v7033_v1, %v6398_v62  ;;  %v7046_v44 = vsub.s32 3, %v7635_v0  ;;  %v3264_v3 = vrot.slane %v7039_v30, %v7637_v10  ;;  %p5713_p5 = scmp.ne.s32.totalorder %s7427_s16, %s5712_s18  ;;  %p5720_p10 = scmp.lt.s32.totalorder %s5718_s25, %s5712_s18 }
 0xa13   : > { %v2901_v6 = vmul.f32 %v2869_v15, %v2581_v18  ;;  %v7053_v19 = vsub.s32 4, %v7635_v0  ;;  %v3271_v52 = vrot.slane %v7039_v30, %v6398_v62  ;;  %v7064_v34 = vsub.s32 5, %v7635_v0 }
 0xa14   : > { %v3222_v60 = vrot.slane %v7033_v1, %v7046_v44  ;;  %v3278_v13 = vrot.slane %v7039_v30, %v7046_v44  ;;  %v7638_v45 = vlaneseq  ;;  %v2935_v40 = vstv %s2934_s1  ;;  %p5714_p3 = pnand %p5713_p5, %p7642_p1  ;;  %p5721_p11 = por %p5720_p10, %p5719_p8 }
 0xa15   : > { %v3229_v32 = vrot.slane %v7033_v1, %v7053_v19  ;;  %v3285_v57 = vrot.slane %v7039_v30, %v7053_v19  ;;  %v3292_v35 = vrot.slane %v7039_v30, %v7064_v34 }
 0xa16   : > { %2908 = vadd.xlane.f32.xlu0 %v2889_v39  ;;  %2926 = vadd.xlane.f32.xlu1 %v2898_v49  ;;  %v2971_v5 = vand.u32 127, %v7638_v45  ;;  %p5715_p9 = pneg %p5714_p3 }
 0xa18   : > { %v7072_v58 = vsub.s32 %v2971_v5, %v7635_v0  ;;  %p5722_p4 = pnand %p5721_p11, %p5715_p9 }
 0xa1a   : > { %2912 = vadd.xlane.f32.xlu0 %v2891_v21  ;;  %2924 = vadd.xlane.f32.xlu1 %v2897_v23 }
 0xa1e   : > { %2914 = vadd.xlane.f32.xlu0 %v2892_v12  ;;  %2928 = vadd.xlane.f32.xlu1 %v2899_v7 }
 0xa22   : > { %2916 = vadd.xlane.f32.xlu0 %v2893_v11  ;;  %2930 = vadd.xlane.f32.xlu1 %v2900_v29 }
 0xa26   : > { %2932 = vadd.xlane.f32.xlu1 %v2901_v6 }
 0xa37   : > { %3210 = vbcast.lane.b32.xlu1 %v3208_v25, 256 }
 0xa38   : > { %3203 = vbcast.lane.b32.xlu0 %v3201_v16, 256 }
 0xa3b   : > { %3259 = vbcast.lane.b32.xlu1 %v3257_v63, 256 }
 0xa3c   : > { %3217 = vbcast.lane.b32.xlu0 %v3215_v47, 256 }
 0xa3f   : > { %3266 = vbcast.lane.b32.xlu1 %v3264_v3, 256 }
 0xa40   : > { %3224 = vbcast.lane.b32.xlu0 %v3222_v60, 256 }
 0xa43   : > { %3273 = vbcast.lane.b32.xlu1 %v3271_v52, 256 }
 0xa44   : > { %3231 = vbcast.lane.b32.xlu0 %v3229_v32, 256 }
 0xa47   : > { %3280 = vbcast.lane.b32.xlu1 %v3278_v13, 256 }
 0xa4b   : > { %3287 = vbcast.lane.b32.xlu1 %v3285_v57, 256 }
 0xa4f   : > { %3294 = vbcast.lane.b32.xlu1 %v3292_v35, 256 }
 0xa8f   : > { %v2903_v31 = vpop.xlane.xlu0 %2902 }
 0xa90   : > { %v7074_v49 = vadd.f32 %v2935_v40, %v2903_v31 }
 0xa92   : > { %v2975_v33 = vrot.slane %v7074_v49, %v7072_v58 }
 0xa93   : > { %v2905_v37 = vpop.xlane.xlu0 %2904  ;;  %v2919_v43 = vpop.xlane.xlu1 %2918 }
 0xa94   : > { %v7069_v42 = vadd.f32 %v2935_v40, %v2905_v37  ;;  %v7088_v51 = vadd.f32 %v2935_v40, %v2919_v43 }
 0xa96   : > { %v2979_v56 = vrot.slane %v7069_v42, %v7072_v58  ;;  %v3007_v55 = vrot.slane %v7088_v51, %v7072_v58 }
 0xa97   : > { %v2907_v38 = vpop.xlane.xlu0 %2906  ;;  %v2921_v36 = vpop.xlane.xlu1 %2920 }
 0xa98   : > { %v7076_v41 = vadd.f32 %v2935_v40, %v2907_v38  ;;  %v7086_v22 = vadd.f32 %v2935_v40, %v2921_v36  ;;  %v3037_v28 = vsel %vm3036_vm2, %v2979_v56, %v2975_v33  ;;  %v3236_v33 = vrot.slane %v7033_v1, %v7064_v34 }
 0xa9a   : > { %v2983_v21 = vrot.slane %v7076_v41, %v7072_v58  ;;  %v3011_v7 = vrot.slane %v7086_v22, %v7072_v58 }
 0xa9b   : > { %v2911_v9 = vpop.xlane.xlu0 %2910  ;;  %v2923_v20 = vpop.xlane.xlu1 %2922 }
 0xa9c   : > { %v7090_v59 = vadd.f32 %v2935_v40, %v2923_v20  ;;  %v7096_v27 = vadd.f32 %v2935_v40, %v2911_v9  ;;  %v3039_v48 = vsel %vm3038_vm3, %v2983_v21, %v3037_v28  ;;  %v3050_v3 = vsel %vm3036_vm2, %v3011_v7, %v3007_v55 }
 0xa9e   : > { %v3015_v8 = vrot.slane %v7090_v59, %v7072_v58  ;;  %v2991_v18 = vrot.slane %v7096_v27, %v7072_v58 }
 0xa9f   : > { %v2909_v39 = vpop.xlane.xlu0 %2908  ;;  %v2927_v54 = vpop.xlane.xlu1 %2926 }
 0xaa0   : > { %v7078_v50 = vadd.f32 %v2935_v40, %v2909_v39  ;;  %v7121_v16 = vadd.f32 %v2935_v40, %v2927_v54  ;;  %v3051_v32 = vsel %vm3038_vm3, %v3015_v8, %v3050_v3 }
 0xaa2   : > { %v2987_v23 = vrot.slane %v7078_v50, %v7072_v58  ;;  %v3023_v43 = vrot.slane %v7121_v16, %v7072_v58 }
 0xaa3   : > { %v2913_v61 = vpop.xlane.xlu0 %2912  ;;  %v2925_v46 = vpop.xlane.xlu1 %2924 }
 0xaa4   : > { %v7094_v24 = vadd.f32 %v2935_v40, %v2913_v61  ;;  %v7098_v17 = vadd.f32 %v2935_v40, %v2925_v46  ;;  %v3041_v14 = vsel %vm3040_vm4, %v2987_v23, %v3039_v48  ;;  %v7160_v23 = vsub.s32 7, %v7635_v0 }
 0xaa5   : > { %v3043_v52 = vsel %vm3042_vm5, %v2991_v18, %v3041_v14 }
 0xaa6   : > { %v2995_v11 = vrot.slane %v7094_v24, %v7072_v58  ;;  %v3019_v29 = vrot.slane %v7098_v17, %v7072_v58  ;;  %v3306_v28 = vrot.slane %v7039_v30, %v7160_v23 }
 0xaa7   : > { %v2915_v4 = vpop.xlane.xlu0 %2914  ;;  %v2929_v26 = vpop.xlane.xlu1 %2928 }
 0xaa8   : > { %v7101_v12 = vadd.f32 %v2935_v40, %v2915_v4  ;;  %v7119_v6 = vadd.f32 %v2935_v40, %v2929_v26  ;;  %v3045_v57 = vsel %vm3044_vm6, %v2995_v11, %v3043_v52  ;;  %v3052_v35 = vsel %vm3040_vm4, %v3019_v29, %v3051_v32 }
 0xaa9   : > { %v3053_v5 = vsel %vm3042_vm5, %v3023_v43, %v3052_v35  ;;  %v3250_v26 = vrot.slane %v7033_v1, %v7160_v23 }
 0xaaa   : > { %v2999_v15 = vrot.slane %v7101_v12, %v7072_v58  ;;  %v3027_v31 = vrot.slane %v7119_v6, %v7072_v58 }
 0xaab   : > { %v2917_v25 = vpop.xlane.xlu0 %2916  ;;  %v2931_v47 = vpop.xlane.xlu1 %2930 }
 0xaac   : > { %v7123_v63 = vadd.f32 %v2935_v40, %v2917_v25  ;;  %v7126_v60 = vadd.f32 %v2935_v40, %v2931_v47  ;;  %v3047_v37 = vsel %vm3046_vm7, %v2999_v15, %v3045_v57  ;;  %v3054_v54 = vsel %vm3044_vm6, %v3027_v31, %v3053_v5 }
 0xaae   : > { %v3003_v13 = vrot.slane %v7123_v63, %v7072_v58  ;;  %v3031_v38 = vrot.slane %v7126_v60, %v7072_v58 }
 0xaaf   : > { %v2933_v36 = vpop.xlane.xlu1 %2932  ;;  %v3204_v55 = vpop.permute.xlu0 %3203 }
 0xab0   : > { %v3049_v9 = vsel %vm3048_vm8, %v3003_v13, %v3047_v37  ;;  %v7142_v20 = vadd.f32 %v2935_v40, %v2933_v36  ;;  %v3055_v61 = vsel %vm3046_vm7, %v3031_v38, %v3054_v54  ;;  %v7153_v40 = vsub.s32 6, %v7635_v0 }
 0xab1   : > { %v3060_v45 = vsel %vm3059_vm9, %v3049_v9, -inf }
 0xab2   : > { %3061 = vmax.xlane.f32.xlu0 %v3060_v45  ;;  %v3035_v39 = vrot.slane %v7142_v20, %v7072_v58  ;;  %v3299_v21 = vrot.slane %v7039_v30, %v7153_v40  ;;  %v3243_v4 = vrot.slane %v7033_v1, %v7153_v40 }
 0xab3   : > { %v7168_v48 = vpop.permute.xlu1 %3210  ;;  %v7176_v14 = vpop.permute.xlu0 %3217 }
 0xab4   : > { %v3056_v56 = vsel %vm3048_vm8, %v3035_v39, %v3055_v61 }
 0xab5   : > { %v3063_v46 = vsel %vm3059_vm9, %v3056_v56, -inf }
 0xab6   : > { %3064 = vmax.xlane.f32.xlu1 %v3063_v46 }
 0xab7   : > { %v7170_v7 = vpop.permute.xlu1 %3259  ;;  %v7180_v30 = vpop.permute.xlu0 %3224 }
 0xabb   : > { %v7172_v0 = vpop.permute.xlu1 %3266  ;;  %v7184_v1 = vpop.permute.xlu0 %3231 }
 0xabf   : > { %v7174_v8 = vpop.permute.xlu1 %3273 }
 0xac3   : > { %v7178_v11 = vpop.permute.xlu1 %3280 }
 0xac7   : > { %3301 = vbcast.lane.b32.xlu1 %v3299_v21, 256  ;;  %v7182_v18 = vpop.permute.xlu1 %3287 }
 0xac8   : > { %3238 = vbcast.lane.b32.xlu0 %v3236_v33, 256 }
 0xacb   : > { %3308 = vbcast.lane.b32.xlu1 %v3306_v28, 256  ;;  %v7188_v15 = vpop.permute.xlu1 %3294 }
 0xacc   : > { %3245 = vbcast.lane.b32.xlu0 %v3243_v4, 256 }
 0xad0   : > { %3252 = vbcast.lane.b32.xlu0 %v3250_v26, 256 }
 0xb3b   : > { %v7186_v29 = vpop.xlane.xlu0 %3061 }
 0xb3c   : > { %v3071_v25 = vrot.slane %v7186_v29, %v7636_v53  ;;  %v3075_v47 = vrot.slane %v7186_v29, %v7637_v10  ;;  %v3079_v3 = vrot.slane %v7186_v29, %v6398_v62  ;;  %v3083_v13 = vrot.slane %v7186_v29, %v7046_v44 }
 0xb3d   : > { %v3087_v36 = vrot.slane %v7186_v29, %v7053_v19  ;;  %v3091_v54 = vrot.slane %v7186_v29, %v7064_v34 }
 0xb3e   : > { %v3148_v52 = vsub.f32 %v7074_v49, %v3071_v25  ;;  %v3149_v32 = vsub.f32 %v7069_v42, %v3075_v47  ;;  %v3150_v43 = vsub.f32 %v7076_v41, %v3079_v3  ;;  %v3151_v42 = vsub.f32 %v7078_v50, %v3083_v13 }
 0xb3f   : > { %v3065_v57 = vpop.xlane.xlu1 %3064  ;;  %v3152_v61 = vsub.f32 %v7096_v27, %v3087_v36  ;;  %v3153_v33 = vsub.f32 %v7094_v24, %v3091_v54  ;;  %v3095_v27 = vrot.slane %v7186_v29, %v7153_v40 }
 0xb40   : > { %v3164_v35 = vmul.f32 1.442695, %v3148_v52  ;;  %v3107_v31 = vrot.slane %v3065_v57, %v7637_v10  ;;  %v3111_v37 = vrot.slane %v3065_v57, %v6398_v62  ;;  %v3166_v38 = vmul.f32 1.442695, %v3149_v32 }
 0xb41   : > { %v3115_v9 = vrot.slane %v3065_v57, %v7046_v44  ;;  %v3168_v45 = vmul.f32 1.442695, %v3150_v43  ;;  %v3170_v41 = vmul.f32 1.442695, %v3151_v42  ;;  %v3119_v56 = vrot.slane %v3065_v57, %v7053_v19 }
 0xb42   : > { %5330 = vpow2.f32 %v3164_v35  ;;  %v3157_v49 = vsub.f32 %v7086_v22, %v3107_v31  ;;  %v3158_v5 = vsub.f32 %v7090_v59, %v3111_v37  ;;  %v3123_v50 = vrot.slane %v3065_v57, %v7064_v34 }
 0xb43   : > { %5332 = vpow2.f32 %v3166_v38  ;;  %v3159_v22 = vsub.f32 %v7098_v17, %v3115_v9  ;;  %v3172_v59 = vmul.f32 1.442695, %v3152_v61  ;;  %v3103_v21 = vrot.slane %v3065_v57, %v7636_v53 }
 0xb44   : > { %v3182_v39 = vmul.f32 1.442695, %v3157_v49  ;;  %5334 = vpow2.f32 %v3168_v45  ;;  %v3184_v46 = vmul.f32 1.442695, %v3158_v5  ;;  %v3160_v28 = vsub.f32 %v7121_v16, %v3119_v56 }
 0xb45   : > { %v3186_v4 = vmul.f32 1.442695, %v3159_v22  ;;  %v3174_v25 = vmul.f32 1.442695, %v3153_v33  ;;  %v3127_v17 = vrot.slane %v3065_v57, %v7153_v40  ;;  %v3161_v47 = vsub.f32 %v7119_v6, %v3123_v50 }
 0xb46   : > { %5336 = vpow2.f32 %v3182_v39  ;;  %v3188_v24 = vmul.f32 1.442695, %v3160_v28  ;;  %v3156_v52 = vsub.f32 %v7088_v51, %v3103_v21  ;;  %v3099_v32 = vrot.slane %v7186_v29, %v7160_v23 }
 0xb47   : > { %5338 = vpow2.f32 %v3170_v41  ;;  %v3154_v13 = vsub.f32 %v7101_v12, %v3095_v27  ;;  %v3131_v35 = vrot.slane %v3065_v57, %v7160_v23  ;;  %v3190_v31 = vmul.f32 1.442695, %v3161_v47 }
 0xb48   : > { %5340 = vpow2.f32 %v3184_v46  ;;  %v3162_v6 = vsub.f32 %v7126_v60, %v3127_v17  ;;  %v3180_v37 = vmul.f32 1.442695, %v3156_v52  ;;  %v3155_v38 = vsub.f32 %v7123_v63, %v3099_v32 }
 0xb49   : > { %5342 = vpow2.f32 %v3172_v59  ;;  %v3176_v43 = vmul.f32 1.442695, %v3154_v13  ;;  %v3163_v36 = vsub.f32 %v7142_v20, %v3131_v35 }
 0xb4a   : > { %5344 = vpow2.f32 %v3186_v4  ;;  %v3192_v57 = vmul.f32 1.442695, %v3162_v6  ;;  %v3178_v42 = vmul.f32 1.442695, %v3155_v38 }
 0xb4b   : > { %5346 = vpow2.f32 %v3174_v25  ;;  %v3194_v20 = vmul.f32 1.442695, %v3163_v36 }
 0xb4c   : > { %5348 = vpow2.f32 %v3188_v24 }
 0xb4d   : > { %5350 = vpow2.f32 %v3190_v31 }
 0xb4e   : > { %5352 = vpow2.f32 %v3180_v37 }
 0xb4f   : > { %v5331_v26 = vpop.eup %5330  ;;  %5354 = vpow2.f32 %v3176_v43 }
 0xb50   : > { %v7222_v3 = vmul.f32 %v5331_v26, %v3204_v55  ;;  %v5333_v16 = vpop.eup %5332  ;;  %5356 = vpow2.f32 %v3192_v57 }
 0xb51   : > { %v7232_v55 = vmul.f32 %v5333_v16, %v7168_v48  ;;  %v5335_v51 = vpop.eup %5334  ;;  %5358 = vpow2.f32 %v3178_v42 }
 0xb52   : > { %3359 = vperm.xlu0 %5072, %v7222_v3   ;;  %v7238_v49 = vmul.f32 %v5335_v51, %v7176_v14  ;;  %5360 = vpow2.f32 %v3194_v20 }
 0xb53   : > { %3362 = vperm.xlu1 %5073, %v7232_v55   ;;  %v5337_v29 = vpop.eup %5336 }
 0xb54   : > { %v5339_v12 = vpop.eup %5338  ;;  %v7241_v60 = vmul.f32 %v5337_v29, %v7172_v0 }
 0xb55   : > { %v5341_v48 = vpop.eup %5340  ;;  %v7246_v9 = vmul.f32 %v5339_v12, %v7180_v30  ;;  %v3239_v30 = vpop.permute.xlu0 %3238 }
 0xb56   : > { %3386 = vperm.xlu0 %5072, %v7241_v60   ;;  %v5343_v63 = vpop.eup %5342  ;;  %v7249_v14 = vmul.f32 %v5341_v48, %v7174_v8 }
 0xb57   : > { %3365 = vperm.xlu1 %5073, %v7238_v49   ;;  %v5345_v45 = vpop.eup %5344  ;;  %v7254_v5 = vmul.f32 %v5343_v63, %v7184_v1 }
 0xb58   : > { %v5347_v0 = vpop.eup %5346  ;;  %v7257_v39 = vmul.f32 %v5345_v45, %v7178_v11  ;;  %v3302_v11 = vpop.permute.xlu1 %3301 }
 0xb59   : > { %v5349_v54 = vpop.eup %5348  ;;  %v7261_v41 = vmul.f32 %v5347_v0, %v3239_v30  ;;  %v3246_v1 = vpop.permute.xlu0 %3245 }
 0xb5a   : > { %3389 = vperm.xlu0 %5072, %v7249_v14   ;;  %v5351_v8 = vpop.eup %5350  ;;  %v7264_v61 = vmul.f32 %v5349_v54, %v7182_v18 }
 0xb5b   : > { %3368 = vperm.xlu1 %5073, %v7246_v9   ;;  %v5353_v56 = vpop.eup %5352  ;;  %v7269_v22 = vmul.f32 %v5351_v8, %v7188_v15 }
 0xb5c   : > { %v5355_v46 = vpop.eup %5354  ;;  %v7272_v50 = vmul.f32 %v5353_v56, %v7170_v7  ;;  %v3309_v27 = vpop.permute.xlu1 %3308 }
 0xb5d   : > { %v5357_v33 = vpop.eup %5356  ;;  %v7276_v59 = vmul.f32 %v5355_v46, %v3246_v1  ;;  %v3253_v28 = vpop.permute.xlu0 %3252 }
 0xb5e   : > { %3392 = vperm.xlu0 %5072, %v7257_v39   ;;  %v5359_v18 = vpop.eup %5358  ;;  %v7278_v21 = vmul.f32 %v5357_v33, %v3302_v11 }
 0xb5f   : > { %3371 = vperm.xlu1 %5073, %v7254_v5   ;;  %v5361_v4 = vpop.eup %5360  ;;  %v7282_v15 = vmul.f32 %v5359_v18, %v3253_v28 }
 0xb60   : > { %v7284_v7 = vmul.f32 %v5361_v4, %v3309_v27 }
 0xb62   : > { %3395 = vperm.xlu0 %5072, %v7264_v61  }
 0xb63   : > { %3374 = vperm.xlu1 %5073, %v7261_v41  }
 0xb66   : > { %3398 = vperm.xlu0 %5072, %v7269_v22  }
 0xb67   : > { %3383 = vperm.xlu1 %5073, %v7272_v50  }
 0xb6a   : > { %3401 = vperm.xlu0 %5072, %v7278_v21  }
 0xb6b   : > { %3377 = vperm.xlu1 %5073, %v7276_v59  }
 0xb6e   : > { %3404 = vperm.xlu0 %5072, %v7284_v7  }
 0xb6f   : > { %3380 = vperm.xlu1 %5073, %v7282_v15  }
 0xbcd   : > { %v3360_v26 = vpop.permute.xlu0 %3359 }
 0xbce   : > { %v3363_v25 = vpop.permute.xlu1 %3362  ;;  %v3409_v37 = vrot.slane %v3360_v26, %v7072_v58 }
 0xbcf   : > { %v3413_v51 = vrot.slane %v3363_v25, %v7072_v58 }
 0xbd1   : > { %v3387_v17 = vpop.permute.xlu0 %3386  ;;  %v3470_v54 = vsel %vm3036_vm2, %v3413_v51, %v3409_v37 }
 0xbd2   : > { %v3366_v47 = vpop.permute.xlu1 %3365  ;;  %v3445_v29 = vrot.slane %v3387_v17, %v7072_v58 }
 0xbd3   : > { %v3417_v38 = vrot.slane %v3366_v47, %v7072_v58 }
 0xbd5   : > { %v3390_v24 = vpop.permute.xlu0 %3389  ;;  %v3471_v1 = vsel %vm3038_vm3, %v3417_v38, %v3470_v54 }
 0xbd6   : > { %v3369_v52 = vpop.permute.xlu1 %3368  ;;  %v3449_v36 = vrot.slane %v3390_v24, %v7072_v58 }
 0xbd7   : > { %v3421_v12 = vrot.slane %v3369_v52, %v7072_v58 }
 0xbd9   : > { %v3393_v32 = vpop.permute.xlu0 %3392  ;;  %v3472_v18 = vsel %vm3040_vm4, %v3421_v12, %v3471_v1 }
 0xbda   : > { %v3372_v16 = vpop.permute.xlu1 %3371  ;;  %v3453_v57 = vrot.slane %v3393_v32, %v7072_v58 }
 0xbdb   : > { %v3425_v42 = vrot.slane %v3372_v16, %v7072_v58 }
 0xbdd   : > { %v3396_v13 = vpop.permute.xlu0 %3395  ;;  %v3473_v28 = vsel %vm3042_vm5, %v3425_v42, %v3472_v18 }
 0xbde   : > { %v3375_v35 = vpop.permute.xlu1 %3374  ;;  %v3457_v63 = vrot.slane %v3396_v13, %v7072_v58 }
 0xbdf   : > { %v3429_v30 = vrot.slane %v3375_v35, %v7072_v58 }
 0xbe1   : > { %v3399_v31 = vpop.permute.xlu0 %3398  ;;  %v3474_v25 = vsel %vm3044_vm6, %v3429_v30, %v3473_v28 }
 0xbe2   : > { %v3384_v6 = vpop.permute.xlu1 %3383  ;;  %v3461_v8 = vrot.slane %v3399_v31, %v7072_v58 }
 0xbe3   : > { %v3441_v43 = vrot.slane %v3384_v6, %v7072_v58 }
 0xbe5   : > { %v3477_v48 = vsel %vm3036_vm2, %v3445_v29, %v3441_v43  ;;  %v3402_v45 = vpop.permute.xlu0 %3401 }
 0xbe6   : > { %v3478_v20 = vsel %vm3038_vm3, %v3449_v36, %v3477_v48  ;;  %v3378_v0 = vpop.permute.xlu1 %3377  ;;  %v3465_v11 = vrot.slane %v3402_v45, %v7072_v58 }
 0xbe7   : > { %v3479_v56 = vsel %vm3040_vm4, %v3453_v57, %v3478_v20  ;;  %v3433_v46 = vrot.slane %v3378_v0, %v7072_v58 }
 0xbe8   : > { %v3480_v33 = vsel %vm3042_vm5, %v3457_v63, %v3479_v56 }
 0xbe9   : > { %v3481_v4 = vsel %vm3044_vm6, %v3461_v8, %v3480_v33  ;;  %v3405_v27 = vpop.permute.xlu0 %3404  ;;  %v3475_v52 = vsel %vm3046_vm7, %v3433_v46, %v3474_v25 }
 0xbea   : > { %v3381_v26 = vpop.permute.xlu1 %3380  ;;  %v3469_v17 = vrot.slane %v3405_v27, %v7072_v58  ;;  %v3482_v24 = vsel %vm3046_vm7, %v3465_v11, %v3481_v4 }
 0xbeb   : > { %v3437_v47 = vrot.slane %v3381_v26, %v7072_v58 }
 0xbec   : > { %v3483_v32 = vsel %vm3048_vm8, %v3469_v17, %v3482_v24 }
 0xbed   : > { %v3476_v16 = vsel %vm3048_vm8, %v3437_v47, %v3475_v52  ;;  %v3489_v13 = vsel %vm3059_vm9, %v3483_v32, 0.0  ;;  %v5146_v52 = vld [vmem:[#allocation20 + $0x38] sm:$0xff]  }
 0xbee   : > { %v3486_v35 = vsel %vm3059_vm9, %v3476_v16, 0.0  ;;  %3490 = vadd.xlane.f32.xlu0 %v3489_v13  ;;  %4860 = vmatpush3.bf16.msra.mxu1 %v5146_v52  ;;  %v5154_v32 = vld [vmem:[%s7490_s15 + $0x38] sm:$0xff]   ;;  %v5155_v16 = vld [vmem:[%s7490_s15 + $0x30] sm:$0xff]  }
 0xbef   : > { %3487 = vadd.xlane.f32.xlu1 %v3486_v35  ;;  %4861 = vmatprep.subr.bf16.mxu1 %v7602_v2  ;;  %v5153_v13 = vld [vmem:[#allocation20] sm:$0xff]   ;;  %v5156_v35 = vld [vmem:[%s7490_s15 + $0x28] sm:$0xff]  }
 0xbf0   : > { %4880 = vmatpush3.bf16.msra.mxu0 %v5154_v32 }
 0xbf1   : > { %4881 = vmatprep.subr.bf16.mxu0 %v7602_v2 }
 0xbf4   : > { %4882 = vmatpush3.bf16.msra.mxu0 %v5155_v16 }
 0xbf5   : > { %4883 = vmatprep.subr.bf16.mxu0 %v7602_v2 }
 0xbf8   : > { %4884 = vmatpush3.bf16.msra.mxu0 %v5156_v35 }
 0xbf9   : > { %4885 = vmatprep.subr.bf16.mxu0 %v7602_v2 }
 0xc77   : > { %v3491_v31 = vpop.xlane.xlu0 %3490 }
 0xc78   : > { %v3488_v6 = vpop.xlane.xlu1 %3487  ;;  %v3493_v37 = vadd.f32 1e-05, %v3491_v31  ;;  %v5157_v31 = vld [vmem:[%s7490_s15 + $0x20] sm:$0xff]  }
 0xc79   : > { %v3492_v51 = vadd.f32 1e-05, %v3488_v6  ;;  %4886 = vmatpush3.bf16.msra.mxu0 %v5157_v31  ;;  %v5158_v6 = vld [vmem:[%s7490_s15 + $0x18] sm:$0xff]  }
 0xc7a   : > { %v3535_v38 = vrot.slane %v3493_v37, %v7637_v10  ;;  %v3539_v12 = vrot.slane %v3493_v37, %v6398_v62  ;;  %v3543_v48 = vrot.slane %v3493_v37, %v7046_v44  ;;  %v3531_v0 = vrot.slane %v3493_v37, %v7636_v53  ;;  %4887 = vmatprep.subr.bf16.mxu0 %v7602_v2 }
 0xc7b   : > { %v3503_v58 = vrot.slane %v3492_v51, %v7637_v10  ;;  %v3499_v29 = vrot.slane %v3492_v51, %v7636_v53  ;;  %v3507_v43 = vrot.slane %v3492_v51, %v6398_v62  ;;  %v3511_v36 = vrot.slane %v3492_v51, %v7046_v44 }
 0xc7c   : > { %v3515_v57 = vrot.slane %v3492_v51, %v7053_v19  ;;  %v3519_v42 = vrot.slane %v3492_v51, %v7064_v34  ;;  %v3547_v10 = vrot.slane %v3493_v37, %v7053_v19  ;;  %v3551_v30 = vrot.slane %v3493_v37, %v7064_v34 }
 0xc7d   : > { %5362 = vrcp.f32 %v3503_v58  ;;  %v3523_v19 = vrot.slane %v3492_v51, %v7153_v40  ;;  %v3555_v53 = vrot.slane %v3493_v37, %v7153_v40  ;;  %v3527_v34 = vrot.slane %v3492_v51, %v7160_v23  ;;  %4888 = vmatpush3.bf16.msra.mxu0 %v5158_v6 }
 0xc7e   : > { %5364 = vrcp.f32 %v3499_v29  ;;  %v3559_v46 = vrot.slane %v3493_v37, %v7160_v23  ;;  %4889 = vmatprep.subr.bf16.mxu0 %v7602_v2  ;;  %v5418_v37 = vld [vmem:[%s6162_s24] sm:$0xff]  }
 0xc7f   : > { %5366 = vrcp.f32 %v3507_v43  ;;  %v3609_v51 = vunpack.c.h.bf16 %v5418_v37  ;;  %v3608_v58 = vunpack.c.l.bf16 %v5418_v37  ;;  %v5423_v37 = vld [vmem:[%s6162_s24 + $0x30] sm:$0xff]  }
 0xc80   : > { %5368 = vrcp.f32 %v3535_v38 }
 0xc81   : > { %5370 = vrcp.f32 %v3511_v36  ;;  %v5419_v36 = vld [vmem:[%s6162_s24 + $0x8] sm:$0xff]  }
 0xc82   : > { %5372 = vrcp.f32 %v3539_v12  ;;  %v3610_v12 = vunpack.c.l.bf16 %v5419_v36 }
 0xc83   : > { %5374 = vrcp.f32 %v3515_v57 }
 0xc84   : > { %5376 = vrcp.f32 %v3543_v48  ;;  %v7382_v48 = vld [vmem:[%s6162_s24 + $0x20] sm:$0xff]  }
 0xc85   : > { %5378 = vrcp.f32 %v3519_v42  ;;  %v3617_v42 = vunpack.c.h.bf16 %v7382_v48 }
 0xc86   : > { %5380 = vrcp.f32 %v3547_v10 }
 0xc87   : > { %5382 = vrcp.f32 %v3531_v0 }
 0xc88   : > { %5384 = vrcp.f32 %v3551_v30 }
 0xc89   : > { %5386 = vrcp.f32 %v3523_v19 }
 0xc8a   : > { %v5363_v63 = vpop.eup %5362  ;;  %5388 = vrcp.f32 %v3555_v53 }
 0xc8b   : > { %v5365_v20 = vpop.eup %5364  ;;  %v3579_v45 = vmul.f32 %v5363_v63, %v7232_v55  ;;  %5390 = vrcp.f32 %v3527_v34 }
 0xc8c   : > { %v5367_v62 = vpop.eup %5366  ;;  %v3577_v54 = vmul.f32 %v5365_v20, %v7222_v3  ;;  %5392 = vrcp.f32 %v3559_v46 }
 0xc8d   : > { %v5369_v44 = vpop.eup %5368  ;;  %3631 = vperm.xlu1 %5073, %v3579_v45   ;;  %v3581_v8 = vmul.f32 %v5367_v62, %v7238_v49 }
 0xc8e   : > { %3626 = vperm.xlu0 %5072, %v3577_v54   ;;  %v5371_v56 = vpop.eup %5370  ;;  %v3595_v55 = vmul.f32 %v5369_v44, %v7241_v60  ;;  %v3611_v54 = vunpack.c.h.bf16 %v5419_v36 }
 0xc8f   : > { %v5373_v1 = vpop.eup %5372  ;;  %v3583_v3 = vmul.f32 %v5371_v56, %v7246_v9 }
 0xc90   : > { %v5375_v11 = vpop.eup %5374  ;;  %v3597_v49 = vmul.f32 %v5373_v1, %v7249_v14 }
 0xc91   : > { %3636 = vperm.xlu1 %5073, %v3581_v8   ;;  %v5377_v33 = vpop.eup %5376  ;;  %v3585_v60 = vmul.f32 %v5375_v11, %v7254_v5  ;;  %v5421_v8 = vld [vmem:[%s6162_s24 + $0x28] sm:$0xff]  }
 0xc92   : > { %3671 = vperm.xlu0 %5072, %v3595_v55   ;;  %v5379_v40 = vpop.eup %5378  ;;  %v3599_v18 = vmul.f32 %v5377_v33, %v7257_v39  ;;  %v3618_v19 = vunpack.c.l.bf16 %v5421_v8  ;;  %v5422_v33 = vld [vmem:[%s6162_s24 + $0x10] sm:$0xff]  }
 0xc93   : > { %v5381_v9 = vpop.eup %5380  ;;  %v3587_v4 = vmul.f32 %v5379_v40, %v7261_v41 }
 0xc94   : > { %v5383_v28 = vpop.eup %5382  ;;  %v3601_v14 = vmul.f32 %v5381_v9, %v7264_v61 }
 0xc95   : > { %3641 = vperm.xlu1 %5073, %v3583_v3   ;;  %v5385_v27 = vpop.eup %5384  ;;  %v3593_v23 = vmul.f32 %v5383_v28, %v7272_v50  ;;  %v5148_v50 = vld [vmem:[#allocation20 + $0x28] sm:$0xff]  }
 0xc96   : > { %3676 = vperm.xlu0 %5072, %v3597_v49   ;;  %v5387_v26 = vpop.eup %5386  ;;  %v3603_v5 = vmul.f32 %v5385_v27, %v7269_v22  ;;  %v5147_v22 = vld [vmem:[#allocation20 + $0x30] sm:$0xff]  }
 0xc97   : > { %v5389_v25 = vpop.eup %5388  ;;  %v3589_v39 = vmul.f32 %v5387_v26, %v7276_v59  ;;  %4862 = vmatpush3.bf16.msra.mxu1 %v5147_v22  ;;  %v5149_v59 = vld [vmem:[#allocation20 + $0x20] sm:$0xff]  }
 0xc98   : > { %v5391_v17 = vpop.eup %5390  ;;  %v3605_v47 = vmul.f32 %v5389_v25, %v7278_v21  ;;  %4863 = vmatprep.subr.bf16.mxu1 %v7602_v2  ;;  %v5150_v21 = vld [vmem:[#allocation20 + $0x18] sm:$0xff]  }
 0xc99   : > { %3646 = vperm.xlu1 %5073, %v3585_v60   ;;  %v5393_v41 = vpop.eup %5392  ;;  %v3591_v61 = vmul.f32 %v5391_v17, %v7282_v15  ;;  %v5151_v15 = vld [vmem:[#allocation20 + $0x10] sm:$0xff]   ;;  %v3612_v60 = vunpack.c.l.bf16 %v5422_v33 }
 0xc9a   : > { %3681 = vperm.xlu0 %5072, %v3599_v18   ;;  %v3607_v24 = vmul.f32 %v5393_v41, %v7284_v7  ;;  %v5152_v7 = vld [vmem:[#allocation20 + $0x8] sm:$0xff]  }
 0xc9b   : > { %4864 = vmatpush3.bf16.msra.mxu1 %v5148_v50 }
 0xc9c   : > { %4865 = vmatprep.subr.bf16.mxu1 %v7602_v2 }
 0xc9d   : > { %3651 = vperm.xlu1 %5073, %v3587_v4   ;;  %v3619_v4 = vunpack.c.h.bf16 %v5421_v8 }
 0xc9e   : > { %3686 = vperm.xlu0 %5072, %v3601_v14  }
 0xc9f   : > { %4866 = vmatpush3.bf16.msra.mxu1 %v5149_v59 }
 0xca0   : > { %4867 = vmatprep.subr.bf16.mxu1 %v7602_v2 }
 0xca1   : > { %3666 = vperm.xlu1 %5073, %v3593_v23  }
 0xca2   : > { %3691 = vperm.xlu0 %5072, %v3603_v5  }
 0xca3   : > { %4868 = vmatpush3.bf16.msra.mxu1 %v5150_v21 }
 0xca4   : > { %4869 = vmatprep.subr.bf16.mxu1 %v7602_v2 }
 0xca5   : > { %3656 = vperm.xlu1 %5073, %v3589_v39  }
 0xca6   : > { %3696 = vperm.xlu0 %5072, %v3605_v47  }
 0xca7   : > { %4870 = vmatpush3.bf16.msra.mxu1 %v5151_v15 }
 0xca8   : > { %4871 = vmatprep.subr.bf16.mxu1 %v7602_v2 }
 0xca9   : > { %3661 = vperm.xlu1 %5073, %v3591_v61  }
 0xcaa   : > { %3701 = vperm.xlu0 %5072, %v3607_v24  }
 0xcab   : > { %4872 = vmatpush3.bf16.msra.mxu1 %v5152_v7  ;;  %v3613_v7 = vunpack.c.h.bf16 %v5422_v33 }
 0xcac   : > { %4873 = vmatprep.subr.bf16.mxu1 %v7602_v2 }
 0xcaf   : > { %4874 = vmatpush3.bf16.msra.mxu1 %v5153_v13 }
 0xd08   : > { %v3632_v29 = vpop.permute.xlu1 %3631 }
 0xd09   : > { %v3705_v43 = vmul.f32 %v3632_v29, %v3609_v51  ;;  %v3627_v38 = vpop.permute.xlu0 %3626  ;;  %v3620_v51 = vunpack.c.l.bf16 %v5423_v37 }
 0xd0a   : > { %v3704_v57 = vmul.f32 %v3627_v38, %v3608_v58 }
 0xd0b   : > { %v3726_v10 = vrot.slane %v3705_v43, 4 }
 0xd0c   : > { %v3720_v63 = vrot.slane %v3704_v57, 4  ;;  %v3637_v20 = vpop.permute.xlu1 %3636 }
 0xd0d   : > { %v3727_v45 = vadd.f32 %v3726_v10, %v3705_v43  ;;  %v3706_v0 = vmul.f32 %v3637_v20, %v3610_v12  ;;  %v3672_v62 = vpop.permute.xlu0 %3671 }
 0xd0e   : > { %v3721_v30 = vadd.f32 %v3720_v63, %v3704_v57  ;;  %v3713_v44 = vmul.f32 %v3672_v62, %v3617_v42  ;;  %v3616_v63 = vunpack.c.l.bf16 %v7382_v48 }
 0xd0f   : > { %v3728_v56 = vrot.slane %v3727_v45, 2  ;;  %v3732_v55 = vrot.slane %v3706_v0, 4 }
 0xd10   : > { %v3722_v53 = vrot.slane %v3721_v30, 2  ;;  %v3774_v1 = vrot.slane %v3713_v44, 4  ;;  %v3642_v3 = vpop.permute.xlu1 %3641 }
 0xd11   : > { %v3729_v34 = vadd.f32 %v3728_v56, %v3727_v45  ;;  %v3733_v11 = vadd.f32 %v3732_v55, %v3706_v0  ;;  %v3707_v49 = vmul.f32 %v3642_v3, %v3611_v54  ;;  %v3677_v46 = vpop.permute.xlu0 %3676  ;;  %v3621_v45 = vunpack.c.h.bf16 %v5423_v37  ;;  %v5424_v0 = vld [vmem:[%s6162_s24 + $0x18] sm:$0xff]  }
 0xd12   : > { %v3723_v40 = vadd.f32 %v3722_v53, %v3721_v30  ;;  %v3775_v18 = vadd.f32 %v3774_v1, %v3713_v44  ;;  %v3714_v9 = vmul.f32 %v3677_v46, %v3618_v19  ;;  %v3614_v62 = vunpack.c.l.bf16 %v5424_v0  ;;  %v5425_v19 = vld [vmem:[%s6162_s24 + $0x38] sm:$0xff]   ;;  %s4110_s24 = scalar_lea.sflag [#allocation5], %s6151_s7 }
 0xd13   : > { %v3730_v28 = vrot.slane %v3729_v34, 1  ;;  %v3734_v14 = vrot.slane %v3733_v11, 2  ;;  %v3738_v27 = vrot.slane %v3707_v49, 4  ;;  %v3622_v56 = vunpack.c.l.bf16 %v5425_v19 }
 0xd14   : > { %v3724_v23 = vrot.slane %v3723_v40, 1  ;;  %v3776_v26 = vrot.slane %v3775_v18, 2  ;;  %v3780_v5 = vrot.slane %v3714_v9, 4  ;;  %v3647_v25 = vpop.permute.xlu1 %3646  ;;  %v3615_v46 = vunpack.c.h.bf16 %v5424_v0 }
 0xd15   : > { %v3731_v39 = vadd.f32 %v3730_v28, %v3729_v34  ;;  %v3735_v17 = vadd.f32 %v3734_v14, %v3733_v11  ;;  %v3739_v47 = vadd.f32 %v3738_v27, %v3707_v49  ;;  %v3708_v41 = vmul.f32 %v3647_v25, %v3612_v60  ;;  %v3682_v61 = vpop.permute.xlu0 %3681 }
 0xd16   : > { %v3725_v24 = vadd.f32 %v3724_v23, %v3723_v40  ;;  %v3777_v52 = vadd.f32 %v3776_v26, %v3775_v18  ;;  %v3781_v22 = vadd.f32 %v3780_v5, %v3714_v9  ;;  %v3715_v50 = vmul.f32 %v3682_v61, %v3619_v4 }
 0xd17   : > { %v3736_v59 = vrot.slane %v3735_v17, 1  ;;  %v3740_v21 = vrot.slane %v3739_v47, 2  ;;  %v3744_v15 = vrot.slane %v3708_v41, 4  ;;  %v3817_v29 = vpack.c.bf16 %v3731_v39, %v3731_v39 }
 0xd18   : > { %v3778_v32 = vrot.slane %v3777_v52, 1  ;;  %v3782_v16 = vrot.slane %v3781_v22, 2  ;;  %v3786_v13 = vrot.slane %v3715_v50, 4  ;;  %v3652_v35 = vpop.permute.xlu1 %3651  ;;  %v3816_v43 = vpack.c.bf16 %v3725_v24, %v3725_v24 }
 0xd19   : > { %v3741_v31 = vadd.f32 %v3740_v21, %v3739_v47  ;;  %v3745_v6 = vadd.f32 %v3744_v15, %v3708_v41  ;;  %v3687_v58 = vpop.permute.xlu0 %3686  ;;  %v3737_v12 = vadd.f32 %v3736_v59, %v3735_v17  ;;  %v3709_v42 = vmul.f32 %v3652_v35, %v3613_v7 }
 0xd1a   : > { %v3783_v38 = vadd.f32 %v3782_v16, %v3781_v22  ;;  %v3787_v36 = vadd.f32 %v3786_v13, %v3715_v50  ;;  %v3779_v10 = vadd.f32 %v3778_v32, %v3777_v52  ;;  %v3872_v55 = vunpack.c.l.b16 %v3817_v29 }
 0xd1b   : > { %v3742_v57 = vrot.slane %v3741_v31, 1  ;;  %v3746_v30 = vrot.slane %v3745_v6, 2  ;;  %v3750_v44 = vrot.slane %v3709_v42, 4  ;;  %v3871_v53 = vunpack.c.l.b16 %v3816_v43 }
 0xd1c   : > { %v3667_v20 = vpop.permute.xlu1 %3666  ;;  %v3784_v54 = vrot.slane %v3783_v38, 1  ;;  %v3788_v1 = vrot.slane %v3787_v36, 2  ;;  %v3716_v3 = vmul.f32 %v3687_v58, %v3620_v51  ;;  %v3818_v34 = vpack.c.bf16 %v3737_v12, %v3737_v12 }
 0xd1d   : > { %v3692_v8 = vpop.permute.xlu0 %3691  ;;  %v3743_v11 = vadd.f32 %v3742_v57, %v3741_v31  ;;  %v3751_v49 = vadd.f32 %v3750_v44, %v3709_v42  ;;  %v3825_v33 = vpack.c.bf16 %v3779_v10, %v3779_v10  ;;  %v3712_v60 = vmul.f32 %v3667_v20, %v3616_v63 }
 0xd1e   : > { %v3792_v48 = vrot.slane %v3716_v3, 4  ;;  %v3623_v18 = vunpack.c.h.bf16 %v5425_v19  ;;  %v3785_v9 = vadd.f32 %v3784_v54, %v3783_v38  ;;  %v3747_v4 = vadd.f32 %v3746_v30, %v3745_v6 }
 0xd1f   : > { %v3752_v28 = vrot.slane %v3751_v49, 2  ;;  %v3717_v14 = vmul.f32 %v3692_v8, %v3621_v45  ;;  %v7392_v23 = vsel %vm3036_vm2, %v3872_v55, %v3871_v53  ;;  %v3789_v26 = vadd.f32 %v3788_v1, %v3787_v36 }
 0xd20   : > { %v3657_v40 = vpop.permute.xlu1 %3656  ;;  %v3793_v5 = vadd.f32 %v3792_v48, %v3716_v3  ;;  %v3768_v25 = vrot.slane %v3712_v60, 4  ;;  %v7394_v39 = vunpack.c.l.b16 %v3818_v34  ;;  %v3819_v17 = vpack.c.bf16 %v3743_v11, %v3743_v11 }
 0xd21   : > { %v3697_v27 = vpop.permute.xlu0 %3696  ;;  %v3753_v47 = vadd.f32 %v3752_v28, %v3751_v49  ;;  %v3798_v41 = vrot.slane %v3717_v14, 4  ;;  %v3880_v61 = vunpack.c.l.b16 %v3825_v33  ;;  %v3710_v22 = vmul.f32 %v3657_v40, %v3614_v62 }
 0xd22   : > { %v3794_v24 = vrot.slane %v3793_v5, 2  ;;  %v3769_v52 = vadd.f32 %v3768_v25, %v3712_v60  ;;  %v3826_v50 = vpack.c.bf16 %v3785_v9, %v3785_v9  ;;  %v3748_v59 = vrot.slane %v3747_v4, 1 }
 0xd23   : > { %v3799_v21 = vadd.f32 %v3798_v41, %v3717_v14  ;;  %v3718_v15 = vmul.f32 %v3697_v27, %v3622_v56  ;;  %v3790_v32 = vrot.slane %v3789_v26, 1  ;;  %v3756_v35 = vrot.slane %v3710_v22, 4 }
 0xd24   : > { %v3662_v7 = vpop.permute.xlu1 %3661  ;;  %v3795_v16 = vadd.f32 %v3794_v24, %v3793_v5  ;;  %v3770_v13 = vrot.slane %v3769_v52, 2  ;;  %v3874_v6 = vunpack.c.l.b16 %v3819_v17  ;;  %v3754_v37 = vrot.slane %v3753_v47, 1 }
 0xd25   : > { %v3702_v31 = vpop.permute.xlu0 %3701  ;;  %v3800_v51 = vrot.slane %v3799_v21, 2  ;;  %v3804_v58 = vrot.slane %v3718_v15, 4  ;;  %v3757_v38 = vadd.f32 %v3756_v35, %v3710_v22  ;;  %v3711_v36 = vmul.f32 %v3662_v7, %v3615_v46 }
 0xd26   : > { %v3796_v29 = vrot.slane %v3795_v16, 1  ;;  %v3771_v43 = vadd.f32 %v3770_v13, %v3769_v52  ;;  %v3749_v12 = vadd.f32 %v3748_v59, %v3747_v4  ;;  %v3719_v10 = vmul.f32 %v3702_v31, %v3623_v18 }
 0xd27   : > { %v3801_v57 = vadd.f32 %v3800_v51, %v3799_v21  ;;  %v3805_v42 = vadd.f32 %v3804_v58, %v3718_v15  ;;  %v3791_v63 = vadd.f32 %v3790_v32, %v3789_v26  ;;  %v3758_v45 = vrot.slane %v3757_v38, 2 }
 0xd28   : > { %v3772_v20 = vrot.slane %v3771_v43, 1  ;;  %v3762_v0 = vrot.slane %v3711_v36, 4  ;;  %v3797_v62 = vadd.f32 %v3796_v29, %v3795_v16  ;;  %v3810_v44 = vrot.slane %v3719_v10, 4 }
 0xd29   : > { %v3802_v54 = vrot.slane %v3801_v57, 1  ;;  %v3806_v30 = vrot.slane %v3805_v42, 2  ;;  %v3755_v8 = vadd.f32 %v3754_v37, %v3753_v47  ;;  %v3759_v56 = vadd.f32 %v3758_v45, %v3757_v38  ;;  %v4476_v45 = vld [vmem:[#allocation21] ss:$0 sm:$0xff] }
 0xd2a   : > { %v3773_v19 = vadd.f32 %v3772_v20, %v3771_v43  ;;  %v3763_v55 = vadd.f32 %v3762_v0, %v3711_v36  ;;  %v3820_v53 = vpack.c.bf16 %v3749_v12, %v3749_v12  ;;  %v3811_v34 = vadd.f32 %v3810_v44, %v3719_v10  ;;  %v5159_v10 = vld [vmem:[%s7490_s15 + $0x10] sm:$0xff]   ;;  %v5161_v20 = vld [vmem:[%s7490_s15] sm:$0xff]  }
 0xd2b   : > { %v3803_v1 = vadd.f32 %v3802_v54, %v3801_v57  ;;  %v3807_v3 = vadd.f32 %v3806_v30, %v3805_v42  ;;  %v3827_v11 = vpack.c.bf16 %v3791_v63, %v3791_v63  ;;  %v3760_v46 = vrot.slane %v3759_v56, 1  ;;  %4890 = vmatpush3.bf16.msra.mxu0 %v5159_v10  ;;  %v5160_v63 = vld [vmem:[%s7490_s15 + $0x8] sm:$0xff]  }
 0xd2c   : > { %v3824_v49 = vpack.c.bf16 %v3773_v19, %v3773_v19  ;;  %v3764_v33 = vrot.slane %v3763_v55, 2  ;;  %v3881_v48 = vunpack.c.l.b16 %v3826_v50  ;;  %v3828_v60 = vpack.c.bf16 %v3797_v62, %v3797_v62  ;;  %4891 = vmatprep.subr.bf16.mxu0 %v7602_v2 }
 0xd2d   : > { %v3808_v40 = vrot.slane %v3807_v3, 1  ;;  %v3812_v18 = vrot.slane %v3811_v34, 2  ;;  %v3821_v9 = vpack.c.bf16 %v3755_v8, %v3755_v8  ;;  %v3761_v28 = vadd.f32 %v3760_v46, %v3759_v56 }
 0xd2e   : > { %v3879_v4 = vunpack.c.l.b16 %v3824_v49  ;;  %v3765_v14 = vadd.f32 %v3764_v33, %v3763_v55  ;;  %v3875_v27 = vunpack.c.l.b16 %v3820_v53  ;;  %v3829_v26 = vpack.c.bf16 %v3803_v1, %v3803_v1  ;;  %v4485_v53 = vld [vmem:[%s7639_s4] ss:$0 sm:$0xff] }
 0xd2f   : > { %v3809_v5 = vadd.f32 %v3808_v40, %v3807_v3  ;;  %v3813_v25 = vadd.f32 %v3812_v18, %v3811_v34  ;;  %v3882_v17 = vunpack.c.l.b16 %v3827_v11  ;;  %v3822_v41 = vpack.c.bf16 %v3761_v28, %v3761_v28  ;;  %4892 = vmatpush3.bf16.msra.mxu0 %v5160_v63 }
 0xd30   : > { %v3894_v47 = vsel %vm3036_vm2, %v3880_v61, %v3879_v4  ;;  %v3766_v24 = vrot.slane %v3765_v14, 1  ;;  %v3883_v52 = vunpack.c.l.b16 %v3828_v60  ;;  %v3888_v21 = vsel %vm3038_vm3, %v7394_v39, %v7392_v23  ;;  %4893 = vmatprep.subr.bf16.mxu0 %v7602_v2 }
 0xd31   : > { %v3895_v22 = vsel %vm3038_vm3, %v3881_v48, %v3894_v47  ;;  %v3830_v50 = vpack.c.bf16 %v3809_v5, %v3809_v5  ;;  %v3814_v59 = vrot.slane %v3813_v25, 1  ;;  %v3876_v15 = vunpack.c.l.b16 %v3821_v9 }
 0xd32   : > { %v3896_v7 = vsel %vm3040_vm4, %v3882_v17, %v3895_v22  ;;  %v3767_v32 = vadd.f32 %v3766_v24, %v3765_v14  ;;  %v3884_v13 = vunpack.c.l.b16 %v3829_v26  ;;  %v3877_v35 = vunpack.c.l.b16 %v3822_v41 }
 0xd33   : > { %v3897_v16 = vsel %vm3042_vm5, %v3883_v52, %v3896_v7  ;;  %v3815_v61 = vadd.f32 %v3814_v59, %v3813_v25  ;;  %v3889_v31 = vsel %vm3040_vm4, %v3874_v6, %v3888_v21  ;;  %v3885_v37 = vunpack.c.l.b16 %v3830_v50  ;;  %4894 = vmatpush3.bf16.msra.mxu0 %v5161_v20 }
 0xd34   : > { %v3823_v51 = vpack.c.bf16 %v3767_v32, %v3767_v32  ;;  %v3890_v58 = vsel %vm3042_vm5, %v3875_v27, %v3889_v31  ;;  %v3898_v29 = vsel %vm3044_vm6, %v3884_v13, %v3897_v16 }
 0xd35   : > { %v3831_v43 = vpack.c.bf16 %v3815_v61, %v3815_v61  ;;  %v3891_v23 = vsel %vm3044_vm6, %v3876_v15, %v3890_v58  ;;  %v3899_v12 = vsel %vm3046_vm7, %v3885_v37, %v3898_v29 }
 0xd36   : > { %v3878_v39 = vunpack.c.l.b16 %v3823_v51  ;;  %v3892_v38 = vsel %vm3046_vm7, %v3877_v35, %v3891_v23 }
 0xd37   : > { %v3886_v36 = vunpack.c.l.b16 %v3831_v43 }
 0xd38   : > { %v3893_v57 = vsel %vm3048_vm8, %v3878_v39, %v3892_v38 }
 0xd39   : > { %v3900_v42 = vsel %vm3048_vm8, %v3886_v36, %v3899_v12 }
 0xd3a   : > { %v3901_v6 = vpack.c.b16 %v3900_v42, %v3893_v57 }
 0xd3c   : > { %4876 = vmatmul.mubr.bf16.vlgmr.msra.gmra.mxu1 %v3901_v6 }
 0xdfc   : > { %v3985_v0 = vpop.f32.mrf.mxu1 }
 0xdfd   : > { %v3986_v54 = vadd.f32 %v4476_v45, %v3985_v0 }
 0xdfe   : > { %v4877_v62 = vpop.f32.mrf.mxu1 }
 0xdff   : > { %v3992_v19 = vmax.f32 %v3986_v54, 0.0 }
 0xe00   : > { %v3988_v30 = vpop.f32.mrf.mxu1 }
 0xe01   : > { %v3989_v44 = vadd.f32 %v4476_v45, %v3988_v30 }
 0xe02   : > { %v4878_v8 = vpop.f32.mrf.mxu1 }
 0xe03   : > { %v3993_v56 = vmax.f32 %v3989_v44, 0.0 }
 0xe05   : > { %v3994_v55 = vpack.c.bf16 %v3993_v56, %v3992_v19 }
 0xe07   : > { %4896 = vmatmul.mubr.bf16.vlgmr.msra.gmra.mxu0 %v3994_v55 }
 0xec7   : > { %v4100_v2 = vpop.f32.mrf.mxu0 }
 0xec8   : > { %v4101_v1 = vadd.f32 %v4485_v53, %v4100_v2 }
 0xec9   : > { %v4897_v3 = vpop.f32.mrf.mxu0 }
 0xeca   : > { %4107 = vst [vmem:[%s783_s23] sm:$0xff] %v4101_v1 }
 0xecb   : > { %v4103_v34 = vpop.f32.mrf.mxu0 }
 0xecc   : > { %v4104_v11 = vadd.f32 %v4485_v53, %v4103_v34 }
 0xecd   : > { %v4898_v49 = vpop.f32.mrf.mxu0 }
 0xece   : > { %4108 = vst [vmem:[%s783_s23 + $0x8] sm:$0xff] %v4104_v11 }
 0xecf   : > { %5725 = shalt.err (!%p5722_p4)
}
 0xed0   : > { %s5726_s17 = scalar_lea.hbm %s7432_s21, 256  ;;  %s5730_s1 = scalar_lea.hbm %s7641_s20, 512 }
 0xed1   : > { %p5727_p7 = scmp.ne.s32.totalorder %s7432_s21, %s5726_s17  ;;  %p5731_p13 = scmp.lt.s32.totalorder %s7432_s21, %s7641_s20 }
 0xed2   : > { %p5732_p12 = scmp.lt.s32.totalorder %s5730_s1, %s5726_s17 }
 0xed3   : > { %p5728_p2 = pnand %p5727_p7, %p7642_p1 }
 0xed4   : > { %p5733_p5 = por %p5732_p12, %p5731_p13 }
 0xed5   : > { %p5729_p0 = pneg %p5728_p2 }
 0xed7   : > { %p5734_p3 = pnand %p5733_p5, %p5729_p0 }
 0xed9   : > { %5737 = shalt.err (!%p5734_p3)
}
 0xeda   : > { %s5834_s23 = smov 128   ;;  %s5835_s19 = smov 8  }
 0xedb   : > { %4954 = dma.vmem_to_hbm [thread:$0]  (%p7642_p1), %s7427_s16, 256, %s7432_s21, %s4110_s24, %s5834_s23, %s5834_s23, %s5835_s19  }
 0xedc PF: > { %s7643_s26 = sld [smem:[#allocation36_spill]] }
 0xedd   : > { %s7644_s9 = sld [smem:[#allocation40_spill]] }
 0xee2   : > { %s4138_s18 = sand.u32 1, %s7643_s26  }
 0xee3   : > { %p7645_p9 = scmp.ne.s32.totalorder %s7644_s9, 0  ;;  %s4139_s12 = scalar_lea.sflag [#allocation5], %s4138_s18 }
 0xee5   : > { %p4988_p8 = pnand %p4338_p6, %p7645_p9 }
 0xee7   : > { %p4989_p10 = pneg %p4988_p8 }
 0xee9   : > { %5787 = dma.done.wait (%p4989_p10), %s4139_s12, 256  }
 0xeea   : > { %5789 = vsyncadd (%p4989_p10), %s4139_s12, 4294967040  ;;  %s7646_s29 = sld [smem:[#allocation37_spill]]  ;;  %s7648_s26 = smov %s5796_s27 }
 0xeeb   : > { %s7647_s30 = sld [smem:[#allocation38_spill]]  ;;  %s7649_s27 = smov %s5800_s28 }
 0xef0   : > { %p39_p11 = scmp.ge.s32.totalorder %s7646_s29, 4  }
 0xef1   : > { %s7650_s28 = smov %s7647_s30 }
 0xef2   :  { %41 = sbr.rel (!%p39_p11) target bundleno = 24 (0x18), region = 194 }
 0xef7   :  { %4144 = vsyncpa [#allocation4], 1 }
 0xef8   :  { %4146 = vsyncpa [#allocation4 + $0x1], 1 }
 0xef9   :  { %4147 = vsyncpa [#allocation7], 1 }
 0xefa   :  { %4149 = vsyncpa [#allocation7 + $0x1], 1 }
 0xefb   :  { %4150 = vsyncpa [#allocation10], 1 }
 0xefc   :  { %4151 = vsyncpa [#allocation13], 1 }
 0xefd   :  { %4152 = vsyncpa [#allocation16], 1 }
 0xefe   :  { %4153 = vsyncpa [#allocation19], 1 }
 0xeff   :  { %4154 = vsyncpa [#allocation22], 1 }
 0xf00   :  { %4155 = vsyncpa [#allocation5], 1 }
 0xf01   :  { %4157 = vsyncpa [#allocation5 + $0x1], 1 }

</bundles_post_ra>
